<compile_context>
chip_gen: v6e
topology: v6e:2x2x1
jax: 0.10.0
libtpu: 0.0.40
codegen_flags: <defaults>
</compile_context>

<pallas_src>
import functools

import jax
import jax.numpy as jnp
import numpy as np
from jax.experimental import pallas as pl
from jax.experimental.pallas import tpu as pltpu

MODES = 8      # kept Fourier modes (modes <= N // 2)
WIDTH = 32     # channel width
NPTS = 64      # spatial points
NLAYERS = 4    # number of Fourier blocks
BATCH = 2


def _fno_kernel(x_ref, pw_ref, pb_ref, f_ref, t_ref, m0_ref, msgn_ref,
                g_ref, wr_ref, wc_ref, wb_ref, qwt_ref, qb_ref, o_ref,
                *, n_layers, modes, batch):
    """Fully fused FNO forward (single invocation, batch folded into rows).

    Shapes (K=modes, C=width, B=batch, N=spatial, BN=B*N):
      x_ref    (BN, 1)        input samples
      pw/pb    (1, C)         P = Linear(1, C)
      f_ref    (2*B*2K, BN)   block-diag truncated real-DFT; rows [0, 2BK) give
                              per-batch [Re(rfft); Im(rfft)], rows [2BK, 4BK)
                              the swapped order [Im; Re]
      t_ref    (C, K*C)       lane-tiling matrix (identity tiled K times)
      m0/msgn  (B*2K, K*C)    block-diagonal per-mode masks (msgn carries -Im)
      g_ref    (BN, B*2K)     block-diag irfft weights [gc | gs]
      wr_ref   (L, 2*K*C, C)  stacked, flattened [Re(R); Im(R)] per layer
      wc/wb    (L, C, C) / (L, 1, C)  pointwise Conv1d weight (transposed)+bias
      qwt/qb   (1, C) / (1, 1) Q = Linear(C, 1), stored transposed
      o_ref    (1, BN)        lane-dense output row
    """
    half = 2 * modes * batch                    # = B*2K rows of spectral data

    # P: Linear(1, width)  ->  (BN, C)
    h = x_ref[...] * pw_ref[...] + pb_ref[...]

    f_all = f_ref[...]                          # loaded once, reused all layers
    t_tile = t_ref[...]
    m0 = m0_ref[...]
    msgn = msgn_ref[...]
    g_left = g_ref[...]

    for l in range(n_layers):
        # Truncated rfft of every channel, natural and swapped row order, for
        # all batches at once: one (4BK, BN) x (BN, C) matmul.
        d = jnp.dot(f_all, h, preferred_element_type=jnp.float32)        # (4BK, C)
        # Tile channels across the K mode slots; masking makes the per-mode
        # complex multiply a single dense matmul against the flattened R.
        t_all = jnp.dot(d, t_tile, preferred_element_type=jnp.float32)   # (4BK, KC)
        x_re = t_all[:half, :] * m0          # pairs with Re(R)
        x_im = t_all[half:, :] * msgn        # pairs with Im(R), sign folded in
        x_bd = jnp.concatenate([x_re, x_im], axis=1)                     # (2BK, 2KC)
        y_all = jnp.dot(x_bd, wr_ref[l],
                        preferred_element_type=jnp.float32)              # (2BK, C)
        # irfft (block-diag [gc|gs]) + pointwise conv W + bias + ReLU.
        v1 = jnp.dot(g_left, y_all, preferred_element_type=jnp.float32)  # (BN, C)
        v2 = jnp.dot(h, wc_ref[l], preferred_element_type=jnp.float32)   # (BN, C)
        h = jnp.maximum(v1 + v2 + wb_ref[l], 0.0)

    # Q: Linear(width, 1), produced lane-dense as a (1, BN) row.
    out = jnp.dot(qwt_ref[...], h.T,
                  preferred_element_type=jnp.float32) + qb_ref[...]
    o_ref[...] = out.astype(o_ref.dtype)


def _block_diag(block, reps):
    r, c = block.shape
    out = np.zeros((reps * r, reps * c), np.float64)
    for b in range(reps):
        out[b * r:(b + 1) * r, b * c:(b + 1) * c] = block
    return out


def pack_kernel_params(params, batch, n, modes=MODES, width=WIDTH,
                       n_layers=NLAYERS):
    """Pre-reshape / pre-stack every constant the kernel needs (all f32)."""
    pw, pb, rr, ri, wc, wb, qw, qb = params
    K, C = modes, width

    nn_ = np.arange(n)
    kk = np.arange(K)
    # rfft (unnormalized): xr = fc @ h, xi = fs @ h
    ang_f = 2.0 * np.pi * np.outer(kk, nn_) / n                     # (K, N)
    fc = np.cos(ang_f)
    fs = -np.sin(ang_f)
    # irfft weights for the first K modes (w_k handles DC/Nyquist weighting)
    w_k = np.where((kk == 0) | ((n % 2 == 0) & (kk == n // 2)), 1.0, 2.0)
    ang_i = 2.0 * np.pi * np.outer(nn_, kk) / n                     # (N, K)
    gc = (w_k[None, :] / n) * np.cos(ang_i)
    gs = -(w_k[None, :] / n) * np.sin(ang_i)

    # Block-diag (over batch) truncated DFT, natural ([Re; Im]) and swapped
    # ([Im; Re]) row order, stacked so one matmul yields both.
    fcs = np.concatenate([fc, fs], axis=0)
    fsw = np.concatenate([fs, fc], axis=0)
    f_all = np.concatenate([_block_diag(fcs, batch),
                            _block_diag(fsw, batch)], axis=0)       # (4BK, BN)

    # Lane-tiling matrix and block-diagonal per-mode masks.
    t_tile = np.tile(np.eye(C), (1, K))                             # (C, KC)
    r_idx = np.arange(2 * K)
    col_mode = np.repeat(np.arange(K), C)
    m0_blk = (r_idx[:, None] % K == col_mode[None, :]).astype(np.float64)
    sgn = np.where(r_idx < K, -1.0, 1.0)[:, None]
    m0_all = np.tile(m0_blk, (batch, 1))                            # (B*2K, KC)
    msgn_all = np.tile(m0_blk * sgn, (batch, 1))

    # Block-diag irfft weights [gc | gs] per batch.
    gcs_bd = _block_diag(np.concatenate([gc, gs], axis=1), batch)   # (BN, B*2K)

    # Per-layer spectral weights, pre-flattened and stacked: (L, 2*K*C, C).
    rr_np = np.asarray(rr).reshape(n_layers, K * C, C)
    ri_np = np.asarray(ri).reshape(n_layers, K * C, C)
    w_r = np.concatenate([rr_np, ri_np], axis=1)

    f32 = lambda a: jnp.asarray(a, jnp.float32)
    return (pw, pb, f32(f_all), f32(t_tile), f32(m0_all), f32(msgn_all),
            f32(gcs_bd), f32(w_r), wc, wb,
            jnp.reshape(qw, (1, width)), qb)


def fno_forward(x, params, modes=MODES, width=WIDTH, n_layers=NLAYERS):
    B, N, _ = x.shape
    kparams = pack_kernel_params(params, B, N, modes, width, n_layers)
    kernel = functools.partial(_fno_kernel, n_layers=n_layers, modes=modes,
                               batch=B)
    n_inputs = 1 + len(kparams)
    # Whole problem (< 0.5 MiB) lives in VMEM for a single fused invocation:
    # no grid, full-array VMEM blocks for every operand.
    vmem_spec = pl.BlockSpec(memory_space=pltpu.MemorySpace.VMEM)
    out = pl.pallas_call(
        kernel,
        out_shape=jax.ShapeDtypeStruct((1, B * N), jnp.float32),
        in_specs=[vmem_spec] * n_inputs,
        out_specs=vmem_spec,
    )(x.reshape(B * N, 1), *kparams)
    return out.reshape(B, N, 1)


def init_params(key, width=WIDTH, modes=MODES, n_layers=NLAYERS):
    keys = jax.random.split(key, 8)
    scale_r = 1.0 / (width * width)
    # P: Linear(1, width) stored as (1, C) weight and (1, C) bias
    pw = 0.5 * jax.random.normal(keys[0], (1, width), jnp.float32)
    pb = 0.1 * jax.random.normal(keys[1], (1, width), jnp.float32)
    # FourierLayer complex weights R stored as (layer, k, Cin, Cout)
    rr = scale_r * jax.random.normal(keys[2], (n_layers, modes, width, width),
                                     jnp.float32)
    ri = scale_r * jax.random.normal(keys[3], (n_layers, modes, width, width),
                                     jnp.float32)
    # Conv1d(width, width, 1) stored transposed: wc[l, c_in, c_out]
    wc = (1.0 / np.sqrt(width)) * jax.random.normal(
        keys[4], (n_layers, width, width), jnp.float32)
    wb = 0.1 * jax.random.normal(keys[5], (n_layers, 1, width), jnp.float32)
    # Q: Linear(width, 1)
    qw = (1.0 / np.sqrt(width)) * jax.random.normal(keys[6], (width, 1),
                                                    jnp.float32)
    qb = 0.1 * jax.random.normal(keys[7], (1, 1), jnp.float32)
    return (pw, pb, rr, ri, wc, wb, qw, qb)


def reference_forward(x, params, modes=MODES, n_layers=NLAYERS):
    """Pure-JAX reference mirroring the PyTorch module (uses real FFTs)."""
    pw, pb, rr, ri, wc, wb, qw, qb = params
    B, N, _ = x.shape
    h = x * pw + pb                        # (B, N, C)   == self.P(x)
    h = jnp.transpose(h, (0, 2, 1))        # (B, C, N)   == permute(0, 2, 1)
    for l in range(n_layers):
        xft = jnp.fft.rfft(h, axis=-1)                              # (B, C, N//2+1)
        R = (jnp.transpose(rr[l], (1, 2, 0))
             + 1j * jnp.transpose(ri[l], (1, 2, 0)))                # (Cin, Cout, K)
        y = jnp.zeros((B, h.shape[1], N // 2 + 1), jnp.complex64)
        y = y.at[:, :, :modes].set(
            jnp.einsum('bnk,nmk->bmk',
                       xft[:, :, :modes].astype(jnp.complex64), R))
        v1 = jnp.fft.irfft(y, n=N, axis=-1)
        v2 = jnp.einsum('bcn,cm->bmn', h, wc[l]) + wb[l][0][None, :, None]
        h = jax.nn.relu(v1 + v2)
    h = jnp.transpose(h, (0, 2, 1))        # (B, N, C)
    return h @ qw + qb                     # (B, N, 1)   == self.Q(x)


if __name__ == "__main__":
    key = jax.random.PRNGKey(0)
    kx, kp = jax.random.split(key)
    x = jax.random.normal(kx, (BATCH, NPTS, 1), jnp.float32)
    params = init_params(kp)

    out = fno_forward(x, params)
    out = jax.block_until_ready(out)
    assert out.shape == (BATCH, NPTS, 1)

    ref = reference_forward(x, params)
    np.testing.assert_allclose(np.asarray(out), np.asarray(ref),
                               rtol=2e-3, atol=2e-4)
    print("KERNEL_OK")
</pallas_src>

<mosaic_0001>
module attributes {stable_mosaic.version = 11 : i64} {
  func.func @_fno_kernel(%arg0: memref<128x1xf32, #tpu.memory_space<vmem>>, %arg1: memref<1x32xf32, #tpu.memory_space<vmem>>, %arg2: memref<1x32xf32, #tpu.memory_space<vmem>>, %arg3: memref<64x128xf32, #tpu.memory_space<vmem>>, %arg4: memref<32x256xf32, #tpu.memory_space<vmem>>, %arg5: memref<32x256xf32, #tpu.memory_space<vmem>>, %arg6: memref<32x256xf32, #tpu.memory_space<vmem>>, %arg7: memref<128x32xf32, #tpu.memory_space<vmem>>, %arg8: memref<4x512x32xf32, #tpu.memory_space<vmem>>, %arg9: memref<4x32x32xf32, #tpu.memory_space<vmem>>, %arg10: memref<4x1x32xf32, #tpu.memory_space<vmem>>, %arg11: memref<1x32xf32, #tpu.memory_space<vmem>>, %arg12: memref<1x1xf32, #tpu.memory_space<vmem>>, %arg13: memref<1x128xf32, #tpu.memory_space<vmem>>) attributes {dimension_semantics = [], scalar_prefetch = 0 : i64, scratch_operands = 0 : i64, tpu.core_type = #tpu.core_type<tc>} {
    %c0 = arith.constant 0 : index
    %c0_0 = arith.constant 0 : index
    %0 = vector.load %arg0[%c0, %c0_0] : memref<128x1xf32, #tpu.memory_space<vmem>>, vector<128x1xf32>
    %c0_1 = arith.constant 0 : index
    %c0_2 = arith.constant 0 : index
    %1 = vector.load %arg1[%c0_1, %c0_2] : memref<1x32xf32, #tpu.memory_space<vmem>>, vector<1x32xf32>
    %2 = vector.broadcast %0 : vector<128x1xf32> to vector<128x32xf32>
    %3 = vector.broadcast %1 : vector<1x32xf32> to vector<128x32xf32>
    %4 = arith.mulf %2, %3 : vector<128x32xf32>
    %c0_3 = arith.constant 0 : index
    %c0_4 = arith.constant 0 : index
    %5 = vector.load %arg2[%c0_3, %c0_4] : memref<1x32xf32, #tpu.memory_space<vmem>>, vector<1x32xf32>
    %6 = vector.broadcast %5 : vector<1x32xf32> to vector<128x32xf32>
    %7 = arith.addf %4, %6 : vector<128x32xf32>
    %c0_5 = arith.constant 0 : index
    %c0_6 = arith.constant 0 : index
    %8 = vector.load %arg3[%c0_5, %c0_6] : memref<64x128xf32, #tpu.memory_space<vmem>>, vector<64x128xf32>
    %c0_7 = arith.constant 0 : index
    %c0_8 = arith.constant 0 : index
    %9 = vector.load %arg4[%c0_7, %c0_8] : memref<32x256xf32, #tpu.memory_space<vmem>>, vector<32x256xf32>
    %c0_9 = arith.constant 0 : index
    %c0_10 = arith.constant 0 : index
    %10 = vector.load %arg5[%c0_9, %c0_10] : memref<32x256xf32, #tpu.memory_space<vmem>>, vector<32x256xf32>
    %c0_11 = arith.constant 0 : index
    %c0_12 = arith.constant 0 : index
    %11 = vector.load %arg6[%c0_11, %c0_12] : memref<32x256xf32, #tpu.memory_space<vmem>>, vector<32x256xf32>
    %c0_13 = arith.constant 0 : index
    %c0_14 = arith.constant 0 : index
    %12 = vector.load %arg7[%c0_13, %c0_14] : memref<128x32xf32, #tpu.memory_space<vmem>>, vector<128x32xf32>
    %cst = arith.constant dense<0.000000e+00> : vector<64x32xf32>
    %13 = tpu.matmul %8, %7, %cst {dimension_numbers = #tpu.dot_dimension_numbers<[1], [0], [0], [1], [0, 0, 1, 1], [], []>} : vector<64x128xf32>, vector<128x32xf32>, vector<64x32xf32> -> vector<64x32xf32>
    %cst_15 = arith.constant dense<0.000000e+00> : vector<64x256xf32>
    %14 = tpu.matmul %13, %9, %cst_15 {dimension_numbers = #tpu.dot_dimension_numbers<[1], [0], [0], [1], [0, 0, 1, 1], [], []>} : vector<64x32xf32>, vector<32x256xf32>, vector<64x256xf32> -> vector<64x256xf32>
    %15 = vector.extract_strided_slice %14 {offsets = [0, 0], sizes = [32, 256], strides = [1, 1]} : vector<64x256xf32> to vector<32x256xf32>
    %16 = arith.mulf %15, %10 : vector<32x256xf32>
    %17 = vector.extract_strided_slice %14 {offsets = [32, 0], sizes = [32, 256], strides = [1, 1]} : vector<64x256xf32> to vector<32x256xf32>
    %18 = arith.mulf %17, %11 : vector<32x256xf32>
    %19 = tpu.concatenate %16, %18 in 1 : vector<32x256xf32>, vector<32x256xf32> -> vector<32x512xf32>
    %c0_16 = arith.constant 0 : index
    %c0_17 = arith.constant 0 : index
    %c0_18 = arith.constant 0 : index
    %20 = vector.load %arg8[%c0_16, %c0_17, %c0_18] : memref<4x512x32xf32, #tpu.memory_space<vmem>>, vector<1x512x32xf32>
    %21 = vector.shape_cast %20 : vector<1x512x32xf32> to vector<512x32xf32>
    %cst_19 = arith.constant dense<0.000000e+00> : vector<32x32xf32>
    %22 = tpu.matmul %19, %21, %cst_19 {dimension_numbers = #tpu.dot_dimension_numbers<[1], [0], [0], [1], [0, 0, 1, 1], [], []>} : vector<32x512xf32>, vector<512x32xf32>, vector<32x32xf32> -> vector<32x32xf32>
    %cst_20 = arith.constant dense<0.000000e+00> : vector<128x32xf32>
    %23 = tpu.matmul %12, %22, %cst_20 {dimension_numbers = #tpu.dot_dimension_numbers<[1], [0], [0], [1], [0, 0, 1, 1], [], []>} : vector<128x32xf32>, vector<32x32xf32>, vector<128x32xf32> -> vector<128x32xf32>
    %c0_21 = arith.constant 0 : index
    %c0_22 = arith.constant 0 : index
    %c0_23 = arith.constant 0 : index
    %24 = vector.load %arg9[%c0_21, %c0_22, %c0_23] : memref<4x32x32xf32, #tpu.memory_space<vmem>>, vector<1x32x32xf32>
    %25 = vector.shape_cast %24 : vector<1x32x32xf32> to vector<32x32xf32>
    %cst_24 = arith.constant dense<0.000000e+00> : vector<128x32xf32>
    %26 = tpu.matmul %7, %25, %cst_24 {dimension_numbers = #tpu.dot_dimension_numbers<[1], [0], [0], [1], [0, 0, 1, 1], [], []>} : vector<128x32xf32>, vector<32x32xf32>, vector<128x32xf32> -> vector<128x32xf32>
    %27 = arith.addf %23, %26 : vector<128x32xf32>
    %c0_25 = arith.constant 0 : index
    %c0_26 = arith.constant 0 : index
    %c0_27 = arith.constant 0 : index
    %28 = vector.load %arg10[%c0_25, %c0_26, %c0_27] : memref<4x1x32xf32, #tpu.memory_space<vmem>>, vector<1x1x32xf32>
    %29 = vector.shape_cast %28 : vector<1x1x32xf32> to vector<1x32xf32>
    %30 = vector.broadcast %29 : vector<1x32xf32> to vector<128x32xf32>
    %31 = arith.addf %27, %30 : vector<128x32xf32>
    %cst_28 = arith.constant 0.000000e+00 : f32
    %32 = vector.broadcast %cst_28 : f32 to vector<128x32xf32>
    %33 = arith.maximumf %31, %32 : vector<128x32xf32>
    %cst_29 = arith.constant dense<0.000000e+00> : vector<64x32xf32>
    %34 = tpu.matmul %8, %33, %cst_29 {dimension_numbers = #tpu.dot_dimension_numbers<[1], [0], [0], [1], [0, 0, 1, 1], [], []>} : vector<64x128xf32>, vector<128x32xf32>, vector<64x32xf32> -> vector<64x32xf32>
    %cst_30 = arith.constant dense<0.000000e+00> : vector<64x256xf32>
    %35 = tpu.matmul %34, %9, %cst_30 {dimension_numbers = #tpu.dot_dimension_numbers<[1], [0], [0], [1], [0, 0, 1, 1], [], []>} : vector<64x32xf32>, vector<32x256xf32>, vector<64x256xf32> -> vector<64x256xf32>
    %36 = vector.extract_strided_slice %35 {offsets = [0, 0], sizes = [32, 256], strides = [1, 1]} : vector<64x256xf32> to vector<32x256xf32>
    %37 = arith.mulf %36, %10 : vector<32x256xf32>
    %38 = vector.extract_strided_slice %35 {offsets = [32, 0], sizes = [32, 256], strides = [1, 1]} : vector<64x256xf32> to vector<32x256xf32>
    %39 = arith.mulf %38, %11 : vector<32x256xf32>
    %40 = tpu.concatenate %37, %39 in 1 : vector<32x256xf32>, vector<32x256xf32> -> vector<32x512xf32>
    %c1 = arith.constant 1 : index
    %c0_31 = arith.constant 0 : index
    %c0_32 = arith.constant 0 : index
    %41 = vector.load %arg8[%c1, %c0_31, %c0_32] : memref<4x512x32xf32, #tpu.memory_space<vmem>>, vector<1x512x32xf32>
    %42 = vector.shape_cast %41 : vector<1x512x32xf32> to vector<512x32xf32>
    %cst_33 = arith.constant dense<0.000000e+00> : vector<32x32xf32>
    %43 = tpu.matmul %40, %42, %cst_33 {dimension_numbers = #tpu.dot_dimension_numbers<[1], [0], [0], [1], [0, 0, 1, 1], [], []>} : vector<32x512xf32>, vector<512x32xf32>, vector<32x32xf32> -> vector<32x32xf32>
    %cst_34 = arith.constant dense<0.000000e+00> : vector<128x32xf32>
    %44 = tpu.matmul %12, %43, %cst_34 {dimension_numbers = #tpu.dot_dimension_numbers<[1], [0], [0], [1], [0, 0, 1, 1], [], []>} : vector<128x32xf32>, vector<32x32xf32>, vector<128x32xf32> -> vector<128x32xf32>
    %c1_35 = arith.constant 1 : index
    %c0_36 = arith.constant 0 : index
    %c0_37 = arith.constant 0 : index
    %45 = vector.load %arg9[%c1_35, %c0_36, %c0_37] : memref<4x32x32xf32, #tpu.memory_space<vmem>>, vector<1x32x32xf32>
    %46 = vector.shape_cast %45 : vector<1x32x32xf32> to vector<32x32xf32>
    %cst_38 = arith.constant dense<0.000000e+00> : vector<128x32xf32>
    %47 = tpu.matmul %33, %46, %cst_38 {dimension_numbers = #tpu.dot_dimension_numbers<[1], [0], [0], [1], [0, 0, 1, 1], [], []>} : vector<128x32xf32>, vector<32x32xf32>, vector<128x32xf32> -> vector<128x32xf32>
    %48 = arith.addf %44, %47 : vector<128x32xf32>
    %c1_39 = arith.constant 1 : index
    %c0_40 = arith.constant 0 : index
    %c0_41 = arith.constant 0 : index
    %49 = vector.load %arg10[%c1_39, %c0_40, %c0_41] : memref<4x1x32xf32, #tpu.memory_space<vmem>>, vector<1x1x32xf32>
    %50 = vector.shape_cast %49 : vector<1x1x32xf32> to vector<1x32xf32>
    %51 = vector.broadcast %50 : vector<1x32xf32> to vector<128x32xf32>
    %52 = arith.addf %48, %51 : vector<128x32xf32>
    %cst_42 = arith.constant 0.000000e+00 : f32
    %53 = vector.broadcast %cst_42 : f32 to vector<128x32xf32>
    %54 = arith.maximumf %52, %53 : vector<128x32xf32>
    %cst_43 = arith.constant dense<0.000000e+00> : vector<64x32xf32>
    %55 = tpu.matmul %8, %54, %cst_43 {dimension_numbers = #tpu.dot_dimension_numbers<[1], [0], [0], [1], [0, 0, 1, 1], [], []>} : vector<64x128xf32>, vector<128x32xf32>, vector<64x32xf32> -> vector<64x32xf32>
    %cst_44 = arith.constant dense<0.000000e+00> : vector<64x256xf32>
    %56 = tpu.matmul %55, %9, %cst_44 {dimension_numbers = #tpu.dot_dimension_numbers<[1], [0], [0], [1], [0, 0, 1, 1], [], []>} : vector<64x32xf32>, vector<32x256xf32>, vector<64x256xf32> -> vector<64x256xf32>
    %57 = vector.extract_strided_slice %56 {offsets = [0, 0], sizes = [32, 256], strides = [1, 1]} : vector<64x256xf32> to vector<32x256xf32>
    %58 = arith.mulf %57, %10 : vector<32x256xf32>
    %59 = vector.extract_strided_slice %56 {offsets = [32, 0], sizes = [32, 256], strides = [1, 1]} : vector<64x256xf32> to vector<32x256xf32>
    %60 = arith.mulf %59, %11 : vector<32x256xf32>
    %61 = tpu.concatenate %58, %60 in 1 : vector<32x256xf32>, vector<32x256xf32> -> vector<32x512xf32>
    %c2 = arith.constant 2 : index
    %c0_45 = arith.constant 0 : index
    %c0_46 = arith.constant 0 : index
    %62 = vector.load %arg8[%c2, %c0_45, %c0_46] : memref<4x512x32xf32, #tpu.memory_space<vmem>>, vector<1x512x32xf32>
    %63 = vector.shape_cast %62 : vector<1x512x32xf32> to vector<512x32xf32>
    %cst_47 = arith.constant dense<0.000000e+00> : vector<32x32xf32>
    %64 = tpu.matmul %61, %63, %cst_47 {dimension_numbers = #tpu.dot_dimension_numbers<[1], [0], [0], [1], [0, 0, 1, 1], [], []>} : vector<32x512xf32>, vector<512x32xf32>, vector<32x32xf32> -> vector<32x32xf32>
    %cst_48 = arith.constant dense<0.000000e+00> : vector<128x32xf32>
    %65 = tpu.matmul %12, %64, %cst_48 {dimension_numbers = #tpu.dot_dimension_numbers<[1], [0], [0], [1], [0, 0, 1, 1], [], []>} : vector<128x32xf32>, vector<32x32xf32>, vector<128x32xf32> -> vector<128x32xf32>
    %c2_49 = arith.constant 2 : index
    %c0_50 = arith.constant 0 : index
    %c0_51 = arith.constant 0 : index
    %66 = vector.load %arg9[%c2_49, %c0_50, %c0_51] : memref<4x32x32xf32, #tpu.memory_space<vmem>>, vector<1x32x32xf32>
    %67 = vector.shape_cast %66 : vector<1x32x32xf32> to vector<32x32xf32>
    %cst_52 = arith.constant dense<0.000000e+00> : vector<128x32xf32>
    %68 = tpu.matmul %54, %67, %cst_52 {dimension_numbers = #tpu.dot_dimension_numbers<[1], [0], [0], [1], [0, 0, 1, 1], [], []>} : vector<128x32xf32>, vector<32x32xf32>, vector<128x32xf32> -> vector<128x32xf32>
    %69 = arith.addf %65, %68 : vector<128x32xf32>
    %c2_53 = arith.constant 2 : index
    %c0_54 = arith.constant 0 : index
    %c0_55 = arith.constant 0 : index
    %70 = vector.load %arg10[%c2_53, %c0_54, %c0_55] : memref<4x1x32xf32, #tpu.memory_space<vmem>>, vector<1x1x32xf32>
    %71 = vector.shape_cast %70 : vector<1x1x32xf32> to vector<1x32xf32>
    %72 = vector.broadcast %71 : vector<1x32xf32> to vector<128x32xf32>
    %73 = arith.addf %69, %72 : vector<128x32xf32>
    %cst_56 = arith.constant 0.000000e+00 : f32
    %74 = vector.broadcast %cst_56 : f32 to vector<128x32xf32>
    %75 = arith.maximumf %73, %74 : vector<128x32xf32>
    %cst_57 = arith.constant dense<0.000000e+00> : vector<64x32xf32>
    %76 = tpu.matmul %8, %75, %cst_57 {dimension_numbers = #tpu.dot_dimension_numbers<[1], [0], [0], [1], [0, 0, 1, 1], [], []>} : vector<64x128xf32>, vector<128x32xf32>, vector<64x32xf32> -> vector<64x32xf32>
    %cst_58 = arith.constant dense<0.000000e+00> : vector<64x256xf32>
    %77 = tpu.matmul %76, %9, %cst_58 {dimension_numbers = #tpu.dot_dimension_numbers<[1], [0], [0], [1], [0, 0, 1, 1], [], []>} : vector<64x32xf32>, vector<32x256xf32>, vector<64x256xf32> -> vector<64x256xf32>
    %78 = vector.extract_strided_slice %77 {offsets = [0, 0], sizes = [32, 256], strides = [1, 1]} : vector<64x256xf32> to vector<32x256xf32>
    %79 = arith.mulf %78, %10 : vector<32x256xf32>
    %80 = vector.extract_strided_slice %77 {offsets = [32, 0], sizes = [32, 256], strides = [1, 1]} : vector<64x256xf32> to vector<32x256xf32>
    %81 = arith.mulf %80, %11 : vector<32x256xf32>
    %82 = tpu.concatenate %79, %81 in 1 : vector<32x256xf32>, vector<32x256xf32> -> vector<32x512xf32>
    %c3 = arith.constant 3 : index
    %c0_59 = arith.constant 0 : index
    %c0_60 = arith.constant 0 : index
    %83 = vector.load %arg8[%c3, %c0_59, %c0_60] : memref<4x512x32xf32, #tpu.memory_space<vmem>>, vector<1x512x32xf32>
    %84 = vector.shape_cast %83 : vector<1x512x32xf32> to vector<512x32xf32>
    %cst_61 = arith.constant dense<0.000000e+00> : vector<32x32xf32>
    %85 = tpu.matmul %82, %84, %cst_61 {dimension_numbers = #tpu.dot_dimension_numbers<[1], [0], [0], [1], [0, 0, 1, 1], [], []>} : vector<32x512xf32>, vector<512x32xf32>, vector<32x32xf32> -> vector<32x32xf32>
    %cst_62 = arith.constant dense<0.000000e+00> : vector<128x32xf32>
    %86 = tpu.matmul %12, %85, %cst_62 {dimension_numbers = #tpu.dot_dimension_numbers<[1], [0], [0], [1], [0, 0, 1, 1], [], []>} : vector<128x32xf32>, vector<32x32xf32>, vector<128x32xf32> -> vector<128x32xf32>
    %c3_63 = arith.constant 3 : index
    %c0_64 = arith.constant 0 : index
    %c0_65 = arith.constant 0 : index
    %87 = vector.load %arg9[%c3_63, %c0_64, %c0_65] : memref<4x32x32xf32, #tpu.memory_space<vmem>>, vector<1x32x32xf32>
    %88 = vector.shape_cast %87 : vector<1x32x32xf32> to vector<32x32xf32>
    %cst_66 = arith.constant dense<0.000000e+00> : vector<128x32xf32>
    %89 = tpu.matmul %75, %88, %cst_66 {dimension_numbers = #tpu.dot_dimension_numbers<[1], [0], [0], [1], [0, 0, 1, 1], [], []>} : vector<128x32xf32>, vector<32x32xf32>, vector<128x32xf32> -> vector<128x32xf32>
    %90 = arith.addf %86, %89 : vector<128x32xf32>
    %c3_67 = arith.constant 3 : index
    %c0_68 = arith.constant 0 : index
    %c0_69 = arith.constant 0 : index
    %91 = vector.load %arg10[%c3_67, %c0_68, %c0_69] : memref<4x1x32xf32, #tpu.memory_space<vmem>>, vector<1x1x32xf32>
    %92 = vector.shape_cast %91 : vector<1x1x32xf32> to vector<1x32xf32>
    %93 = vector.broadcast %92 : vector<1x32xf32> to vector<128x32xf32>
    %94 = arith.addf %90, %93 : vector<128x32xf32>
    %cst_70 = arith.constant 0.000000e+00 : f32
    %95 = vector.broadcast %cst_70 : f32 to vector<128x32xf32>
    %96 = arith.maximumf %94, %95 : vector<128x32xf32>
    %c0_71 = arith.constant 0 : index
    %c0_72 = arith.constant 0 : index
    %97 = vector.load %arg11[%c0_71, %c0_72] : memref<1x32xf32, #tpu.memory_space<vmem>>, vector<1x32xf32>
    %98 = tpu.transpose %96, [1, 0] : vector<128x32xf32> -> vector<32x128xf32>
    %cst_73 = arith.constant dense<0.000000e+00> : vector<1x128xf32>
    %99 = tpu.matmul %97, %98, %cst_73 {dimension_numbers = #tpu.dot_dimension_numbers<[1], [0], [0], [1], [0, 0, 1, 1], [], []>} : vector<1x32xf32>, vector<32x128xf32>, vector<1x128xf32> -> vector<1x128xf32>
    %c0_74 = arith.constant 0 : index
    %c0_75 = arith.constant 0 : index
    %100 = vector.load %arg12[%c0_74, %c0_75] : memref<1x1xf32, #tpu.memory_space<vmem>>, vector<1x1xf32>
    %101 = vector.broadcast %100 : vector<1x1xf32> to vector<1x128xf32>
    %102 = arith.addf %99, %101 : vector<1x128xf32>
    %c0_76 = arith.constant 0 : index
    %c0_77 = arith.constant 0 : index
    %103 = vector.load %arg13[%c0_76, %c0_77] : memref<1x128xf32, #tpu.memory_space<vmem>>, vector<1x128xf32>
    tpu.vector_store %arg13[%c0_76, %c0_77], %102 {strides = array<i32>} : memref<1x128xf32, #tpu.memory_space<vmem>>, vector<1x128xf32>,
    return
  }
}

</mosaic_0001>

<bundles_post_ra>
// kernel: tpu_custom_call.1
= control target key start
LH: loop header
LB: loop body
LE: loop exit
PB: predicated region body
PF: predicated region fallthrough
CT: control target
= control target key end

     0   :  { %s7909_s0 = inlined_call_operand.vmem [shape: f32[128,1], index: 0, kind: input, shape index: {}]   ;;  %s7910_s1 = inlined_call_operand.vmem [shape: f32[1,32], index: 1, kind: input, shape index: {}]   ;;  %s7911_s2 = inlined_call_operand.vmem [shape: f32[1,32], index: 2, kind: input, shape index: {}]   ;;  %s7912_s3 = inlined_call_operand.vmem [shape: f32[64,128], index: 3, kind: input, shape index: {}]   ;;  %s7913_s4 = inlined_call_operand.vmem [shape: f32[32,256], index: 4, kind: input, shape index: {}]   ;;  %s7914_s5 = inlined_call_operand.vmem [shape: f32[32,256], index: 5, kind: input, shape index: {}]   ;;  %s7915_s6 = inlined_call_operand.vmem [shape: f32[32,256], index: 6, kind: input, shape index: {}]   ;;  %s7916_s7 = inlined_call_operand.vmem [shape: f32[128,32], index: 7, kind: input, shape index: {}]   ;;  %s7917_s8 = inlined_call_operand.vmem [shape: f32[4,512,32], index: 8, kind: input, shape index: {}]   ;;  %s7918_s9 = inlined_call_operand.vmem [shape: f32[4,32,32], index: 9, kind: input, shape index: {}]   ;;  %s7919_s10 = inlined_call_operand.vmem [shape: f32[4,1,32], index: 10, kind: input, shape index: {}]   ;;  %s7920_s11 = inlined_call_operand.vmem [shape: f32[1,32], index: 11, kind: input, shape index: {}]   ;;  %s7921_s12 = inlined_call_operand.<no memory space> [shape: f32[1,1], index: 12, kind: input, shape index: {}]   ;;  %s7922_s13 = inlined_call_operand.hbm [shape: f32[1,128], index: 13, kind: output, shape index: {}]  }
   0x1   :  { %v18_v0 = vstv %s7921_s12 }
   0x2   :  { %19 = vst [vmem:[#allocation2] sm:$0x1] %v18_v0 }
   0x3   :  { %v62_v1 = vld [vmem:[%s7909_s0 + $0x78] sm:$0xff]  ;;  %v60_v2 = vld [vmem:[%s7909_s0 + $0x68] sm:$0xff]  ;;  %v5497_v3 = vmov 0   ;;  %v61_v4 = vld [vmem:[%s7909_s0 + $0x70] sm:$0xff] }
   0x4   :  { %5421 = vset.pattern.permute.xlu1 %v5497_v3  ;;  %5420 = vset.pattern.permute.xlu0 %v5497_v3  ;;  %v59_v5 = vld [vmem:[%s7909_s0 + $0x60] sm:$0xff] }
   0x5   :  { %141 = vperm.xlu0 %5420, %v62_v1   ;;  %131 = vperm.xlu1 %5421, %v60_v2  }
   0x9   :  { %136 = vperm.xlu0 %5420, %v61_v4   ;;  %126 = vperm.xlu1 %5421, %v59_v5  }
   0xa   :  { %20 = vsyncpa [#allocation4], 0  ;;  %v58_v6 = vld [vmem:[%s7909_s0 + $0x58] sm:$0xff]  ;;  %v57_v7 = vld [vmem:[%s7909_s0 + $0x50] sm:$0xff]  ;;  %vm342_vm0 = vcmask 261120   ;;  %vm5499_vm1 = vmmov 0  }
   0xb   :  { %v56_v8 = vld [vmem:[%s7909_s0 + $0x48] sm:$0xff]  ;;  %v55_v9 = vld [vmem:[%s7909_s0 + $0x40] sm:$0xff]  ;;  %v54_v10 = vld [vmem:[%s7909_s0 + $0x38] sm:$0xff]  ;;  %s5500_s24 = smov [#allocation3]  }
   0xc   :  { %v53_v11 = vld [vmem:[%s7909_s0 + $0x30] sm:$0xff]  ;;  %v52_v12 = vld [vmem:[%s7909_s0 + $0x28] sm:$0xff]  ;;  %v51_v13 = vld [vmem:[%s7909_s0 + $0x20] sm:$0xff] }
   0xd   :  { %121 = vperm.xlu0 %5420, %v58_v6   ;;  %116 = vperm.xlu1 %5421, %v57_v7   ;;  %v50_v14 = vld [vmem:[%s7909_s0 + $0x18] sm:$0xff]  ;;  %v49_v15 = vld [vmem:[%s7909_s0 + $0x10] sm:$0xff]  ;;  %v48_v16 = vld [vmem:[%s7909_s0 + $0x8] sm:$0xff] }
   0xe   :  { %v47_v17 = vld [vmem:[%s7909_s0] sm:$0xff]  ;;  %v204_v20 = vld [vmem:[%s7913_s4 + $0x38] sm:$0xff]  ;;  %v203_v21 = vld [vmem:[%s7913_s4 + $0x30] sm:$0xff] }
   0xf   :  { %v3788_v18 = vld [vmem:[#allocation2] sm:$0x1]  ;;  %v202_v22 = vld [vmem:[%s7913_s4 + $0x28] sm:$0xff]  ;;  %391 = vmatprep.subr.mxu1 %v204_v20  ;;  %v200_v24 = vld [vmem:[%s7913_s4 + $0x18] sm:$0xff] }
  0x10   :  { %v5625_v19 = vld [vmem:[%s7912_s3] sm:$0xff]  ;;  %392 = vmatpush1.msra.mxu1 %v203_v21  ;;  %v5800_v20 = vld [vmem:[%s7913_s4 + $0x8] sm:$0xff] }
  0x11   :  { %111 = vperm.xlu0 %5420, %v56_v8   ;;  %106 = vperm.xlu1 %5421, %v55_v9   ;;  %v201_v23 = vld [vmem:[%s7913_s4 + $0x20] sm:$0xff] }
  0x12   :  { %4981 = vmatprep.mubr.f32.mxu0 %v5625_v19  ;;  %393 = vmatprep.subr.mxu1 %v202_v22  ;;  %v5646_v25 = vld [vmem:[%s7910_s1] ss:$0 sm:$0xff]  ;;  %v7923_v22 = vmov 0.0  }
  0x13   :  { %394 = vmatpush1.msra.mxu1 %v201_v23  ;;  %v5651_v26 = vld [vmem:[%s7911_s2] ss:$0 sm:$0xff]  ;;  %431 = vmatprep.mubr.f32.mxu1 %v7923_v22  ;;  %v527_v23 = vld [vmem:[%s7917_s8 + $0xf8] sm:$0xff] }
  0x14   :  { %395 = vmatprep.subr.mxu1 %v200_v24  ;;  %v5806_v21 = vld [vmem:[%s7913_s4] sm:$0xff]  ;;  %v559_v24 = vld [vmem:[%s7917_s8 + $0x1f8] sm:$0xff] }
  0x15   :  { %101 = vperm.xlu0 %5420, %v54_v10   ;;  %96 = vperm.xlu1 %5421, %v53_v11   ;;  %v5750_v11 = vld [vmem:[%s7912_s3 + $0x8] sm:$0xff] }
  0x19   :  { %91 = vperm.xlu0 %5420, %v52_v12   ;;  %86 = vperm.xlu1 %5421, %v51_v13   ;;  %v5756_v12 = vld [vmem:[%s7912_s3 + $0x10] sm:$0xff]  ;;  %v5764_v13 = vld [vmem:[%s7912_s3 + $0x18] sm:$0xff] }
  0x1d   :  { %81 = vperm.xlu0 %5420, %v50_v14   ;;  %76 = vperm.xlu1 %5421, %v49_v15   ;;  %v5769_v14 = vld [vmem:[%s7912_s3 + $0x20] sm:$0xff]  ;;  %v5776_v15 = vld [vmem:[%s7912_s3 + $0x28] sm:$0xff] }
  0x21   :  { %71 = vperm.xlu0 %5420, %v48_v16   ;;  %66 = vperm.xlu1 %5421, %v47_v17   ;;  %v5781_v16 = vld [vmem:[%s7912_s3 + $0x30] sm:$0xff]  ;;  %v5788_v17 = vld [vmem:[%s7912_s3 + $0x38] sm:$0xff] }
  0x25   :  { %3791 = vperm.xlu0 %5420, %v3788_v18   ;;  %v5794_v18 = vld [vmem:[%s7913_s4 + $0x10] sm:$0xff] }
  0x26   :  { %396 = vmatpush1.msra.mxu1 %v5794_v18 }
  0x27   :  { %397 = vmatprep.subr.mxu1 %v5800_v20 }
  0x28   :  { %398 = vmatpush1.msra.mxu1 %v5806_v21 }
  0x29   :  { %4348 = vmatprep.subr.mxu1 %v527_v23  ;;  %v517_v23 = vld [vmem:[%s7917_s8 + $0xa8] sm:$0xff] }
  0x80   :  { %v142_v27 = vpop.permute.xlu0 %141  ;;  %v132_v28 = vpop.permute.xlu1 %131 }
  0x81   :  { %v165_v29 = vmul.f32 %v5646_v25, %v142_v27  ;;  %v163_v33 = vmul.f32 %v5646_v25, %v132_v28  ;;  %v542_v27 = vld [vmem:[%s7917_s8 + $0x170] sm:$0xff]  ;;  %v557_v28 = vld [vmem:[%s7917_s8 + $0x1e8] sm:$0xff] }
  0x83   :  { %v5655_v30 = vadd.f32 %v5651_v26, %v165_v29  ;;  %v5666_v39 = vadd.f32 %v5651_v26, %v163_v33  ;;  %v541_v29 = vld [vmem:[%s7917_s8 + $0x168] sm:$0xff]  ;;  %v555_v33 = vld [vmem:[%s7917_s8 + $0x1d8] sm:$0xff] }
  0x84   :  { %v137_v31 = vpop.permute.xlu0 %136  ;;  %v127_v32 = vpop.permute.xlu1 %126 }
  0x85   :  { %v164_v34 = vmul.f32 %v5646_v25, %v137_v31  ;;  %4949 = vmatprep.subr.mxu0 %v5655_v30  ;;  %v162_v36 = vmul.f32 %v5646_v25, %v127_v32  ;;  %v556_v31 = vld [vmem:[%s7917_s8 + $0x1e0] sm:$0xff] }
  0x86   :  { %4950 = vmatpush3.msra.mxu0 %v5655_v30  ;;  %v540_v32 = vld [vmem:[%s7917_s8 + $0x160] sm:$0xff] }
  0x87   :  { %v5662_v35 = vadd.f32 %v5651_v26, %v164_v34  ;;  %v5672_v41 = vadd.f32 %v5651_v26, %v162_v36  ;;  %v539_v34 = vld [vmem:[%s7917_s8 + $0x158] sm:$0xff] }
  0x88   :  { %v122_v37 = vpop.permute.xlu0 %121  ;;  %v117_v38 = vpop.permute.xlu1 %116 }
  0x89   :  { %v161_v40 = vmul.f32 %v5646_v25, %v122_v37  ;;  %4951 = vmatprep.subr.mxu0 %v5662_v35  ;;  %v160_v42 = vmul.f32 %v5646_v25, %v117_v38  ;;  %v511_v37 = vld [vmem:[%s7917_s8 + $0x78] sm:$0xff] }
  0x8a   :  { %4952 = vmatpush3.msra.mxu0 %v5662_v35 }
  0x8b   :  { %4953 = vmatprep.subr.mxu0 %v5666_v39  ;;  %v5678_v45 = vadd.f32 %v5651_v26, %v161_v40  ;;  %v5684_v47 = vadd.f32 %v5651_v26, %v160_v42  ;;  %v526_v40 = vld [vmem:[%s7917_s8 + $0xf0] sm:$0xff] }
  0x8c   :  { %4954 = vmatpush3.msra.mxu0 %v5666_v39  ;;  %v112_v43 = vpop.permute.xlu0 %111  ;;  %v107_v44 = vpop.permute.xlu1 %106  ;;  %v510_v42 = vld [vmem:[%s7917_s8 + $0x70] sm:$0xff] }
  0x8d   :  { %v159_v46 = vmul.f32 %v5646_v25, %v112_v43  ;;  %4955 = vmatprep.subr.mxu0 %v5672_v41  ;;  %v158_v48 = vmul.f32 %v5646_v25, %v107_v44  ;;  %v525_v43 = vld [vmem:[%s7917_s8 + $0xe8] sm:$0xff] }
  0x8e   :  { %4956 = vmatpush3.msra.mxu0 %v5672_v41  ;;  %v509_v44 = vld [vmem:[%s7917_s8 + $0x68] sm:$0xff] }
  0x8f   :  { %4957 = vmatprep.subr.mxu0 %v5678_v45  ;;  %v5690_v51 = vadd.f32 %v5651_v26, %v159_v46  ;;  %v5696_v53 = vadd.f32 %v5651_v26, %v158_v48  ;;  %v524_v48 = vld [vmem:[%s7917_s8 + $0xe0] sm:$0xff] }
  0x90   :  { %4958 = vmatpush3.msra.mxu0 %v5678_v45  ;;  %v102_v49 = vpop.permute.xlu0 %101  ;;  %v97_v50 = vpop.permute.xlu1 %96 }
  0x91   :  { %v157_v52 = vmul.f32 %v5646_v25, %v102_v49  ;;  %4959 = vmatprep.subr.mxu0 %v5684_v47  ;;  %v156_v54 = vmul.f32 %v5646_v25, %v97_v50  ;;  %v508_v49 = vld [vmem:[%s7917_s8 + $0x60] sm:$0xff]  ;;  %v523_v50 = vld [vmem:[%s7917_s8 + $0xd8] sm:$0xff] }
  0x92   :  { %4960 = vmatpush3.msra.mxu0 %v5684_v47 }
  0x93   :  { %4961 = vmatprep.subr.mxu0 %v5690_v51  ;;  %v5702_v57 = vadd.f32 %v5651_v26, %v157_v52  ;;  %v5708_v59 = vadd.f32 %v5651_v26, %v156_v54  ;;  %v507_v52 = vld [vmem:[%s7917_s8 + $0x58] sm:$0xff] }
  0x94   :  { %4962 = vmatpush3.msra.mxu0 %v5690_v51  ;;  %v92_v55 = vpop.permute.xlu0 %91  ;;  %v87_v56 = vpop.permute.xlu1 %86 }
  0x95   :  { %v155_v58 = vmul.f32 %v5646_v25, %v92_v55  ;;  %4963 = vmatprep.subr.mxu0 %v5696_v53  ;;  %v154_v60 = vmul.f32 %v5646_v25, %v87_v56  ;;  %v522_v55 = vld [vmem:[%s7917_s8 + $0xd0] sm:$0xff] }
  0x96   :  { %4964 = vmatpush3.msra.mxu0 %v5696_v53  ;;  %v506_v56 = vld [vmem:[%s7917_s8 + $0x50] sm:$0xff] }
  0x97   :  { %4965 = vmatprep.subr.mxu0 %v5702_v57  ;;  %v5714_v63 = vadd.f32 %v5651_v26, %v155_v58  ;;  %v5720_v1 = vadd.f32 %v5651_v26, %v154_v60  ;;  %v521_v58 = vld [vmem:[%s7917_s8 + $0xc8] sm:$0xff] }
  0x98   :  { %4966 = vmatpush3.msra.mxu0 %v5702_v57  ;;  %v82_v61 = vpop.permute.xlu0 %81  ;;  %v77_v62 = vpop.permute.xlu1 %76  ;;  %v505_v60 = vld [vmem:[%s7917_s8 + $0x48] sm:$0xff] }
  0x99   :  { %v153_v0 = vmul.f32 %v5646_v25, %v82_v61  ;;  %4967 = vmatprep.subr.mxu0 %v5708_v59  ;;  %v152_v2 = vmul.f32 %v5646_v25, %v77_v62  ;;  %v520_v62 = vld [vmem:[%s7917_s8 + $0xc0] sm:$0xff] }
  0x9a   :  { %4968 = vmatpush3.msra.mxu0 %v5708_v59 }
  0x9b   :  { %4969 = vmatprep.subr.mxu0 %v5714_v63  ;;  %v5726_v5 = vadd.f32 %v5651_v26, %v153_v0  ;;  %v5732_v7 = vadd.f32 %v5651_v26, %v152_v2  ;;  %v504_v0 = vld [vmem:[%s7917_s8 + $0x40] sm:$0xff]  ;;  %v519_v2 = vld [vmem:[%s7917_s8 + $0xb8] sm:$0xff] }
  0x9c   :  { %4970 = vmatpush3.msra.mxu0 %v5714_v63  ;;  %v72_v3 = vpop.permute.xlu0 %71  ;;  %v67_v4 = vpop.permute.xlu1 %66 }
  0x9d   :  { %v151_v6 = vmul.f32 %v5646_v25, %v72_v3  ;;  %4971 = vmatprep.subr.mxu0 %v5720_v1  ;;  %v150_v8 = vmul.f32 %v5646_v25, %v67_v4  ;;  %v543_v25 = vld [vmem:[%s7917_s8 + $0x178] sm:$0xff] }
  0x9e   :  { %4972 = vmatpush3.msra.mxu0 %v5720_v1  ;;  %v503_v3 = vld [vmem:[%s7917_s8 + $0x38] sm:$0xff] }
  0x9f   :  { %4973 = vmatprep.subr.mxu0 %v5726_v5  ;;  %v5738_v9 = vadd.f32 %v5651_v26, %v151_v6  ;;  %v5743_v10 = vadd.f32 %v5651_v26, %v150_v8  ;;  %v558_v26 = vld [vmem:[%s7917_s8 + $0x1f0] sm:$0xff] }
  0xa0   :  { %4974 = vmatpush3.msra.mxu0 %v5726_v5  ;;  %v518_v6 = vld [vmem:[%s7917_s8 + $0xb0] sm:$0xff] }
  0xa1   :  { %4975 = vmatprep.subr.mxu0 %v5732_v7  ;;  %v502_v8 = vld [vmem:[%s7917_s8 + $0x30] sm:$0xff] }
  0xa2   :  { %4976 = vmatpush3.msra.mxu0 %v5732_v7 }
  0xa3   :  { %4977 = vmatprep.subr.mxu0 %v5738_v9 }
  0xa4   :  { %4978 = vmatpush3.msra.mxu0 %v5738_v9 }
  0xa5   :  { %4979 = vmatprep.subr.mxu0 %v5743_v10 }
  0xa6   :  { %4980 = vmatpush3.msra.mxu0 %v5743_v10 }
  0xa7   :  { %4982 = vmatmul.mubr.f32.vlgmr.msra.gmra.mxu0 %v5750_v11  ;;  %4392 = vmatprep.subr.mxu0 %v559_v24  ;;  %v501_v24 = vld [vmem:[%s7917_s8 + $0x28] sm:$0xff] }
  0xa8   :  { %4984 = vmatprep.mubr.f32.mxu0 %v5756_v12  ;;  %4393 = vmatpush3.msra.mxu0 %v543_v25 }
  0xa9   :  { %4394 = vmatprep.subr.mxu0 %v558_v26  ;;  %v516_v26 = vld [vmem:[%s7917_s8 + $0xa0] sm:$0xff] }
  0xaa   :  { %4395 = vmatpush3.msra.mxu0 %v542_v27  ;;  %v500_v27 = vld [vmem:[%s7917_s8 + $0x20] sm:$0xff] }
  0xab   :  { %4985 = vmatmul.mubr.f32.gmra.mxu0 %v5764_v13  ;;  %4396 = vmatprep.subr.mxu0 %v557_v28  ;;  %v515_v28 = vld [vmem:[%s7917_s8 + $0x98] sm:$0xff] }
  0xac   :  { %4987 = vmatprep.mubr.f32.mxu0 %v5769_v14  ;;  %4397 = vmatpush3.msra.mxu0 %v541_v29  ;;  %v499_v29 = vld [vmem:[%s7917_s8 + $0x18] sm:$0xff] }
  0xad   :  { %4398 = vmatprep.subr.mxu0 %v556_v31 }
  0xae   :  { %4399 = vmatpush3.msra.mxu0 %v540_v32  ;;  %v514_v32 = vld [vmem:[%s7917_s8 + $0x90] sm:$0xff] }
  0xaf   :  { %4988 = vmatmul.mubr.f32.gmra.mxu0 %v5776_v15  ;;  %4400 = vmatprep.subr.mxu0 %v555_v33  ;;  %v554_v33 = vld [vmem:[%s7917_s8 + $0x1d0] sm:$0xff] }
  0xb0   :  { %4990 = vmatprep.mubr.f32.mxu0 %v5781_v16  ;;  %4401 = vmatpush3.msra.mxu0 %v539_v34  ;;  %v498_v34 = vld [vmem:[%s7917_s8 + $0x10] sm:$0xff] }
  0xb1   :  { %4402 = vmatprep.subr.mxu0 %v554_v33  ;;  %v6040_v33 = vld [vmem:[%s7914_s5 + $0x10] sm:$0xff] }
  0xb3   :  { %4991 = vmatmul.mubr.f32.gmra.mxu0 %v5788_v17 }
 0x167   :  { %v4983_v36 = vpop.f32.mrf.mxu0 }
 0x169   :  { %v303_v38 = vpop.f32.mrf.mxu0 }
 0x16a   :  { %3936 = vmatmul.mubr.msk.f32.vlgmr.msra.gmra.mxu1 %vm342_vm0, %v303_v38  ;;  %v553_v38 = vld [vmem:[%s7917_s8 + $0x1c8] sm:$0xff] }
 0x16b   :  { %437 = vmatprep.mubr.f32.mxu1 %v7923_v22  ;;  %4349 = vmatpush3.msra.mxu1 %v511_v37  ;;  %v4986_v46 = vpop.f32.mrf.mxu0  ;;  %v513_v37 = vld [vmem:[%s7917_s8 + $0x88] sm:$0xff] }
 0x16c   :  { %4350 = vmatprep.subr.mxu1 %v526_v40  ;;  %v497_v40 = vld [vmem:[%s7917_s8 + $0x8] sm:$0xff] }
 0x16d   :  { %4351 = vmatpush3.msra.mxu1 %v510_v42  ;;  %v313_v54 = vpop.f32.mrf.mxu0  ;;  %v537_v42 = vld [vmem:[%s7917_s8 + $0x148] sm:$0xff] }
 0x16e   :  { %3937 = vmatmul.mubr.msk.f32.gmra.mxu1 %vm342_vm0, %v4983_v36  ;;  %4352 = vmatprep.subr.mxu1 %v525_v43  ;;  %v538_v36 = vld [vmem:[%s7917_s8 + $0x150] sm:$0xff]  ;;  %v512_v43 = vld [vmem:[%s7917_s8 + $0x80] sm:$0xff] }
 0x16f   :  { %443 = vmatprep.mubr.f32.mxu1 %v7923_v22  ;;  %4353 = vmatpush3.msra.mxu1 %v509_v44  ;;  %v4989_v61 = vpop.f32.mrf.mxu0  ;;  %v552_v44 = vld [vmem:[%s7917_s8 + $0x1c0] sm:$0xff] }
 0x170   :  { %4354 = vmatprep.subr.mxu1 %v524_v48  ;;  %4403 = vmatpush3.msra.mxu0 %v538_v36  ;;  %v536_v48 = vld [vmem:[%s7917_s8 + $0x140] sm:$0xff] }
 0x171   :  { %4355 = vmatpush3.msra.mxu1 %v508_v49  ;;  %v323_v4 = vpop.f32.mrf.mxu0  ;;  %4404 = vmatprep.subr.mxu0 %v553_v38  ;;  %v551_v49 = vld [vmem:[%s7917_s8 + $0x1b8] sm:$0xff]  ;;  %v731_v38 = vld [vmem:[%s7918_s9 + $0x8] sm:$0xff] }
 0x172   :  { %3938 = vmatmul.mubr.msk.f32.gmra.mxu1 %vm342_vm0, %v313_v54  ;;  %4356 = vmatprep.subr.mxu1 %v523_v50  ;;  %v535_v50 = vld [vmem:[%s7917_s8 + $0x138] sm:$0xff]  ;;  %v534_v54 = vld [vmem:[%s7917_s8 + $0x130] sm:$0xff] }
 0x173   :  { %449 = vmatprep.mubr.f32.mxu1 %v7923_v22  ;;  %4357 = vmatpush3.msra.mxu1 %v507_v52  ;;  %v4992_v25 = vpop.f32.mrf.mxu0  ;;  %v550_v52 = vld [vmem:[%s7917_s8 + $0x1b0] sm:$0xff] }
 0x174   :  { %4358 = vmatprep.subr.mxu1 %v522_v55  ;;  %4405 = vmatpush3.msra.mxu0 %v537_v42  ;;  %v549_v55 = vld [vmem:[%s7917_s8 + $0x1a8] sm:$0xff] }
 0x175   :  { %4359 = vmatpush3.msra.mxu1 %v506_v56  ;;  %v333_v31 = vpop.f32.mrf.mxu0  ;;  %4406 = vmatprep.subr.mxu0 %v552_v44  ;;  %v533_v56 = vld [vmem:[%s7917_s8 + $0x128] sm:$0xff]  ;;  %v6058_v44 = vld [vmem:[%s7914_s5 + $0x20] sm:$0xff] }
 0x176   :  { %3939 = vmatmul.mubr.msk.f32.gmra.mxu1 %vm342_vm0, %v4986_v46  ;;  %4360 = vmatprep.subr.mxu1 %v521_v58  ;;  %v496_v46 = vld [vmem:[%s7917_s8] sm:$0xff] }
 0x177   :  { %455 = vmatprep.mubr.f32.mxu1 %v7923_v22  ;;  %4361 = vmatpush3.msra.mxu1 %v505_v60  ;;  %v548_v58 = vld [vmem:[%s7917_s8 + $0x1a0] sm:$0xff] }
 0x178   :  { %4362 = vmatprep.subr.mxu1 %v520_v62  ;;  %4407 = vmatpush3.msra.mxu0 %v536_v48  ;;  %v532_v60 = vld [vmem:[%s7917_s8 + $0x120] sm:$0xff]  ;;  %v733_v62 = vld [vmem:[%s7918_s9 + $0x18] sm:$0xff] }
 0x179   :  { %4363 = vmatpush3.msra.mxu1 %v504_v0  ;;  %4408 = vmatprep.subr.mxu0 %v551_v49  ;;  %v531_v0 = vld [vmem:[%s7917_s8 + $0x118] sm:$0xff] }
 0x17a   :  { %3940 = vmatmul.mubr.msk.f32.gmra.mxu1 %vm342_vm0, %v323_v4  ;;  %4364 = vmatprep.subr.mxu1 %v519_v2  ;;  %v546_v2 = vld [vmem:[%s7917_s8 + $0x190] sm:$0xff]  ;;  %v545_v4 = vld [vmem:[%s7917_s8 + $0x188] sm:$0xff] }
 0x17b   :  { %461 = vmatprep.mubr.f32.mxu1 %v7923_v22  ;;  %4365 = vmatpush3.msra.mxu1 %v503_v3  ;;  %v530_v3 = vld [vmem:[%s7917_s8 + $0x110] sm:$0xff] }
 0x17c   :  { %4366 = vmatprep.subr.mxu1 %v518_v6  ;;  %4409 = vmatpush3.msra.mxu0 %v535_v50  ;;  %v529_v6 = vld [vmem:[%s7917_s8 + $0x108] sm:$0xff] }
 0x17d   :  { %4367 = vmatpush3.msra.mxu1 %v502_v8  ;;  %4410 = vmatprep.subr.mxu0 %v550_v52  ;;  %v544_v8 = vld [vmem:[%s7917_s8 + $0x180] sm:$0xff] }
 0x17e   :  { %3941 = vmatmul.mubr.msk.f32.gmra.mxu1 %vm342_vm0, %v4989_v61  ;;  %4368 = vmatprep.subr.mxu1 %v517_v23  ;;  %v547_v61 = vld [vmem:[%s7917_s8 + $0x198] sm:$0xff]  ;;  %v528_v23 = vld [vmem:[%s7917_s8 + $0x100] sm:$0xff] }
 0x17f   :  { %467 = vmatprep.mubr.f32.mxu1 %v7923_v22  ;;  %4369 = vmatpush3.msra.mxu1 %v501_v24 }
 0x180   :  { %4370 = vmatprep.subr.mxu1 %v516_v26  ;;  %4411 = vmatpush3.msra.mxu0 %v534_v54  ;;  %v6028_v26 = vld [vmem:[%s7914_s5] sm:$0xff]  ;;  %v6068_v54 = vld [vmem:[%s7914_s5 + $0x38] sm:$0xff] }
 0x181   :  { %4371 = vmatpush3.msra.mxu1 %v500_v27  ;;  %4412 = vmatprep.subr.mxu0 %v549_v55  ;;  %v6073_v55 = vld [vmem:[%s7914_s5 + $0x30] sm:$0xff] }
 0x182   :  { %3942 = vmatmul.mubr.msk.f32.gmra.mxu1 %vm342_vm0, %v333_v31  ;;  %4372 = vmatprep.subr.mxu1 %v515_v28 }
 0x183   :  { %473 = vmatprep.mubr.f32.mxu1 %v7923_v22  ;;  %4373 = vmatpush3.msra.mxu1 %v499_v29 }
 0x184   :  { %4374 = vmatprep.subr.mxu1 %v514_v32  ;;  %4413 = vmatpush3.msra.mxu0 %v533_v56  ;;  %v6035_v32 = vld [vmem:[%s7914_s5 + $0x18] sm:$0xff] }
 0x185   :  { %4375 = vmatpush3.msra.mxu1 %v498_v34  ;;  %4414 = vmatprep.subr.mxu0 %v548_v58  ;;  %v732_v34 = vld [vmem:[%s7918_s9 + $0x10] sm:$0xff] }
 0x186   :  { %3943 = vmatmul.mubr.msk.f32.gmra.mxu1 %vm342_vm0, %v4992_v25  ;;  %4376 = vmatprep.subr.mxu1 %v513_v37  ;;  %v6023_v25 = vld [vmem:[%s7914_s5 + $0x8] sm:$0xff] }
 0x187   :  { %4377 = vmatpush3.msra.mxu1 %v497_v40  ;;  %4415 = vmatpush3.msra.mxu0 %v532_v60 }
 0x188   :  { %4378 = vmatprep.subr.mxu1 %v512_v43  ;;  %4416 = vmatprep.subr.mxu0 %v547_v61  ;;  %v6053_v43 = vld [vmem:[%s7914_s5 + $0x28] sm:$0xff] }
 0x189   :  { %4379 = vmatpush3.msra.mxu1 %v496_v46  ;;  %4417 = vmatpush3.msra.mxu0 %v531_v0  ;;  %v730_v46 = vld [vmem:[%s7918_s9] sm:$0xff] }
 0x18a   :  { %4993 = vmatprep.subr.mxu1 %v733_v62  ;;  %4418 = vmatprep.subr.mxu0 %v546_v2  ;;  %v6085_v0 = vld [vmem:[%s7915_s6] sm:$0xff] }
 0x18b   :  { %4419 = vmatpush3.msra.mxu0 %v530_v3 }
 0x18c   :  { %4420 = vmatprep.subr.mxu0 %v545_v4 }
 0x18d   :  { %4421 = vmatpush3.msra.mxu0 %v529_v6 }
 0x18e   :  { %4422 = vmatprep.subr.mxu0 %v544_v8  ;;  %v6094_v8 = vld [vmem:[%s7915_s6 + $0x18] sm:$0xff] }
 0x18f   :  { %4423 = vmatpush3.msra.mxu0 %v528_v23  ;;  %v6099_v23 = vld [vmem:[%s7915_s6 + $0x10] sm:$0xff] }
 0x22a   :  { %v433_v24 = vpop.f32.mrf.mxu1 }
 0x22b   :  { %v480_v29 = vmul.f32 %v433_v24, %v6028_v26 }
 0x22c   :  { %v435_v27 = vpop.f32.mrf.mxu1 }
 0x22d   :  { %v481_v28 = vmul.f32 %v435_v27, %v6023_v25 }
 0x22e   :  { %v439_v31 = vpop.f32.mrf.mxu1 }
 0x22f   :  { %624 = vmatprep.mubr.f32.mxu1 %v481_v28  ;;  %v482_v40 = vmul.f32 %v439_v31, %v6040_v33  ;;  %v6115_v31 = vld [vmem:[%s7915_s6 + $0x20] sm:$0xff] }
 0x230   :  { %v441_v36 = vpop.f32.mrf.mxu1  ;;  %625 = vmatmul.mubr.f32.vlgmr.msra.gmra.mxu1 %v480_v29  ;;  %v6110_v29 = vld [vmem:[%s7915_s6 + $0x28] sm:$0xff]  ;;  %7967 = vst [vmem:[#allocation7_spill] sm:$0xff] %v6115_v31 }
 0x231   :  { %v483_v37 = vmul.f32 %v441_v36, %v6035_v32  ;;  %4994 = vmatpush3.msra.mxu1 %v733_v62  ;;  %v6080_v62 = vld [vmem:[%s7915_s6 + $0x8] sm:$0xff]  ;;  %7966 = vst [vmem:[#allocation6_spill] sm:$0xff] %v6110_v29 }
 0x232   :  { %v445_v42 = vpop.f32.mrf.mxu1  ;;  %4995 = vmatprep.subr.mxu1 %v732_v34 }
 0x233   :  { %629 = vmatprep.mubr.f32.mxu1 %v483_v37  ;;  %4996 = vmatpush3.msra.mxu1 %v732_v34  ;;  %v484_v50 = vmul.f32 %v445_v42, %v6058_v44  ;;  %v6126_v37 = vld [vmem:[%s7915_s6 + $0x38] sm:$0xff] }
 0x234   :  { %v447_v48 = vpop.f32.mrf.mxu1  ;;  %630 = vmatmul.mubr.f32.gmra.mxu1 %v482_v40  ;;  %4997 = vmatprep.subr.mxu1 %v731_v38  ;;  %7968 = vst [vmem:[#allocation8_spill] sm:$0xff] %v6126_v37 }
 0x235   :  { %v485_v49 = vmul.f32 %v447_v48, %v6053_v43  ;;  %4998 = vmatpush3.msra.mxu1 %v731_v38  ;;  %v6131_v38 = vld [vmem:[%s7915_s6 + $0x30] sm:$0xff] }
 0x236   :  { %v451_v52 = vpop.f32.mrf.mxu1  ;;  %4999 = vmatprep.subr.mxu1 %v730_v46  ;;  %7969 = vst [vmem:[#allocation9_spill] sm:$0xff] %v6131_v38 }
 0x237   :  { %634 = vmatprep.mubr.f32.mxu1 %v485_v49  ;;  %5000 = vmatpush3.msra.mxu1 %v730_v46  ;;  %v486_v60 = vmul.f32 %v451_v52, %v6073_v55 }
 0x238   :  { %v453_v56 = vpop.f32.mrf.mxu1  ;;  %635 = vmatmul.mubr.f32.gmra.mxu1 %v484_v50 }
 0x239   :  { %v487_v58 = vmul.f32 %v453_v56, %v6068_v54 }
 0x23a   :  { %v457_v61 = vpop.f32.mrf.mxu1 }
 0x23b   :  { %639 = vmatprep.mubr.f32.mxu1 %v487_v58  ;;  %v488_v4 = vmul.f32 %v457_v61, %v6085_v0 }
 0x23c   :  { %v459_v2 = vpop.f32.mrf.mxu1  ;;  %640 = vmatmul.mubr.f32.gmra.mxu1 %v486_v60 }
 0x23d   :  { %v489_v3 = vmul.f32 %v459_v2, %v6080_v62  ;;  %5001 = vmatprep.mubr.msk.f32.mxu1 %vm342_vm0, %v5743_v10 }
 0x23e   :  { %v463_v6 = vpop.f32.mrf.mxu1 }
 0x23f   :  { %709 = vmatprep.mubr.f32.mxu0 %v489_v3  ;;  %v490_v27 = vmul.f32 %v463_v6, %v6099_v23 }
 0x240   :  { %v465_v24 = vpop.f32.mrf.mxu1  ;;  %710 = vmatmul.mubr.f32.vlgmr.msra.gmra.mxu0 %v488_v4  ;;  %5002 = vmatmul.mubr.msk.f32.vlgmr.msra.gmra.mxu1 %vm342_vm0, %v5738_v9 }
 0x241   :  { %v491_v10 = vmul.f32 %v465_v24, %v6094_v8  ;;  %5004 = vmatprep.mubr.msk.f32.mxu1 %vm342_vm0, %v5732_v7 }
 0x242   :  { %v469_v28 = vpop.f32.mrf.mxu1 }
 0x243   :  { %714 = vmatprep.mubr.f32.mxu0 %v491_v10  ;;  %v492_v34 = vmul.f32 %v469_v28, %v6115_v31  ;;  %v6168_v28 = vld [vmem:[%s7916_s7 + $0x8] sm:$0xff] }
 0x244   :  { %v471_v9 = vpop.f32.mrf.mxu1  ;;  %715 = vmatmul.mubr.f32.gmra.mxu0 %v490_v27  ;;  %5005 = vmatmul.mubr.msk.f32.gmra.mxu1 %vm342_vm0, %v5726_v5  ;;  %7971 = vst [vmem:[#allocation11_spill] sm:$0xff] %v6168_v28 }
 0x245   :  { %v493_v7 = vmul.f32 %v471_v9, %v6110_v29  ;;  %5007 = vmatprep.mubr.msk.f32.mxu1 %vm342_vm0, %v5720_v1  ;;  %v6173_v9 = vld [vmem:[%s7916_s7 + $0x10] sm:$0xff] }
 0x246   :  { %v475_v36 = vpop.f32.mrf.mxu1  ;;  %7972 = vst [vmem:[#allocation12_spill] sm:$0xff] %v6173_v9 }
 0x247   :  { %719 = vmatprep.mubr.f32.mxu0 %v493_v7  ;;  %v494_v40 = vmul.f32 %v475_v36, %v6131_v38  ;;  %v6182_v7 = vld [vmem:[%s7916_s7 + $0x18] sm:$0xff]  ;;  %v6196_v36 = vld [vmem:[%s7916_s7 + $0x28] sm:$0xff] }
 0x248   :  { %v477_v5 = vpop.f32.mrf.mxu1  ;;  %720 = vmatmul.mubr.f32.gmra.mxu0 %v492_v34  ;;  %5008 = vmatmul.mubr.msk.f32.gmra.mxu1 %vm342_vm0, %v5714_v63  ;;  %7973 = vst [vmem:[#allocation13_spill] sm:$0xff] %v6182_v7  ;;  %v6187_v34 = vld [vmem:[%s7916_s7 + $0x20] sm:$0xff]  ;;  %7975 = vst [vmem:[#allocation15_spill] sm:$0xff] %v6196_v36 }
 0x249   :  { %v495_v1 = vmul.f32 %v477_v5, %v6126_v37  ;;  %5010 = vmatprep.mubr.msk.f32.mxu1 %vm342_vm0, %v5708_v59  ;;  %7974 = vst [vmem:[#allocation14_spill] sm:$0xff] %v6187_v34  ;;  %v6201_v5 = vld [vmem:[%s7916_s7 + $0x30] sm:$0xff] }
 0x24a   :  { %7976 = vst [vmem:[#allocation16_spill] sm:$0xff] %v6201_v5 }
 0x24b   :  { %724 = vmatprep.mubr.f32.mxu0 %v495_v1  ;;  %v6210_v1 = vld [vmem:[%s7916_s7 + $0x38] sm:$0xff] }
 0x24c   :  { %725 = vmatmul.mubr.f32.gmra.mxu0 %v494_v40  ;;  %5011 = vmatmul.mubr.msk.f32.gmra.mxu1 %vm342_vm0, %v5702_v57  ;;  %7977 = vst [vmem:[#allocation17_spill] sm:$0xff] %v6210_v1  ;;  %v6215_v40 = vld [vmem:[%s7916_s7 + $0x40] sm:$0xff] }
 0x24d   :  { %5013 = vmatprep.mubr.msk.f32.mxu1 %vm342_vm0, %v5696_v53  ;;  %7978 = vst [vmem:[#allocation18_spill] sm:$0xff] %v6215_v40 }
 0x250   :  { %5014 = vmatmul.mubr.msk.f32.gmra.mxu1 %vm342_vm0, %v5690_v51 }
 0x251   :  { %5016 = vmatprep.mubr.msk.f32.mxu1 %vm342_vm0, %v5684_v47  ;;  %v6161_v47 = vld [vmem:[%s7916_s7] sm:$0xff] }
 0x252   :  { %7970 = vst [vmem:[#allocation10_spill] sm:$0xff] %v6161_v47  ;;  %5033 = vmatprep.mubr.msk.f32.mxu0 %vm342_vm0, %v6161_v47 }
 0x254   :  { %5017 = vmatmul.mubr.msk.f32.gmra.mxu1 %vm342_vm0, %v5678_v45 }
 0x255   :  { %5019 = vmatprep.mubr.msk.f32.mxu1 %vm342_vm0, %v5672_v41 }
 0x258   :  { %5020 = vmatmul.mubr.msk.f32.gmra.mxu1 %vm342_vm0, %v5666_v39 }
 0x259   :  { %5022 = vmatprep.mubr.msk.f32.mxu1 %vm342_vm0, %v5662_v35 }
 0x25c   :  { %5023 = vmatmul.mubr.msk.f32.gmra.mxu1 %vm342_vm0, %v5655_v30 }
 0x25d   :  { %5089 = vmatprep.mubr.f32.mxu1 %v5625_v19 }
 0x2f0   :  { %v4380_v41 = vpop.f32.mrf.mxu1 }
 0x2f2   :  { %v4381_v45 = vpop.f32.mrf.mxu1 }
 0x2f3   :  { %v4382_v24 = vadd.f32 %v4381_v45, %v4380_v41  ;;  %v6224_v41 = vld [vmem:[%s7916_s7 + $0x48] sm:$0xff]  ;;  %v6229_v45 = vld [vmem:[%s7916_s7 + $0x50] sm:$0xff] }
 0x2f4   :  { %v4383_v51 = vpop.f32.mrf.mxu1  ;;  %7979 = vst [vmem:[#allocation19_spill] sm:$0xff] %v6224_v41  ;;  %7980 = vst [vmem:[#allocation20_spill] sm:$0xff] %v6229_v45 }
 0x2f6   :  { %v4384_v39 = vpop.f32.mrf.mxu1 }
 0x2f7   :  { %v4385_v3 = vadd.f32 %v4384_v39, %v4383_v51  ;;  %v6238_v51 = vld [vmem:[%s7916_s7 + $0x58] sm:$0xff]  ;;  %v6243_v39 = vld [vmem:[%s7916_s7 + $0x60] sm:$0xff] }
 0x2f8   :  { %v4386_v53 = vpop.f32.mrf.mxu1  ;;  %7981 = vst [vmem:[#allocation21_spill] sm:$0xff] %v6238_v51  ;;  %7982 = vst [vmem:[#allocation22_spill] sm:$0xff] %v6243_v39 }
 0x2fa   :  { %v4387_v59 = vpop.f32.mrf.mxu1 }
 0x2fb   :  { %v4388_v60 = vadd.f32 %v4387_v59, %v4386_v53  ;;  %v6252_v53 = vld [vmem:[%s7916_s7 + $0x68] sm:$0xff] }
 0x2fc   :  { %v4389_v42 = vpop.f32.mrf.mxu1  ;;  %7983 = vst [vmem:[#allocation23_spill] sm:$0xff] %v6252_v53 }
 0x2fe   :  { %v4390_v48 = vpop.f32.mrf.mxu1 }
 0x2ff   :  { %v4391_v52 = vadd.f32 %v4390_v48, %v4389_v42 }
 0x300   :  { %v4424_v57 = vpop.f32.mrf.mxu0  ;;  %v6270_v59 = vpop.f32.mrf.mxu1 }
 0x302   :  { %v4425_v35 = vpop.f32.mrf.mxu0 }
 0x303   :  { %v4426_v4 = vadd.f32 %v4425_v35, %v4424_v57  ;;  %v6257_v57 = vld [vmem:[%s7916_s7 + $0x70] sm:$0xff]  ;;  %v6266_v35 = vld [vmem:[%s7916_s7 + $0x78] sm:$0xff] }
 0x304   :  { %v4427_v63 = vpop.f32.mrf.mxu0  ;;  %7984 = vst [vmem:[#allocation24_spill] sm:$0xff] %v6257_v57  ;;  %7985 = vst [vmem:[#allocation25_spill] sm:$0xff] %v6266_v35 }
 0x305   :  { %v712_v27 = vadd.f32 %v4426_v4, %v4382_v24 }
 0x306   :  { %v4428_v30 = vpop.f32.mrf.mxu0 }
 0x307   :  { %v4429_v61 = vadd.f32 %v4428_v30, %v4427_v63  ;;  %v6272_v63 = vpop.f32.mrf.mxu1 }
 0x308   :  { %v4430_v19 = vpop.f32.mrf.mxu0 }
 0x309   :  { %v717_v10 = vadd.f32 %v4429_v61, %v4385_v3  ;;  %v6274_v30 = vpop.f32.mrf.mxu1 }
 0x30a   :  { %v4431_v46 = vpop.f32.mrf.mxu0 }
 0x30b   :  { %v4432_v56 = vadd.f32 %v4431_v46, %v4430_v19  ;;  %v6276_v42 = vpop.f32.mrf.mxu1 }
 0x30c   :  { %v4433_v49 = vpop.f32.mrf.mxu0 }
 0x30d   :  { %v722_v6 = vadd.f32 %v4432_v56, %v4388_v60  ;;  %v6278_v19 = vpop.f32.mrf.mxu1 }
 0x30e   :  { %v4434_v50 = vpop.f32.mrf.mxu0 }
 0x30f   :  { %v4435_v58 = vadd.f32 %v4434_v50, %v4433_v49  ;;  %v6280_v46 = vpop.f32.mrf.mxu1 }
 0x311   :  { %v727_v2 = vadd.f32 %v4435_v58, %v4391_v52  ;;  %v5012_v48 = vpop.f32.mrf.mxu1 }
 0x313   :  { %5025 = vmatprep.subr.mxu0 %v727_v2  ;;  %v878_v49 = vpop.f32.mrf.mxu1 }
 0x314   :  { %5026 = vmatpush3.msra.mxu0 %v727_v2 }
 0x315   :  { %5027 = vmatprep.subr.mxu0 %v722_v6  ;;  %v5015_v52 = vpop.f32.mrf.mxu1 }
 0x316   :  { %5028 = vmatpush3.msra.mxu0 %v722_v6 }
 0x317   :  { %5029 = vmatprep.subr.mxu0 %v717_v10  ;;  %v888_v60 = vpop.f32.mrf.mxu1 }
 0x318   :  { %5030 = vmatpush3.msra.mxu0 %v717_v10 }
 0x319   :  { %5031 = vmatprep.subr.mxu0 %v712_v27  ;;  %v5018_v3 = vpop.f32.mrf.mxu1 }
 0x31a   :  { %5032 = vmatpush3.msra.mxu0 %v712_v27 }
 0x31b   :  { %5034 = vmatmul.mubr.msk.f32.vlgmr.msra.gmra.mxu0 %vm342_vm0, %v6168_v28  ;;  %v898_v24 = vpop.f32.mrf.mxu1 }
 0x31c   :  { %5036 = vmatprep.mubr.msk.f32.mxu0 %vm342_vm0, %v6173_v9 }
 0x31d   :  { %v5021_v22 = vpop.f32.mrf.mxu1 }
 0x31f   :  { %5037 = vmatmul.mubr.msk.f32.gmra.mxu0 %vm342_vm0, %v6182_v7 }
 0x320   :  { %5039 = vmatprep.mubr.msk.f32.mxu0 %vm342_vm0, %v6187_v34  ;;  %v6293_v34 = vld [vmem:[%s7919_s10] ss:$0 sm:$0xff] }
 0x323   :  { %5040 = vmatmul.mubr.msk.f32.gmra.mxu0 %vm342_vm0, %v6196_v36 }
 0x324   :  { %5042 = vmatprep.mubr.msk.f32.mxu0 %vm342_vm0, %v6201_v5 }
 0x327   :  { %5043 = vmatmul.mubr.msk.f32.gmra.mxu0 %vm342_vm0, %v6210_v1 }
 0x328   :  { %5045 = vmatprep.mubr.msk.f32.mxu0 %vm342_vm0, %v6215_v40 }
 0x32b   :  { %5046 = vmatmul.mubr.msk.f32.gmra.mxu0 %vm342_vm0, %v6224_v41 }
 0x32c   :  { %5048 = vmatprep.mubr.msk.f32.mxu0 %vm342_vm0, %v6229_v45 }
 0x32f   :  { %5049 = vmatmul.mubr.msk.f32.gmra.mxu0 %vm342_vm0, %v6238_v51 }
 0x330   :  { %5051 = vmatprep.mubr.msk.f32.mxu0 %vm342_vm0, %v6243_v39 }
 0x333   :  { %5052 = vmatmul.mubr.msk.f32.gmra.mxu0 %vm342_vm0, %v6252_v53  ;;  %v908_v53 = vpop.f32.mrf.mxu1 }
 0x334   :  { %5054 = vmatprep.mubr.msk.f32.mxu0 %vm342_vm0, %v6257_v57 }
 0x335   :  { %v5024_v45 = vpop.f32.mrf.mxu1 }
 0x337   :  { %5055 = vmatmul.mubr.msk.f32.gmra.mxu0 %vm342_vm0, %v6266_v35  ;;  %v918_v36 = vpop.f32.mrf.mxu1 }
 0x3db   :  { %v6282_v50 = vpop.f32.mrf.mxu0 }
 0x3dd   :  { %v6284_v56 = vpop.f32.mrf.mxu0 }
 0x3df   :  { %v6286_v58 = vpop.f32.mrf.mxu0 }
 0x3e1   :  { %v6288_v61 = vpop.f32.mrf.mxu0 }
 0x3e3   :  { %v5041_v2 = vpop.f32.mrf.mxu0 }
 0x3e5   :  { %v1061_v4 = vpop.f32.mrf.mxu0 }
 0x3e7   :  { %v5044_v6 = vpop.f32.mrf.mxu0 }
 0x3e9   :  { %v1071_v10 = vpop.f32.mrf.mxu0 }
 0x3eb   :  { %v5047_v27 = vpop.f32.mrf.mxu0 }
 0x3ed   :  { %v1081_v35 = vpop.f32.mrf.mxu0 }
 0x3ef   :  { %v5050_v57 = vpop.f32.mrf.mxu0 }
 0x3f0   :  { %v1097_v38 = vadd.f32 %v5050_v57, %v5018_v3 }
 0x3f1   :  { %v1091_v39 = vpop.f32.mrf.mxu0 }
 0x3f3   :  { %v5053_v51 = vpop.f32.mrf.mxu0 }
 0x3f4   :  { %v1107_v1 = vadd.f32 %v5053_v51, %v5021_v22  ;;  %v1092_v22 = vadd.f32 %v1091_v39, %v898_v24  ;;  %v1067_v39 = vadd.f32 %v5041_v2, %v6278_v19  ;;  %v1057_v19 = vadd.f32 %v6286_v58, %v6274_v30 }
 0x3f5   :  { %v1101_v41 = vpop.f32.mrf.mxu0  ;;  %v1047_v30 = vadd.f32 %v6282_v50, %v6270_v59 }
 0x3f6   :  { %v1102_v9 = vadd.f32 %v1101_v41, %v908_v53  ;;  %v1140_v37 = vadd.f32 %v6293_v34, %v1107_v1  ;;  %v1087_v41 = vadd.f32 %v5047_v27, %v5015_v52  ;;  %v1132_v52 = vadd.f32 %v6293_v34, %v1067_v39  ;;  %v6396_v27 = vld [vmem:[%s7913_s4 + $0x30] sm:$0xff]  ;;  %v3993_v39 = vld [vmem:[%s7917_s8 + $0x240] sm:$0xff] }
 0x3f7   :  { %v5056_v40 = vpop.f32.mrf.mxu0  ;;  %v1130_v58 = vadd.f32 %v6293_v34, %v1057_v19  ;;  %v1128_v59 = vadd.f32 %v6293_v34, %v1047_v30  ;;  %v3991_v19 = vld [vmem:[%s7917_s8 + $0x230] sm:$0xff]  ;;  %v3989_v30 = vld [vmem:[%s7917_s8 + $0x220] sm:$0xff] }
 0x3f8   :  { %v1117_v5 = vadd.f32 %v5056_v40, %v5024_v45  ;;  %v1139_v40 = vadd.f32 %v6293_v34, %v1102_v9  ;;  %v1136_v9 = vadd.f32 %v6293_v34, %v1087_v41  ;;  %v4048_v41 = vld [vmem:[%s7917_s8 + $0x3f8] sm:$0xff] }
 0x3f9   :  { %v1111_v7 = vpop.f32.mrf.mxu0  ;;  %v6366_v50 = vmax.f32 %v1130_v58, 0.0  ;;  %v4004_v58 = vld [vmem:[%s7917_s8 + $0x298] sm:$0xff] }
 0x3fa   :  { %v1142_v28 = vadd.f32 %v6293_v34, %v1117_v5  ;;  %v1112_v47 = vadd.f32 %v1111_v7, %v918_v36  ;;  %v1138_v5 = vadd.f32 %v6293_v34, %v1097_v38  ;;  %v6306_v7 = vmax.f32 %v1140_v37, 0.0 }
 0x3fb   :  { %v6311_v36 = vmax.f32 %v1139_v40, 0.0  ;;  %v1072_v37 = vadd.f32 %v1071_v10, %v878_v49  ;;  %v6327_v57 = vmax.f32 %v1136_v9, 0.0  ;;  %v4016_v40 = vld [vmem:[%s7917_s8 + $0x2f8] sm:$0xff]  ;;  %v4010_v9 = vld [vmem:[%s7917_s8 + $0x2c8] sm:$0xff] }
 0x3fc   :  { %v6297_v31 = vmax.f32 %v1142_v28, 0.0  ;;  %v1141_v29 = vadd.f32 %v6293_v34, %v1112_v47  ;;  %v1082_v28 = vadd.f32 %v1081_v35, %v888_v60  ;;  %v1137_v47 = vadd.f32 %v6293_v34, %v1092_v22  ;;  %v6408_v22 = vld [vmem:[%s7913_s4 + $0x20] sm:$0xff]  ;;  %4500 = vmatprep.subr.mxu0 %v4016_v40  ;;  %v4047_v40 = vld [vmem:[%s7917_s8 + $0x3f0] sm:$0xff] }
 0x3fd   :  { %v6316_v1 = vmax.f32 %v1138_v5, 0.0  ;;  %v1062_v35 = vadd.f32 %v1061_v4, %v6280_v46  ;;  %v1052_v46 = vadd.f32 %v6288_v61, %v6276_v42  ;;  %v6354_v4 = vmax.f32 %v1132_v52, 0.0  ;;  %v4012_v5 = vld [vmem:[%s7917_s8 + $0x2d8] sm:$0xff]  ;;  %v4006_v52 = vld [vmem:[%s7917_s8 + $0x2a8] sm:$0xff] }
 0x3fe   :  { %v6301_v45 = vmax.f32 %v1141_v29, 0.0  ;;  %5057 = vmatprep.subr.mxu1 %v6297_v31  ;;  %v1077_v29 = vadd.f32 %v5044_v6, %v5012_v48  ;;  %v1135_v38 = vadd.f32 %v6293_v34, %v1082_v28  ;;  %v6321_v51 = vmax.f32 %v1137_v47, 0.0  ;;  %v3996_v28 = vld [vmem:[%s7917_s8 + $0x258] sm:$0xff]  ;;  %v4011_v47 = vld [vmem:[%s7917_s8 + $0x2d0] sm:$0xff] }
 0x3ff   :  { %5058 = vmatpush3.msra.mxu1 %v6297_v31  ;;  %v1133_v48 = vadd.f32 %v6293_v34, %v1072_v37  ;;  %v1131_v2 = vadd.f32 %v6293_v34, %v1062_v35  ;;  %v1042_v42 = vadd.f32 %v6284_v56, %v6272_v63  ;;  %v1129_v61 = vadd.f32 %v6293_v34, %v1052_v46  ;;  %v3994_v37 = vld [vmem:[%s7917_s8 + $0x248] sm:$0xff]  ;;  %v3992_v35 = vld [vmem:[%s7917_s8 + $0x238] sm:$0xff] }
 0x400   :  { %5059 = vmatprep.subr.mxu1 %v6301_v45  ;;  %v1134_v53 = vadd.f32 %v6293_v34, %v1077_v29  ;;  %v6333_v49 = vmax.f32 %v1135_v38, 0.0  ;;  %v6375_v63 = vmax.f32 %v1128_v59, 0.0  ;;  %v3995_v29 = vld [vmem:[%s7917_s8 + $0x250] sm:$0xff]  ;;  %v4009_v38 = vld [vmem:[%s7917_s8 + $0x2c0] sm:$0xff]  ;;  %v3990_v46 = vld [vmem:[%s7917_s8 + $0x228] sm:$0xff] }
 0x401   :  { %5060 = vmatpush3.msra.mxu1 %v6301_v45  ;;  %v6347_v3 = vmax.f32 %v1133_v48, 0.0  ;;  %v6361_v6 = vmax.f32 %v1131_v2, 0.0  ;;  %v1127_v24 = vadd.f32 %v6293_v34, %v1042_v42  ;;  %v6371_v10 = vmax.f32 %v1129_v61, 0.0  ;;  %v6389_v34 = vld [vmem:[%s7913_s4 + $0x38] sm:$0xff]  ;;  %v4007_v48 = vld [vmem:[%s7917_s8 + $0x2b0] sm:$0xff]  ;;  %v4005_v2 = vld [vmem:[%s7917_s8 + $0x2a0] sm:$0xff] }
 0x402   :  { %5061 = vmatprep.subr.mxu1 %v6306_v7  ;;  %v6340_v60 = vmax.f32 %v1134_v53, 0.0  ;;  %v4008_v53 = vld [vmem:[%s7917_s8 + $0x2b8] sm:$0xff] }
 0x403   :  { %5062 = vmatpush3.msra.mxu1 %v6306_v7  ;;  %v6380_v56 = vmax.f32 %v1127_v24, 0.0  ;;  %v3988_v42 = vld [vmem:[%s7917_s8 + $0x218] sm:$0xff] }
 0x404   :  { %5063 = vmatprep.subr.mxu1 %v6311_v36  ;;  %v4032_v59 = vld [vmem:[%s7917_s8 + $0x378] sm:$0xff] }
 0x405   :  { %5064 = vmatpush3.msra.mxu1 %v6311_v36 }
 0x406   :  { %5065 = vmatprep.subr.mxu1 %v6316_v1 }
 0x407   :  { %5066 = vmatpush3.msra.mxu1 %v6316_v1 }
 0x408   :  { %5067 = vmatprep.subr.mxu1 %v6321_v51 }
 0x409   :  { %5068 = vmatpush3.msra.mxu1 %v6321_v51 }
 0x40a   :  { %5069 = vmatprep.subr.mxu1 %v6327_v57 }
 0x40b   :  { %5070 = vmatpush3.msra.mxu1 %v6327_v57 }
 0x40c   :  { %5071 = vmatprep.subr.mxu1 %v6333_v49 }
 0x40d   :  { %5072 = vmatpush3.msra.mxu1 %v6333_v49 }
 0x40e   :  { %5073 = vmatprep.subr.mxu1 %v6340_v60 }
 0x40f   :  { %5074 = vmatpush3.msra.mxu1 %v6340_v60 }
 0x410   :  { %5075 = vmatprep.subr.mxu1 %v6347_v3 }
 0x411   :  { %5076 = vmatpush3.msra.mxu1 %v6347_v3 }
 0x412   :  { %5077 = vmatprep.subr.mxu1 %v6354_v4 }
 0x413   :  { %5078 = vmatpush3.msra.mxu1 %v6354_v4 }
 0x414   :  { %5079 = vmatprep.subr.mxu1 %v6361_v6 }
 0x415   :  { %5080 = vmatpush3.msra.mxu1 %v6361_v6 }
 0x416   :  { %5081 = vmatprep.subr.mxu1 %v6366_v50 }
 0x417   :  { %5082 = vmatpush3.msra.mxu1 %v6366_v50 }
 0x418   :  { %5083 = vmatprep.subr.mxu1 %v6371_v10 }
 0x419   :  { %5084 = vmatpush3.msra.mxu1 %v6371_v10 }
 0x41a   :  { %5085 = vmatprep.subr.mxu1 %v6375_v63 }
 0x41b   :  { %5086 = vmatpush3.msra.mxu1 %v6375_v63 }
 0x41c   :  { %5087 = vmatprep.subr.mxu1 %v6380_v56 }
 0x41d   :  { %5088 = vmatpush3.msra.mxu1 %v6380_v56 }
 0x41e   :  { %5090 = vmatmul.mubr.f32.vlgmr.msra.gmra.mxu1 %v5750_v11  ;;  %1312 = vmatprep.subr.mxu1 %v6389_v34  ;;  %v6402_v11 = vld [vmem:[%s7913_s4 + $0x28] sm:$0xff] }
 0x41f   :  { %5092 = vmatprep.mubr.f32.mxu1 %v5756_v12  ;;  %1313 = vmatpush1.msra.mxu1 %v6396_v27  ;;  %v6415_v12 = vld [vmem:[%s7913_s4 + $0x18] sm:$0xff] }
 0x420   :  { %1314 = vmatprep.subr.mxu1 %v6402_v11 }
 0x421   :  { %1315 = vmatpush1.msra.mxu1 %v6408_v22 }
 0x422   :  { %5093 = vmatmul.mubr.f32.gmra.mxu1 %v5764_v13  ;;  %1316 = vmatprep.subr.mxu1 %v6415_v12  ;;  %v7986_v13 = vmov 0.0  }
 0x423   :  { %5095 = vmatprep.mubr.f32.mxu1 %v5769_v14  ;;  %1317 = vmatpush1.msra.mxu1 %v5794_v18  ;;  %v4000_v14 = vld [vmem:[%s7917_s8 + $0x278] sm:$0xff]  ;;  %v4015_v18 = vld [vmem:[%s7917_s8 + $0x2f0] sm:$0xff] }
 0x424   :  { %1318 = vmatprep.subr.mxu1 %v5800_v20  ;;  %4501 = vmatpush3.msra.mxu0 %v4000_v14  ;;  %v4013_v20 = vld [vmem:[%s7917_s8 + $0x2e0] sm:$0xff]  ;;  %v4031_v14 = vld [vmem:[%s7917_s8 + $0x370] sm:$0xff] }
 0x425   :  { %1319 = vmatpush1.msra.mxu1 %v5806_v21  ;;  %4502 = vmatprep.subr.mxu0 %v4015_v18  ;;  %v3997_v21 = vld [vmem:[%s7917_s8 + $0x260] sm:$0xff]  ;;  %v4046_v18 = vld [vmem:[%s7917_s8 + $0x3e8] sm:$0xff] }
 0x426   :  { %5096 = vmatmul.mubr.f32.gmra.mxu1 %v5776_v15  ;;  %v3999_v15 = vld [vmem:[%s7917_s8 + $0x270] sm:$0xff]  ;;  %4544 = vmatprep.subr.mxu1 %v4048_v41  ;;  %v4028_v41 = vld [vmem:[%s7917_s8 + $0x358] sm:$0xff] }
 0x427   :  { %5098 = vmatprep.mubr.f32.mxu1 %v5781_v16  ;;  %v4014_v16 = vld [vmem:[%s7917_s8 + $0x2e8] sm:$0xff]  ;;  %4503 = vmatpush3.msra.mxu0 %v3999_v15 }
 0x428   :  { %4504 = vmatprep.subr.mxu0 %v4014_v16  ;;  %v4030_v15 = vld [vmem:[%s7917_s8 + $0x368] sm:$0xff] }
 0x42a   :  { %5099 = vmatmul.mubr.f32.gmra.mxu1 %v5788_v17  ;;  %v3998_v17 = vld [vmem:[%s7917_s8 + $0x268] sm:$0xff] }
 0x42b   :  { %1352 = vmatprep.mubr.f32.mxu1 %v7986_v13  ;;  %4505 = vmatpush3.msra.mxu0 %v3998_v17  ;;  %v4045_v17 = vld [vmem:[%s7917_s8 + $0x3e0] sm:$0xff] }
 0x42c   :  { %4506 = vmatprep.subr.mxu0 %v4013_v20  ;;  %v4029_v20 = vld [vmem:[%s7917_s8 + $0x360] sm:$0xff] }
 0x42d   :  { %4507 = vmatpush3.msra.mxu0 %v3997_v21  ;;  %v4044_v21 = vld [vmem:[%s7917_s8 + $0x3d8] sm:$0xff] }
 0x42e   :  { %4508 = vmatprep.subr.mxu0 %v4012_v5 }
 0x42f   :  { %4509 = vmatpush3.msra.mxu0 %v3996_v28 }
 0x430   :  { %4510 = vmatprep.subr.mxu0 %v4011_v47 }
 0x431   :  { %4511 = vmatpush3.msra.mxu0 %v3995_v29 }
 0x432   :  { %4512 = vmatprep.subr.mxu0 %v4010_v9 }
 0x433   :  { %4513 = vmatpush3.msra.mxu0 %v3994_v37  ;;  %v4003_v37 = vld [vmem:[%s7917_s8 + $0x290] sm:$0xff] }
 0x434   :  { %4514 = vmatprep.subr.mxu0 %v4009_v38  ;;  %v4043_v38 = vld [vmem:[%s7917_s8 + $0x3d0] sm:$0xff] }
 0x435   :  { %4515 = vmatpush3.msra.mxu0 %v3993_v39  ;;  %v3987_v39 = vld [vmem:[%s7917_s8 + $0x210] sm:$0xff] }
 0x436   :  { %4516 = vmatprep.subr.mxu0 %v4008_v53  ;;  %v4027_v53 = vld [vmem:[%s7917_s8 + $0x350] sm:$0xff] }
 0x437   :  { %4517 = vmatpush3.msra.mxu0 %v3992_v35  ;;  %v4002_v35 = vld [vmem:[%s7917_s8 + $0x288] sm:$0xff] }
 0x438   :  { %4518 = vmatprep.subr.mxu0 %v4007_v48  ;;  %v4042_v48 = vld [vmem:[%s7917_s8 + $0x3c8] sm:$0xff] }
 0x439   :  { %4519 = vmatpush3.msra.mxu0 %v3991_v19  ;;  %v3986_v19 = vld [vmem:[%s7917_s8 + $0x208] sm:$0xff] }
 0x43a   :  { %4520 = vmatprep.subr.mxu0 %v4006_v52  ;;  %v4026_v52 = vld [vmem:[%s7917_s8 + $0x348] sm:$0xff] }
 0x43b   :  { %4521 = vmatpush3.msra.mxu0 %v3990_v46  ;;  %v4001_v46 = vld [vmem:[%s7917_s8 + $0x280] sm:$0xff] }
 0x43c   :  { %4522 = vmatprep.subr.mxu0 %v4005_v2  ;;  %v4041_v2 = vld [vmem:[%s7917_s8 + $0x3c0] sm:$0xff] }
 0x43d   :  { %4523 = vmatpush3.msra.mxu0 %v3989_v30  ;;  %v3985_v30 = vld [vmem:[%s7917_s8 + $0x200] sm:$0xff] }
 0x43e   :  { %4524 = vmatprep.subr.mxu0 %v4004_v58  ;;  %v4025_v58 = vld [vmem:[%s7917_s8 + $0x340] sm:$0xff] }
 0x43f   :  { %4525 = vmatpush3.msra.mxu0 %v3988_v42  ;;  %v4040_v42 = vld [vmem:[%s7917_s8 + $0x3b8] sm:$0xff] }
 0x440   :  { %4526 = vmatprep.subr.mxu0 %v4003_v37 }
 0x441   :  { %4527 = vmatpush3.msra.mxu0 %v3987_v39 }
 0x442   :  { %4528 = vmatprep.subr.mxu0 %v4002_v35  ;;  %v4051_v35 = vld [vmem:[%s7918_s9 + $0x30] sm:$0xff] }
 0x443   :  { %4529 = vmatpush3.msra.mxu0 %v3986_v19 }
 0x444   :  { %4530 = vmatprep.subr.mxu0 %v4001_v46 }
 0x445   :  { %4531 = vmatpush3.msra.mxu0 %v3985_v30 }
 0x4de   :  { %v5091_v61 = vpop.f32.mrf.mxu1 }
 0x4e0   :  { %v1225_v24 = vpop.f32.mrf.mxu1 }
 0x4e1   :  { %3977 = vmatmul.mubr.msk.f32.vlgmr.msra.gmra.mxu1 %vm342_vm0, %v1225_v24  ;;  %v4023_v24 = vld [vmem:[%s7917_s8 + $0x330] sm:$0xff] }
 0x4e2   :  { %1358 = vmatprep.mubr.f32.mxu1 %v7986_v13  ;;  %4545 = vmatpush3.msra.mxu1 %v4032_v59  ;;  %v5094_v16 = vpop.f32.mrf.mxu1  ;;  %v4039_v59 = vld [vmem:[%s7917_s8 + $0x3b0] sm:$0xff] }
 0x4e3   :  { %4546 = vmatprep.subr.mxu1 %v4047_v40  ;;  %v4038_v40 = vld [vmem:[%s7917_s8 + $0x3a8] sm:$0xff] }
 0x4e4   :  { %4547 = vmatpush3.msra.mxu1 %v4031_v14  ;;  %v1235_v5 = vpop.f32.mrf.mxu1  ;;  %v4022_v14 = vld [vmem:[%s7917_s8 + $0x328] sm:$0xff] }
 0x4e5   :  { %3978 = vmatmul.mubr.msk.f32.gmra.mxu1 %vm342_vm0, %v5091_v61  ;;  %4548 = vmatprep.subr.mxu1 %v4046_v18  ;;  %v4024_v61 = vld [vmem:[%s7917_s8 + $0x338] sm:$0xff]  ;;  %v4037_v18 = vld [vmem:[%s7917_s8 + $0x3a0] sm:$0xff] }
 0x4e6   :  { %1364 = vmatprep.mubr.f32.mxu1 %v7986_v13  ;;  %4549 = vmatpush3.msra.mxu1 %v4030_v15  ;;  %v5097_v28 = vpop.f32.mrf.mxu1  ;;  %v4021_v15 = vld [vmem:[%s7917_s8 + $0x320] sm:$0xff] }
 0x4e7   :  { %4550 = vmatprep.subr.mxu1 %v4045_v17  ;;  %v4052_v17 = vld [vmem:[%s7918_s9 + $0x38] sm:$0xff] }
 0x4e8   :  { %4551 = vmatpush3.msra.mxu1 %v4029_v20  ;;  %v1245_v47 = vpop.f32.mrf.mxu1  ;;  %5101 = vmatprep.subr.mxu0 %v4052_v17  ;;  %v4020_v20 = vld [vmem:[%s7917_s8 + $0x318] sm:$0xff] }
 0x4e9   :  { %3979 = vmatmul.mubr.msk.f32.gmra.mxu1 %vm342_vm0, %v1235_v5  ;;  %4552 = vmatprep.subr.mxu1 %v4044_v21  ;;  %v4035_v21 = vld [vmem:[%s7917_s8 + $0x390] sm:$0xff]  ;;  %v4034_v5 = vld [vmem:[%s7917_s8 + $0x388] sm:$0xff] }
 0x4ea   :  { %1370 = vmatprep.mubr.f32.mxu1 %v7986_v13  ;;  %4553 = vmatpush3.msra.mxu1 %v4028_v41  ;;  %v5100_v29 = vpop.f32.mrf.mxu1  ;;  %v4019_v41 = vld [vmem:[%s7917_s8 + $0x310] sm:$0xff] }
 0x4eb   :  { %4554 = vmatprep.subr.mxu1 %v4043_v38 }
 0x4ec   :  { %v1255_v9 = vpop.f32.mrf.mxu1  ;;  %4555 = vmatpush3.msra.mxu1 %v4027_v53 }
 0x4ed   :  { %3980 = vmatmul.mubr.msk.f32.gmra.mxu1 %vm342_vm0, %v5094_v16  ;;  %4556 = vmatprep.subr.mxu1 %v4042_v48  ;;  %v4036_v16 = vld [vmem:[%s7917_s8 + $0x398] sm:$0xff] }
 0x4ee   :  { %1376 = vmatprep.mubr.f32.mxu1 %v7986_v13  ;;  %4557 = vmatpush3.msra.mxu1 %v4026_v52  ;;  %v4050_v52 = vld [vmem:[%s7918_s9 + $0x28] sm:$0xff] }
 0x4ef   :  { %4558 = vmatprep.subr.mxu1 %v4041_v2 }
 0x4f0   :  { %4559 = vmatpush3.msra.mxu1 %v4025_v58 }
 0x4f1   :  { %3981 = vmatmul.mubr.msk.f32.gmra.mxu1 %vm342_vm0, %v1245_v47  ;;  %4560 = vmatprep.subr.mxu1 %v4040_v42  ;;  %v4033_v47 = vld [vmem:[%s7917_s8 + $0x380] sm:$0xff] }
 0x4f2   :  { %1382 = vmatprep.mubr.f32.mxu1 %v7986_v13  ;;  %4561 = vmatpush3.msra.mxu1 %v4024_v61 }
 0x4f3   :  { %4562 = vmatprep.subr.mxu1 %v4039_v59 }
 0x4f4   :  { %4563 = vmatpush3.msra.mxu1 %v4023_v24 }
 0x4f5   :  { %3982 = vmatmul.mubr.msk.f32.gmra.mxu1 %vm342_vm0, %v5097_v28  ;;  %4564 = vmatprep.subr.mxu1 %v4038_v40  ;;  %v4018_v28 = vld [vmem:[%s7917_s8 + $0x308] sm:$0xff] }
 0x4f6   :  { %1388 = vmatprep.mubr.f32.mxu1 %v7986_v13  ;;  %4565 = vmatpush3.msra.mxu1 %v4022_v14 }
 0x4f7   :  { %4566 = vmatprep.subr.mxu1 %v4037_v18 }
 0x4f8   :  { %4567 = vmatpush3.msra.mxu1 %v4021_v15 }
 0x4f9   :  { %3983 = vmatmul.mubr.msk.f32.gmra.mxu1 %vm342_vm0, %v1255_v9  ;;  %4568 = vmatprep.subr.mxu1 %v4036_v16 }
 0x4fa   :  { %1394 = vmatprep.mubr.f32.mxu1 %v7986_v13  ;;  %4569 = vmatpush3.msra.mxu1 %v4020_v20 }
 0x4fb   :  { %4570 = vmatprep.subr.mxu1 %v4035_v21 }
 0x4fc   :  { %4571 = vmatpush3.msra.mxu1 %v4019_v41 }
 0x4fd   :  { %3984 = vmatmul.mubr.msk.f32.gmra.mxu1 %vm342_vm0, %v5100_v29  ;;  %4572 = vmatprep.subr.mxu1 %v4034_v5  ;;  %v4017_v29 = vld [vmem:[%s7917_s8 + $0x300] sm:$0xff] }
 0x4fe   :  { %4573 = vmatpush3.msra.mxu1 %v4018_v28 }
 0x4ff   :  { %4574 = vmatprep.subr.mxu1 %v4033_v47 }
 0x500   :  { %4575 = vmatpush3.msra.mxu1 %v4017_v29 }
 0x5a1   :  { %v1354_v9 = vpop.f32.mrf.mxu1 }
 0x5a2   :  { %v1401_v39 = vmul.f32 %v1354_v9, %v6028_v26  ;;  %v4049_v26 = vld [vmem:[%s7918_s9 + $0x20] sm:$0xff] }
 0x5a3   :  { %v1356_v37 = vpop.f32.mrf.mxu1 }
 0x5a4   :  { %v1402_v38 = vmul.f32 %v1356_v37, %v6023_v25 }
 0x5a5   :  { %v1360_v53 = vpop.f32.mrf.mxu1 }
 0x5a6   :  { %1546 = vmatprep.mubr.f32.mxu0 %v1402_v38  ;;  %v1403_v46 = vmul.f32 %v1360_v53, %v6040_v33 }
 0x5a7   :  { %v1362_v48 = vpop.f32.mrf.mxu1  ;;  %1547 = vmatmul.mubr.f32.vlgmr.msra.gmra.mxu0 %v1401_v39 }
 0x5a8   :  { %v1404_v19 = vmul.f32 %v1362_v48, %v6035_v32  ;;  %5102 = vmatpush3.msra.mxu0 %v4052_v17 }
 0x5a9   :  { %v1366_v25 = vpop.f32.mrf.mxu1  ;;  %5103 = vmatprep.subr.mxu0 %v4051_v35 }
 0x5aa   :  { %1551 = vmatprep.mubr.f32.mxu0 %v1404_v19  ;;  %5104 = vmatpush3.msra.mxu0 %v4051_v35  ;;  %v1405_v30 = vmul.f32 %v1366_v25, %v6058_v44 }
 0x5ab   :  { %v1368_v2 = vpop.f32.mrf.mxu1  ;;  %1552 = vmatmul.mubr.f32.gmra.mxu0 %v1403_v46  ;;  %5105 = vmatprep.subr.mxu0 %v4050_v52 }
 0x5ac   :  { %v1406_v32 = vmul.f32 %v1368_v2, %v6053_v43  ;;  %5106 = vmatpush3.msra.mxu0 %v4050_v52  ;;  %v7993_v2 = vld [vmem:[#allocation12_spill] sm:$0xff] }
 0x5ad   :  { %v1372_v58 = vpop.f32.mrf.mxu1  ;;  %5107 = vmatprep.subr.mxu0 %v4049_v26 }
 0x5ae   :  { %1556 = vmatprep.mubr.f32.mxu0 %v1406_v32  ;;  %5108 = vmatpush3.msra.mxu0 %v4049_v26  ;;  %v1407_v61 = vmul.f32 %v1372_v58, %v6073_v55  ;;  %v7992_v26 = vld [vmem:[#allocation11_spill] sm:$0xff]  ;;  %v7994_v32 = vld [vmem:[#allocation13_spill] sm:$0xff] }
 0x5af   :  { %v1374_v33 = vpop.f32.mrf.mxu1  ;;  %1557 = vmatmul.mubr.f32.gmra.mxu0 %v1405_v30  ;;  %v7995_v30 = vld [vmem:[#allocation14_spill] sm:$0xff]  ;;  %v7996_v58 = vld [vmem:[#allocation15_spill] sm:$0xff] }
 0x5b0   :  { %v1408_v42 = vmul.f32 %v1374_v33, %v6068_v54  ;;  %v7997_v33 = vld [vmem:[#allocation16_spill] sm:$0xff] }
 0x5b1   :  { %v1378_v59 = vpop.f32.mrf.mxu1 }
 0x5b2   :  { %1561 = vmatprep.mubr.f32.mxu0 %v1408_v42  ;;  %v1409_v43 = vmul.f32 %v1378_v59, %v6085_v0  ;;  %v7987_v0 = vld [vmem:[#allocation6_spill] sm:$0xff]  ;;  %v7998_v42 = vld [vmem:[#allocation17_spill] sm:$0xff]  ;;  %v8000_v59 = vld [vmem:[#allocation19_spill] sm:$0xff] }
 0x5b3   :  { %v1380_v24 = vpop.f32.mrf.mxu1  ;;  %1562 = vmatmul.mubr.f32.gmra.mxu0 %v1407_v61  ;;  %v7999_v61 = vld [vmem:[#allocation18_spill] sm:$0xff] }
 0x5b4   :  { %v1410_v40 = vmul.f32 %v1380_v24, %v6080_v62  ;;  %5109 = vmatprep.mubr.msk.f32.mxu0 %vm342_vm0, %v6380_v56  ;;  %v8001_v24 = vld [vmem:[#allocation20_spill] sm:$0xff] }
 0x5b5   :  { %v1384_v44 = vpop.f32.mrf.mxu1 }
 0x5b6   :  { %1631 = vmatprep.mubr.f32.mxu1 %v1410_v40  ;;  %v1411_v55 = vmul.f32 %v1384_v44, %v6099_v23  ;;  %v7989_v23 = vld [vmem:[#allocation8_spill] sm:$0xff]  ;;  %v8002_v40 = vld [vmem:[#allocation21_spill] sm:$0xff]  ;;  %v8004_v44 = vld [vmem:[#allocation23_spill] sm:$0xff] }
 0x5b7   :  { %v1386_v14 = vpop.f32.mrf.mxu1  ;;  %1632 = vmatmul.mubr.f32.vlgmr.msra.gmra.mxu1 %v1409_v43  ;;  %5110 = vmatmul.mubr.msk.f32.vlgmr.msra.gmra.mxu0 %vm342_vm0, %v6375_v63  ;;  %v7988_v63 = vld [vmem:[#allocation7_spill] sm:$0xff]  ;;  %v8003_v43 = vld [vmem:[#allocation22_spill] sm:$0xff] }
 0x5b8   :  { %v1412_v54 = vmul.f32 %v1386_v14, %v6094_v8  ;;  %5112 = vmatprep.mubr.msk.f32.mxu0 %vm342_vm0, %v6371_v10  ;;  %v8005_v14 = vld [vmem:[#allocation24_spill] sm:$0xff] }
 0x5b9   :  { %v1390_v62 = vpop.f32.mrf.mxu1 }
 0x5ba   :  { %1636 = vmatprep.mubr.f32.mxu1 %v1412_v54  ;;  %v1413_v15 = vmul.f32 %v1390_v62, %v7988_v63  ;;  %v8006_v54 = vld [vmem:[#allocation25_spill] sm:$0xff] }
 0x5bb   :  { %v1392_v18 = vpop.f32.mrf.mxu1  ;;  %1637 = vmatmul.mubr.f32.gmra.mxu1 %v1411_v55  ;;  %5113 = vmatmul.mubr.msk.f32.gmra.mxu0 %vm342_vm0, %v6366_v50  ;;  %v7990_v50 = vld [vmem:[#allocation9_spill] sm:$0xff] }
 0x5bc   :  { %v1414_v56 = vmul.f32 %v1392_v18, %v7987_v0  ;;  %5115 = vmatprep.mubr.msk.f32.mxu0 %vm342_vm0, %v6361_v6  ;;  %v7991_v6 = vld [vmem:[#allocation10_spill] sm:$0xff] }
 0x5bd   :  { %v1396_v8 = vpop.f32.mrf.mxu1 }
 0x5be   :  { %1641 = vmatprep.mubr.f32.mxu1 %v1414_v56  ;;  %v1415_v17 = vmul.f32 %v1396_v8, %v7990_v50 }
 0x5bf   :  { %v1398_v16 = vpop.f32.mrf.mxu1  ;;  %1642 = vmatmul.mubr.f32.gmra.mxu1 %v1413_v15  ;;  %5116 = vmatmul.mubr.msk.f32.gmra.mxu0 %vm342_vm0, %v6354_v4 }
 0x5c0   :  { %v1416_v10 = vmul.f32 %v1398_v16, %v7989_v23  ;;  %5118 = vmatprep.mubr.msk.f32.mxu0 %vm342_vm0, %v6347_v3 }
 0x5c2   :  { %1646 = vmatprep.mubr.f32.mxu1 %v1416_v10 }
 0x5c3   :  { %1647 = vmatmul.mubr.f32.gmra.mxu1 %v1415_v17  ;;  %5119 = vmatmul.mubr.msk.f32.gmra.mxu0 %vm342_vm0, %v6340_v60 }
 0x5c4   :  { %5121 = vmatprep.mubr.msk.f32.mxu0 %vm342_vm0, %v6333_v49  ;;  %5141 = vmatprep.mubr.msk.f32.mxu1 %vm342_vm0, %v7991_v6 }
 0x5c7   :  { %5122 = vmatmul.mubr.msk.f32.gmra.mxu0 %vm342_vm0, %v6327_v57  ;;  %v6698_v57 = vld [vmem:[%s7912_s3] sm:$0xff] }
 0x5c8   :  { %5124 = vmatprep.mubr.msk.f32.mxu0 %vm342_vm0, %v6321_v51 }
 0x5cb   :  { %5125 = vmatmul.mubr.msk.f32.gmra.mxu0 %vm342_vm0, %v6316_v1 }
 0x5cc   :  { %5127 = vmatprep.mubr.msk.f32.mxu0 %vm342_vm0, %v6311_v36 }
 0x5cf   :  { %5128 = vmatmul.mubr.msk.f32.gmra.mxu0 %vm342_vm0, %v6306_v7 }
 0x5d0   :  { %5130 = vmatprep.mubr.msk.f32.mxu0 %vm342_vm0, %v6301_v45 }
 0x5d3   :  { %5131 = vmatmul.mubr.msk.f32.gmra.mxu0 %vm342_vm0, %v6297_v31 }
 0x5d4   :  { %5197 = vmatprep.mubr.f32.mxu0 %v6698_v57 }
 0x667   :  { %v4532_v1 = vpop.f32.mrf.mxu0 }
 0x669   :  { %v4533_v51 = vpop.f32.mrf.mxu0 }
 0x66a   :  { %v4534_v52 = vadd.f32 %v4533_v51, %v4532_v1 }
 0x66b   :  { %v4535_v49 = vpop.f32.mrf.mxu0 }
 0x66d   :  { %v4536_v36 = vpop.f32.mrf.mxu0 }
 0x66e   :  { %v4537_v35 = vadd.f32 %v4536_v36, %v4535_v49 }
 0x66f   :  { %v4538_v60 = vpop.f32.mrf.mxu0 }
 0x671   :  { %v4539_v4 = vpop.f32.mrf.mxu0 }
 0x672   :  { %v4540_v38 = vadd.f32 %v4539_v4, %v4538_v60 }
 0x673   :  { %v4541_v21 = vpop.f32.mrf.mxu0 }
 0x675   :  { %v4542_v5 = vpop.f32.mrf.mxu0 }
 0x676   :  { %v4543_v29 = vadd.f32 %v4542_v5, %v4541_v21 }
 0x677   :  { %v4576_v3 = vpop.f32.mrf.mxu1  ;;  %v6731_v55 = vpop.f32.mrf.mxu0 }
 0x679   :  { %v4577_v7 = vpop.f32.mrf.mxu1  ;;  %v6733_v62 = vpop.f32.mrf.mxu0 }
 0x67a   :  { %v4578_v48 = vadd.f32 %v4577_v7, %v4576_v3 }
 0x67b   :  { %v4579_v20 = vpop.f32.mrf.mxu1  ;;  %v6735_v18 = vpop.f32.mrf.mxu0 }
 0x67c   :  { %v1634_v25 = vadd.f32 %v4578_v48, %v4534_v52 }
 0x67d   :  { %v4580_v45 = vpop.f32.mrf.mxu1  ;;  %v6737_v0 = vpop.f32.mrf.mxu0 }
 0x67e   :  { %v4581_v39 = vadd.f32 %v4580_v45, %v4579_v20 }
 0x67f   :  { %v4582_v41 = vpop.f32.mrf.mxu1  ;;  %v6739_v56 = vpop.f32.mrf.mxu0 }
 0x680   :  { %v1639_v46 = vadd.f32 %v4581_v39, %v4537_v35 }
 0x681   :  { %v4583_v31 = vpop.f32.mrf.mxu1  ;;  %v6741_v63 = vpop.f32.mrf.mxu0 }
 0x682   :  { %v4584_v9 = vadd.f32 %v4583_v31, %v4582_v41 }
 0x683   :  { %v4585_v28 = vpop.f32.mrf.mxu1  ;;  %v5120_v15 = vpop.f32.mrf.mxu0 }
 0x684   :  { %v1644_v19 = vadd.f32 %v4584_v9, %v4540_v38  ;;  %v6754_v38 = vld [vmem:[%s7919_s10 + $0x1] ss:$0 sm:$0xff] }
 0x685   :  { %v4586_v47 = vpop.f32.mrf.mxu1  ;;  %v1801_v8 = vpop.f32.mrf.mxu0 }
 0x686   :  { %v4587_v37 = vadd.f32 %v4586_v47, %v4585_v28 }
 0x687   :  { %v5123_v23 = vpop.f32.mrf.mxu0 }
 0x688   :  { %v1649_v53 = vadd.f32 %v4587_v37, %v4543_v29 }
 0x689   :  { %v1811_v17 = vpop.f32.mrf.mxu0 }
 0x68a   :  { %5133 = vmatprep.subr.mxu1 %v1649_v53 }
 0x68b   :  { %5134 = vmatpush3.msra.mxu1 %v1649_v53  ;;  %v5126_v51 = vpop.f32.mrf.mxu0 }
 0x68c   :  { %5135 = vmatprep.subr.mxu1 %v1644_v19 }
 0x68d   :  { %5136 = vmatpush3.msra.mxu1 %v1644_v19  ;;  %v1821_v60 = vpop.f32.mrf.mxu0 }
 0x68e   :  { %5137 = vmatprep.subr.mxu1 %v1639_v46 }
 0x68f   :  { %5138 = vmatpush3.msra.mxu1 %v1639_v46  ;;  %v5129_v4 = vpop.f32.mrf.mxu0 }
 0x690   :  { %5139 = vmatprep.subr.mxu1 %v1634_v25 }
 0x691   :  { %5140 = vmatpush3.msra.mxu1 %v1634_v25  ;;  %v1831_v21 = vpop.f32.mrf.mxu0 }
 0x692   :  { %5142 = vmatmul.mubr.msk.f32.vlgmr.msra.gmra.mxu1 %vm342_vm0, %v7992_v26 }
 0x693   :  { %5144 = vmatprep.mubr.msk.f32.mxu1 %vm342_vm0, %v7993_v2  ;;  %v5132_v5 = vpop.f32.mrf.mxu0 }
 0x695   :  { %v1841_v37 = vpop.f32.mrf.mxu0 }
 0x696   :  { %5145 = vmatmul.mubr.msk.f32.gmra.mxu1 %vm342_vm0, %v7994_v32 }
 0x697   :  { %5147 = vmatprep.mubr.msk.f32.mxu1 %vm342_vm0, %v7995_v30 }
 0x69a   :  { %5148 = vmatmul.mubr.msk.f32.gmra.mxu1 %vm342_vm0, %v7996_v58 }
 0x69b   :  { %5150 = vmatprep.mubr.msk.f32.mxu1 %vm342_vm0, %v7997_v33 }
 0x69e   :  { %5151 = vmatmul.mubr.msk.f32.gmra.mxu1 %vm342_vm0, %v7998_v42 }
 0x69f   :  { %5153 = vmatprep.mubr.msk.f32.mxu1 %vm342_vm0, %v7999_v61 }
 0x6a2   :  { %5154 = vmatmul.mubr.msk.f32.gmra.mxu1 %vm342_vm0, %v8000_v59 }
 0x6a3   :  { %5156 = vmatprep.mubr.msk.f32.mxu1 %vm342_vm0, %v8001_v24 }
 0x6a6   :  { %5157 = vmatmul.mubr.msk.f32.gmra.mxu1 %vm342_vm0, %v8002_v40 }
 0x6a7   :  { %5159 = vmatprep.mubr.msk.f32.mxu1 %vm342_vm0, %v8003_v43 }
 0x6aa   :  { %5160 = vmatmul.mubr.msk.f32.gmra.mxu1 %vm342_vm0, %v8004_v44 }
 0x6ab   :  { %5162 = vmatprep.mubr.msk.f32.mxu1 %vm342_vm0, %v8005_v14 }
 0x6ae   :  { %5163 = vmatmul.mubr.msk.f32.gmra.mxu1 %vm342_vm0, %v8006_v54 }
 0x752   :  { %v6743_v16 = vpop.f32.mrf.mxu1 }
 0x754   :  { %v6745_v10 = vpop.f32.mrf.mxu1 }
 0x756   :  { %v6747_v50 = vpop.f32.mrf.mxu1 }
 0x758   :  { %v6749_v6 = vpop.f32.mrf.mxu1 }
 0x75a   :  { %v5149_v1 = vpop.f32.mrf.mxu1 }
 0x75c   :  { %v1936_v49 = vpop.f32.mrf.mxu1 }
 0x75e   :  { %v5152_v36 = vpop.f32.mrf.mxu1 }
 0x75f   :  { %v1952_v24 = vadd.f32 %v5152_v36, %v5120_v15 }
 0x760   :  { %v1946_v3 = vpop.f32.mrf.mxu1 }
 0x761   :  { %v1947_v44 = vadd.f32 %v1946_v3, %v1801_v8  ;;  %v2010_v15 = vadd.f32 %v6754_v38, %v1952_v24  ;;  %v1937_v8 = vadd.f32 %v1936_v49, %v6741_v63  ;;  %v1927_v63 = vadd.f32 %v6749_v6, %v6737_v0  ;;  %v4102_v24 = vld [vmem:[%s7917_s8 + $0x438] sm:$0xff] }
 0x762   :  { %v5155_v7 = vpop.f32.mrf.mxu1  ;;  %v1917_v0 = vadd.f32 %v6745_v10, %v6733_v62 }
 0x763   :  { %v1962_v30 = vadd.f32 %v5155_v7, %v5123_v23  ;;  %v1942_v23 = vadd.f32 %v5149_v1, %v6739_v56  ;;  %v1932_v56 = vadd.f32 %v6747_v50, %v6735_v18  ;;  %v2007_v49 = vadd.f32 %v6754_v38, %v1937_v8  ;;  %v4099_v8 = vld [vmem:[%s7917_s8 + $0x420] sm:$0xff] }
 0x764   :  { %v1956_v20 = vpop.f32.mrf.mxu1  ;;  %v1922_v18 = vadd.f32 %v6743_v16, %v6731_v55  ;;  %v2005_v6 = vadd.f32 %v6754_v38, %v1927_v63  ;;  %v4142_v63 = vld [vmem:[%s7917_s8 + $0x578] sm:$0xff] }
 0x765   :  { %v1957_v42 = vadd.f32 %v1956_v20, %v1811_v17  ;;  %v2012_v40 = vadd.f32 %v6754_v38, %v1962_v30  ;;  %v2008_v1 = vadd.f32 %v6754_v38, %v1942_v23  ;;  %v2006_v50 = vadd.f32 %v6754_v38, %v1932_v56  ;;  %v4104_v30 = vld [vmem:[%s7917_s8 + $0x448] sm:$0xff]  ;;  %v4098_v56 = vld [vmem:[%s7917_s8 + $0x418] sm:$0xff] }
 0x766   :  { %v5158_v45 = vpop.f32.mrf.mxu1  ;;  %v2004_v55 = vadd.f32 %v6754_v38, %v1922_v18  ;;  %v2003_v20 = vadd.f32 %v6754_v38, %v1917_v0  ;;  %v4100_v23 = vld [vmem:[%s7917_s8 + $0x428] sm:$0xff]  ;;  %v4157_v18 = vld [vmem:[%s7917_s8 + $0x5f0] sm:$0xff] }
 0x767   :  { %v1972_v19 = vadd.f32 %v5158_v45, %v5126_v51  ;;  %v2011_v14 = vadd.f32 %v6754_v38, %v1957_v42  ;;  %v6788_v17 = vmax.f32 %v2012_v40, 0.0  ;;  %v2009_v51 = vadd.f32 %v6754_v38, %v1947_v44  ;;  %v4103_v42 = vld [vmem:[%s7917_s8 + $0x440] sm:$0xff]  ;;  %v4117_v40 = vld [vmem:[%s7917_s8 + $0x4b0] sm:$0xff]  ;;  %v4156_v0 = vld [vmem:[%s7917_s8 + $0x5e8] sm:$0xff] }
 0x768   :  { %v1966_v41 = vpop.f32.mrf.mxu1  ;;  %v6815_v7 = vmax.f32 %v2008_v1, 0.0  ;;  %v6827_v16 = vmax.f32 %v2006_v50, 0.0  ;;  %v6832_v45 = vmax.f32 %v2005_v6, 0.0  ;;  %v6836_v62 = vmax.f32 %v2004_v55, 0.0  ;;  %v4101_v44 = vld [vmem:[%s7917_s8 + $0x430] sm:$0xff]  ;;  %v4140_v6 = vld [vmem:[%s7917_s8 + $0x568] sm:$0xff] }
 0x769   :  { %v1967_v26 = vadd.f32 %v1966_v41, %v1821_v60  ;;  %v2014_v58 = vadd.f32 %v6754_v38, %v1972_v19  ;;  %v6794_v36 = vmax.f32 %v2011_v14, 0.0  ;;  %v6801_v60 = vmax.f32 %v2010_v15, 0.0  ;;  %v6856_v41 = vld [vmem:[%s7912_s3 + $0x10] sm:$0xff]  ;;  %v4122_v19 = vld [vmem:[%s7917_s8 + $0x4d8] sm:$0xff]  ;;  %v4116_v14 = vld [vmem:[%s7917_s8 + $0x4a8] sm:$0xff] }
 0x76a   :  { %v5161_v31 = vpop.f32.mrf.mxu1  ;;  %v6808_v3 = vmax.f32 %v2009_v51, 0.0  ;;  %v6840_v10 = vmax.f32 %v2003_v20, 0.0  ;;  %v4115_v15 = vld [vmem:[%s7917_s8 + $0x4a0] sm:$0xff]  ;;  %v4114_v51 = vld [vmem:[%s7917_s8 + $0x498] sm:$0xff]  ;;  %v4141_v50 = vld [vmem:[%s7917_s8 + $0x570] sm:$0xff] }
 0x76b   :  { %v1982_v29 = vadd.f32 %v5161_v31, %v5129_v4  ;;  %v2013_v61 = vadd.f32 %v6754_v38, %v1967_v26  ;;  %v6777_v43 = vmax.f32 %v2014_v58, 0.0  ;;  %v6822_v4 = vmax.f32 %v2007_v49, 0.0  ;;  %v6865_v31 = vld [vmem:[%s7912_s3 + $0x18] sm:$0xff]  ;;  %v4105_v26 = vld [vmem:[%s7917_s8 + $0x450] sm:$0xff]  ;;  %v4119_v58 = vld [vmem:[%s7917_s8 + $0x4c0] sm:$0xff] }
 0x76c   :  { %v1976_v28 = vpop.f32.mrf.mxu1  ;;  %v4155_v20 = vld [vmem:[%s7917_s8 + $0x5e0] sm:$0xff] }
 0x76d   :  { %v1977_v53 = vadd.f32 %v1976_v28, %v1831_v21  ;;  %v2016_v52 = vadd.f32 %v6754_v38, %v1982_v29  ;;  %v6782_v54 = vmax.f32 %v2013_v61, 0.0  ;;  %v6849_v21 = vld [vmem:[%s7912_s3 + $0x8] sm:$0xff]  ;;  %v6908_v28 = vld [vmem:[%s7912_s3 + $0x38] sm:$0xff] }
 0x76e   :  { %v5164_v47 = vpop.f32.mrf.mxu1  ;;  %v4110_v29 = vld [vmem:[%s7917_s8 + $0x478] sm:$0xff] }
 0x76f   :  { %v1992_v9 = vadd.f32 %v5164_v47, %v5132_v5  ;;  %v2015_v2 = vadd.f32 %v6754_v38, %v1977_v53  ;;  %v6767_v33 = vmax.f32 %v2016_v52, 0.0  ;;  %v6902_v5 = vld [vmem:[%s7912_s3 + $0x30] sm:$0xff]  ;;  %v4126_v47 = vld [vmem:[%s7917_s8 + $0x4f8] sm:$0xff]  ;;  %v4123_v53 = vld [vmem:[%s7917_s8 + $0x4e0] sm:$0xff] }
 0x770   :  { %v1986_v39 = vpop.f32.mrf.mxu1  ;;  %4652 = vmatprep.subr.mxu1 %v4126_v47  ;;  %v4106_v52 = vld [vmem:[%s7917_s8 + $0x458] sm:$0xff]  ;;  %v4139_v47 = vld [vmem:[%s7917_s8 + $0x560] sm:$0xff] }
 0x771   :  { %v2018_v35 = vadd.f32 %v6754_v38, %v1992_v9  ;;  %v1987_v48 = vadd.f32 %v1986_v39, %v1841_v37  ;;  %v6772_v59 = vmax.f32 %v2015_v2, 0.0  ;;  %v4125_v9 = vld [vmem:[%s7917_s8 + $0x4f0] sm:$0xff]  ;;  %4653 = vmatpush3.msra.mxu1 %v4110_v29  ;;  %v4108_v39 = vld [vmem:[%s7917_s8 + $0x468] sm:$0xff]  ;;  %v4118_v61 = vld [vmem:[%s7917_s8 + $0x4b8] sm:$0xff] }
 0x772   :  { %v4109_v37 = vld [vmem:[%s7917_s8 + $0x470] sm:$0xff]  ;;  %4654 = vmatprep.subr.mxu1 %v4125_v9  ;;  %v4120_v2 = vld [vmem:[%s7917_s8 + $0x4c8] sm:$0xff]  ;;  %v4154_v29 = vld [vmem:[%s7917_s8 + $0x5d8] sm:$0xff] }
 0x773   :  { %v6758_v46 = vmax.f32 %v2018_v35, 0.0  ;;  %v2017_v25 = vadd.f32 %v6754_v38, %v1987_v48  ;;  %v4124_v38 = vld [vmem:[%s7917_s8 + $0x4e8] sm:$0xff]  ;;  %4655 = vmatpush3.msra.mxu1 %v4109_v37  ;;  %v4107_v35 = vld [vmem:[%s7917_s8 + $0x460] sm:$0xff]  ;;  %v4158_v48 = vld [vmem:[%s7917_s8 + $0x5f8] sm:$0xff] }
 0x774   :  { %4656 = vmatprep.subr.mxu1 %v4124_v38  ;;  %v4138_v9 = vld [vmem:[%s7917_s8 + $0x558] sm:$0xff] }
 0x775   :  { %v6762_v32 = vmax.f32 %v2017_v25, 0.0  ;;  %5165 = vmatprep.subr.mxu0 %v6758_v46  ;;  %4657 = vmatpush3.msra.mxu1 %v4108_v39  ;;  %v4121_v25 = vld [vmem:[%s7917_s8 + $0x4d0] sm:$0xff] }
 0x776   :  { %5166 = vmatpush3.msra.mxu0 %v6758_v46  ;;  %4658 = vmatprep.subr.mxu1 %v4123_v53 }
 0x777   :  { %5167 = vmatprep.subr.mxu0 %v6762_v32  ;;  %4659 = vmatpush3.msra.mxu1 %v4107_v35 }
 0x778   :  { %5168 = vmatpush3.msra.mxu0 %v6762_v32  ;;  %4660 = vmatprep.subr.mxu1 %v4122_v19  ;;  %v4153_v19 = vld [vmem:[%s7917_s8 + $0x5d0] sm:$0xff] }
 0x779   :  { %5169 = vmatprep.subr.mxu0 %v6767_v33  ;;  %4661 = vmatpush3.msra.mxu1 %v4106_v52  ;;  %v4097_v52 = vld [vmem:[%s7917_s8 + $0x410] sm:$0xff] }
 0x77a   :  { %5170 = vmatpush3.msra.mxu0 %v6767_v33  ;;  %4662 = vmatprep.subr.mxu1 %v4121_v25  ;;  %v4137_v25 = vld [vmem:[%s7917_s8 + $0x550] sm:$0xff] }
 0x77b   :  { %5171 = vmatprep.subr.mxu0 %v6772_v59  ;;  %4663 = vmatpush3.msra.mxu1 %v4105_v26  ;;  %v4112_v26 = vld [vmem:[%s7917_s8 + $0x488] sm:$0xff] }
 0x77c   :  { %5172 = vmatpush3.msra.mxu0 %v6772_v59  ;;  %4664 = vmatprep.subr.mxu1 %v4120_v2  ;;  %v4152_v2 = vld [vmem:[%s7917_s8 + $0x5c8] sm:$0xff] }
 0x77d   :  { %5173 = vmatprep.subr.mxu0 %v6777_v43  ;;  %4665 = vmatpush3.msra.mxu1 %v4104_v30  ;;  %v4096_v30 = vld [vmem:[%s7917_s8 + $0x408] sm:$0xff] }
 0x77e   :  { %5174 = vmatpush3.msra.mxu0 %v6777_v43  ;;  %4666 = vmatprep.subr.mxu1 %v4119_v58  ;;  %v4136_v58 = vld [vmem:[%s7917_s8 + $0x548] sm:$0xff] }
 0x77f   :  { %5175 = vmatprep.subr.mxu0 %v6782_v54  ;;  %4667 = vmatpush3.msra.mxu1 %v4103_v42  ;;  %v4111_v42 = vld [vmem:[%s7917_s8 + $0x480] sm:$0xff] }
 0x780   :  { %5176 = vmatpush3.msra.mxu0 %v6782_v54  ;;  %4668 = vmatprep.subr.mxu1 %v4118_v61  ;;  %v4151_v61 = vld [vmem:[%s7917_s8 + $0x5c0] sm:$0xff] }
 0x781   :  { %5177 = vmatprep.subr.mxu0 %v6788_v17  ;;  %4669 = vmatpush3.msra.mxu1 %v4102_v24  ;;  %v4095_v24 = vld [vmem:[%s7917_s8 + $0x400] sm:$0xff] }
 0x782   :  { %5178 = vmatpush3.msra.mxu0 %v6788_v17  ;;  %4670 = vmatprep.subr.mxu1 %v4117_v40  ;;  %v4135_v40 = vld [vmem:[%s7917_s8 + $0x540] sm:$0xff] }
 0x783   :  { %5179 = vmatprep.subr.mxu0 %v6794_v36  ;;  %4671 = vmatpush3.msra.mxu1 %v4101_v44  ;;  %v4150_v44 = vld [vmem:[%s7917_s8 + $0x5b8] sm:$0xff] }
 0x784   :  { %5180 = vmatpush3.msra.mxu0 %v6794_v36  ;;  %4672 = vmatprep.subr.mxu1 %v4116_v14  ;;  %v4134_v14 = vld [vmem:[%s7917_s8 + $0x538] sm:$0xff] }
 0x785   :  { %5181 = vmatprep.subr.mxu0 %v6801_v60  ;;  %4673 = vmatpush3.msra.mxu1 %v4100_v23  ;;  %v4149_v23 = vld [vmem:[%s7917_s8 + $0x5b0] sm:$0xff] }
 0x786   :  { %5182 = vmatpush3.msra.mxu0 %v6801_v60  ;;  %4674 = vmatprep.subr.mxu1 %v4115_v15  ;;  %v4133_v15 = vld [vmem:[%s7917_s8 + $0x530] sm:$0xff] }
 0x787   :  { %5183 = vmatprep.subr.mxu0 %v6808_v3  ;;  %4675 = vmatpush3.msra.mxu1 %v4099_v8  ;;  %v4148_v8 = vld [vmem:[%s7917_s8 + $0x5a8] sm:$0xff] }
 0x788   :  { %5184 = vmatpush3.msra.mxu0 %v6808_v3  ;;  %4676 = vmatprep.subr.mxu1 %v4114_v51  ;;  %v4132_v51 = vld [vmem:[%s7917_s8 + $0x528] sm:$0xff] }
 0x789   :  { %5185 = vmatprep.subr.mxu0 %v6815_v7  ;;  %4677 = vmatpush3.msra.mxu1 %v4098_v56  ;;  %v4147_v56 = vld [vmem:[%s7917_s8 + $0x5a0] sm:$0xff] }
 0x78a   :  { %5186 = vmatpush3.msra.mxu0 %v6815_v7 }
 0x78b   :  { %5187 = vmatprep.subr.mxu0 %v6822_v4 }
 0x78c   :  { %5188 = vmatpush3.msra.mxu0 %v6822_v4 }
 0x78d   :  { %5189 = vmatprep.subr.mxu0 %v6827_v16 }
 0x78e   :  { %5190 = vmatpush3.msra.mxu0 %v6827_v16 }
 0x78f   :  { %5191 = vmatprep.subr.mxu0 %v6832_v45 }
 0x790   :  { %5192 = vmatpush3.msra.mxu0 %v6832_v45 }
 0x791   :  { %5193 = vmatprep.subr.mxu0 %v6836_v62 }
 0x792   :  { %5194 = vmatpush3.msra.mxu0 %v6836_v62 }
 0x793   :  { %5195 = vmatprep.subr.mxu0 %v6840_v10 }
 0x794   :  { %5196 = vmatpush3.msra.mxu0 %v6840_v10 }
 0x795   :  { %5198 = vmatmul.mubr.f32.vlgmr.msra.gmra.mxu0 %v6849_v21  ;;  %2188 = vmatprep.subr.mxu0 %v6389_v34  ;;  %v6872_v34 = vld [vmem:[%s7912_s3 + $0x20] sm:$0xff] }
 0x796   :  { %5200 = vmatprep.mubr.f32.mxu0 %v6856_v41  ;;  %2189 = vmatpush1.msra.mxu0 %v6396_v27  ;;  %v6878_v27 = vld [vmem:[%s7913_s4 + $0x10] sm:$0xff] }
 0x797   :  { %2190 = vmatprep.subr.mxu0 %v6402_v11  ;;  %v6884_v11 = vld [vmem:[%s7913_s4 + $0x8] sm:$0xff] }
 0x798   :  { %2191 = vmatpush1.msra.mxu0 %v6408_v22  ;;  %v6890_v22 = vld [vmem:[%s7913_s4] sm:$0xff] }
 0x799   :  { %5201 = vmatmul.mubr.f32.gmra.mxu0 %v6865_v31  ;;  %2192 = vmatprep.subr.mxu0 %v6415_v12  ;;  %v6896_v12 = vld [vmem:[%s7912_s3 + $0x28] sm:$0xff] }
 0x79a   :  { %5203 = vmatprep.mubr.f32.mxu0 %v6872_v34  ;;  %2193 = vmatpush1.msra.mxu0 %v6878_v27 }
 0x79b   :  { %2194 = vmatprep.subr.mxu0 %v6884_v11 }
 0x79c   :  { %2195 = vmatpush1.msra.mxu0 %v6890_v22 }
 0x79d   :  { %5204 = vmatmul.mubr.f32.gmra.mxu0 %v6896_v12  ;;  %4696 = vmatprep.subr.mxu0 %v4158_v48  ;;  %v4113_v48 = vld [vmem:[%s7917_s8 + $0x490] sm:$0xff] }
 0x79e   :  { %5206 = vmatprep.mubr.f32.mxu0 %v6902_v5  ;;  %4678 = vmatprep.subr.mxu1 %v4113_v48  ;;  %v4161_v48 = vld [vmem:[%s7918_s9 + $0x50] sm:$0xff] }
 0x79f   :  { %4679 = vmatpush3.msra.mxu1 %v4097_v52  ;;  %v7140_v52 = vld [vmem:[%s7914_s5 + $0x18] sm:$0xff] }
 0x7a0   :  { %4680 = vmatprep.subr.mxu1 %v4112_v26  ;;  %v4160_v26 = vld [vmem:[%s7918_s9 + $0x48] sm:$0xff] }
 0x7a1   :  { %5207 = vmatmul.mubr.f32.gmra.mxu0 %v6908_v28  ;;  %4681 = vmatpush3.msra.mxu1 %v4096_v30 }
 0x7a2   :  { %2228 = vmatprep.mubr.f32.mxu0 %v7986_v13  ;;  %4682 = vmatprep.subr.mxu1 %v4111_v42  ;;  %v4159_v42 = vld [vmem:[%s7918_s9 + $0x40] sm:$0xff] }
 0x7a3   :  { %4683 = vmatpush3.msra.mxu1 %v4095_v24  ;;  %v7158_v24 = vld [vmem:[%s7914_s5 + $0x28] sm:$0xff] }
 0x855   :  { %v5199_v1 = vpop.f32.mrf.mxu0 }
 0x857   :  { %v2101_v49 = vpop.f32.mrf.mxu0 }
 0x858   :  { %4087 = vmatmul.mubr.msk.f32.vlgmr.msra.gmra.mxu0 %vm342_vm0, %v2101_v49  ;;  %v4162_v49 = vld [vmem:[%s7918_s9 + $0x58] sm:$0xff] }
 0x859   :  { %2234 = vmatprep.mubr.f32.mxu0 %v7986_v13  ;;  %4697 = vmatpush3.msra.mxu0 %v4142_v63  ;;  %v5202_v55 = vpop.f32.mrf.mxu0  ;;  %v4146_v63 = vld [vmem:[%s7917_s8 + $0x598] sm:$0xff] }
 0x85a   :  { %4698 = vmatprep.subr.mxu0 %v4157_v18  ;;  %5209 = vmatprep.subr.mxu1 %v4162_v49  ;;  %v4130_v18 = vld [vmem:[%s7917_s8 + $0x518] sm:$0xff] }
 0x85b   :  { %4699 = vmatpush3.msra.mxu0 %v4141_v50  ;;  %v2111_v37 = vpop.f32.mrf.mxu0  ;;  %v4145_v50 = vld [vmem:[%s7917_s8 + $0x590] sm:$0xff] }
 0x85c   :  { %4088 = vmatmul.mubr.msk.f32.gmra.mxu0 %vm342_vm0, %v5199_v1  ;;  %4700 = vmatprep.subr.mxu0 %v4156_v0  ;;  %v4131_v1 = vld [vmem:[%s7917_s8 + $0x520] sm:$0xff]  ;;  %v4129_v0 = vld [vmem:[%s7917_s8 + $0x510] sm:$0xff] }
 0x85d   :  { %2240 = vmatprep.mubr.f32.mxu0 %v7986_v13  ;;  %4701 = vmatpush3.msra.mxu0 %v4140_v6  ;;  %v5205_v38 = vpop.f32.mrf.mxu0  ;;  %v4144_v6 = vld [vmem:[%s7917_s8 + $0x588] sm:$0xff] }
 0x85e   :  { %4702 = vmatprep.subr.mxu0 %v4155_v20  ;;  %v4143_v20 = vld [vmem:[%s7917_s8 + $0x580] sm:$0xff] }
 0x85f   :  { %4703 = vmatpush3.msra.mxu0 %v4139_v47  ;;  %v2121_v39 = vpop.f32.mrf.mxu0  ;;  %v4127_v47 = vld [vmem:[%s7917_s8 + $0x500] sm:$0xff] }
 0x860   :  { %4089 = vmatmul.mubr.msk.f32.gmra.mxu0 %vm342_vm0, %v2111_v37  ;;  %4704 = vmatprep.subr.mxu0 %v4154_v29  ;;  %v7125_v37 = vld [vmem:[%s7914_s5 + $0x8] sm:$0xff] }
 0x861   :  { %2246 = vmatprep.mubr.f32.mxu0 %v7986_v13  ;;  %4705 = vmatpush3.msra.mxu0 %v4138_v9  ;;  %v5208_v53 = vpop.f32.mrf.mxu0 }
 0x862   :  { %4706 = vmatprep.subr.mxu0 %v4153_v19 }
 0x863   :  { %v2131_v35 = vpop.f32.mrf.mxu0  ;;  %4707 = vmatpush3.msra.mxu0 %v4137_v25 }
 0x864   :  { %4090 = vmatmul.mubr.msk.f32.gmra.mxu0 %vm342_vm0, %v5202_v55  ;;  %4708 = vmatprep.subr.mxu0 %v4152_v2  ;;  %v4128_v55 = vld [vmem:[%s7917_s8 + $0x508] sm:$0xff]  ;;  %v7149_v2 = vld [vmem:[%s7914_s5 + $0x10] sm:$0xff] }
 0x865   :  { %2252 = vmatprep.mubr.f32.mxu0 %v7986_v13  ;;  %4709 = vmatpush3.msra.mxu0 %v4136_v58 }
 0x866   :  { %4710 = vmatprep.subr.mxu0 %v4151_v61 }
 0x867   :  { %4711 = vmatpush3.msra.mxu0 %v4135_v40 }
 0x868   :  { %4091 = vmatmul.mubr.msk.f32.gmra.mxu0 %vm342_vm0, %v2121_v39  ;;  %4712 = vmatprep.subr.mxu0 %v4150_v44  ;;  %v7131_v39 = vld [vmem:[%s7914_s5] sm:$0xff] }
 0x869   :  { %2258 = vmatprep.mubr.f32.mxu0 %v7986_v13  ;;  %4713 = vmatpush3.msra.mxu0 %v4134_v14  ;;  %v7164_v44 = vld [vmem:[%s7914_s5 + $0x20] sm:$0xff] }
 0x86a   :  { %4714 = vmatprep.subr.mxu0 %v4149_v23 }
 0x86b   :  { %4715 = vmatpush3.msra.mxu0 %v4133_v15 }
 0x86c   :  { %4092 = vmatmul.mubr.msk.f32.gmra.mxu0 %vm342_vm0, %v5205_v38  ;;  %4716 = vmatprep.subr.mxu0 %v4148_v8  ;;  %v7170_v8 = vld [vmem:[%s7914_s5 + $0x38] sm:$0xff] }
 0x86d   :  { %2264 = vmatprep.mubr.f32.mxu0 %v7986_v13  ;;  %4717 = vmatpush3.msra.mxu0 %v4132_v51 }
 0x86e   :  { %4718 = vmatprep.subr.mxu0 %v4147_v56  ;;  %v7176_v56 = vld [vmem:[%s7914_s5 + $0x30] sm:$0xff] }
 0x86f   :  { %4719 = vmatpush3.msra.mxu0 %v4131_v1 }
 0x870   :  { %4093 = vmatmul.mubr.msk.f32.gmra.mxu0 %vm342_vm0, %v2131_v35  ;;  %4720 = vmatprep.subr.mxu0 %v4146_v63 }
 0x871   :  { %2270 = vmatprep.mubr.f32.mxu0 %v7986_v13  ;;  %4721 = vmatpush3.msra.mxu0 %v4130_v18  ;;  %v7182_v18 = vld [vmem:[%s7915_s6 + $0x8] sm:$0xff] }
 0x872   :  { %4722 = vmatprep.subr.mxu0 %v4145_v50 }
 0x873   :  { %4723 = vmatpush3.msra.mxu0 %v4129_v0  ;;  %v7190_v0 = vld [vmem:[%s7915_s6] sm:$0xff] }
 0x874   :  { %4094 = vmatmul.mubr.msk.f32.gmra.mxu0 %vm342_vm0, %v5208_v53  ;;  %4724 = vmatprep.subr.mxu0 %v4144_v6 }
 0x875   :  { %4725 = vmatpush3.msra.mxu0 %v4128_v55 }
 0x876   :  { %4726 = vmatprep.subr.mxu0 %v4143_v20 }
 0x877   :  { %4727 = vmatpush3.msra.mxu0 %v4127_v47  ;;  %v7198_v47 = vld [vmem:[%s7915_s6 + $0x18] sm:$0xff] }
 0x918   :  { %v2230_v29 = vpop.f32.mrf.mxu0 }
 0x919   :  { %v2277_v53 = vmul.f32 %v7131_v39, %v2230_v29  ;;  %v7206_v29 = vld [vmem:[%s7915_s6 + $0x10] sm:$0xff] }
 0x91a   :  { %v2232_v9 = vpop.f32.mrf.mxu0  ;;  %8007 = vst [vmem:[#allocation6_spill] sm:$0xff] %v7206_v29 }
 0x91b   :  { %v2278_v38 = vmul.f32 %v7125_v37, %v2232_v9 }
 0x91c   :  { %v2236_v35 = vpop.f32.mrf.mxu0 }
 0x91d   :  { %2422 = vmatprep.mubr.f32.mxu1 %v2278_v38  ;;  %v2279_v30 = vmul.f32 %v7149_v2, %v2236_v35  ;;  %v7222_v35 = vld [vmem:[%s7915_s6 + $0x20] sm:$0xff] }
 0x91e   :  { %v2238_v19 = vpop.f32.mrf.mxu0  ;;  %2423 = vmatmul.mubr.f32.vlgmr.msra.gmra.mxu1 %v2277_v53  ;;  %v7214_v53 = vld [vmem:[%s7915_s6 + $0x28] sm:$0xff]  ;;  %8009 = vst [vmem:[#allocation8_spill] sm:$0xff] %v7222_v35 }
 0x91f   :  { %v2280_v25 = vmul.f32 %v7140_v52, %v2238_v19  ;;  %5210 = vmatpush3.msra.mxu1 %v4162_v49  ;;  %8008 = vst [vmem:[#allocation7_spill] sm:$0xff] %v7214_v53 }
 0x920   :  { %v2242_v58 = vpop.f32.mrf.mxu0  ;;  %5211 = vmatprep.subr.mxu1 %v4161_v48 }
 0x921   :  { %2427 = vmatprep.mubr.f32.mxu1 %v2280_v25  ;;  %5212 = vmatpush3.msra.mxu1 %v4161_v48  ;;  %v2281_v14 = vmul.f32 %v7164_v44, %v2242_v58  ;;  %v7230_v25 = vld [vmem:[%s7915_s6 + $0x38] sm:$0xff] }
 0x922   :  { %v2244_v61 = vpop.f32.mrf.mxu0  ;;  %2428 = vmatmul.mubr.f32.gmra.mxu1 %v2279_v30  ;;  %5213 = vmatprep.subr.mxu1 %v4160_v26  ;;  %8010 = vst [vmem:[#allocation9_spill] sm:$0xff] %v7230_v25 }
 0x923   :  { %v2282_v40 = vmul.f32 %v7158_v24, %v2244_v61  ;;  %5214 = vmatpush3.msra.mxu1 %v4160_v26  ;;  %v7238_v26 = vld [vmem:[%s7915_s6 + $0x30] sm:$0xff]  ;;  %s3926_s6 = sshll.u32 %s5500_s24, 4  ;;  %s3927_s6 = int_to_ptr.vmem [resolvable:$true] %s3926_s6 }
 0x924   :  { %v2248_v23 = vpop.f32.mrf.mxu0  ;;  %5215 = vmatprep.subr.mxu1 %v4159_v42  ;;  %8011 = vst [vmem:[#allocation10_spill] sm:$0xff] %v7238_v26  ;;  %s5475_s25 = scalar_lea.vmem %s3927_s6, 16  ;;  %s5479_s26 = scalar_lea.vmem %s3927_s6, 32 }
 0x925   :  { %2432 = vmatprep.mubr.f32.mxu1 %v2282_v40  ;;  %5216 = vmatpush3.msra.mxu1 %v4159_v42  ;;  %v2283_v1 = vmul.f32 %v7176_v56, %v2248_v23  ;;  %p5476_p0 = scmp.ne.s32.totalorder %s3927_s6, %s5475_s25  ;;  %p5480_p1 = scmp.lt.s32.totalorder %s3927_s6, %s3927_s6 }
 0x926   :  { %v2250_v15 = vpop.f32.mrf.mxu0  ;;  %2433 = vmatmul.mubr.f32.gmra.mxu1 %v2281_v14  ;;  %p5481_p2 = scmp.lt.s32.totalorder %s5479_s26, %s5475_s25 }
 0x927   :  { %v2284_v51 = vmul.f32 %v7170_v8, %v2250_v15 }
 0x928   :  { %v2254_v63 = vpop.f32.mrf.mxu0  ;;  %p5482_p3 = por %p5481_p2, %p5480_p1 }
 0x929   :  { %2437 = vmatprep.mubr.f32.mxu1 %v2284_v51  ;;  %v2285_v6 = vmul.f32 %v7190_v0, %v2254_v63 }
 0x92a   :  { %v2256_v49 = vpop.f32.mrf.mxu0  ;;  %2438 = vmatmul.mubr.f32.gmra.mxu1 %v2283_v1  ;;  %p5483_p4 = pnand %p5482_p3, %p5476_p0 }
 0x92b   :  { %v2286_v50 = vmul.f32 %v7182_v18, %v2256_v49  ;;  %5217 = vmatprep.mubr.msk.f32.mxu1 %vm342_vm0, %v6840_v10 }
 0x92c   :  { %v2260_v55 = vpop.f32.mrf.mxu0 }
 0x92d   :  { %2507 = vmatprep.mubr.f32.mxu0 %v2286_v50  ;;  %v2287_v9 = vmul.f32 %v7206_v29, %v2260_v55 }
 0x92e   :  { %v2262_v20 = vpop.f32.mrf.mxu0  ;;  %2508 = vmatmul.mubr.f32.vlgmr.msra.gmra.mxu0 %v2285_v6  ;;  %5218 = vmatmul.mubr.msk.f32.vlgmr.msra.gmra.mxu1 %vm342_vm0, %v6836_v62 }
 0x92f   :  { %v2288_v10 = vmul.f32 %v7198_v47, %v2262_v20  ;;  %5220 = vmatprep.mubr.msk.f32.mxu1 %vm342_vm0, %v6832_v45 }
 0x930   :  { %v2266_v38 = vpop.f32.mrf.mxu0 }
 0x931   :  { %2512 = vmatprep.mubr.f32.mxu0 %v2288_v10  ;;  %v2289_v48 = vmul.f32 %v7222_v35, %v2266_v38  ;;  %v7270_v38 = vld [vmem:[%s7916_s7 + $0x8] sm:$0xff] }
 0x932   :  { %v2268_v62 = vpop.f32.mrf.mxu0  ;;  %2513 = vmatmul.mubr.f32.gmra.mxu0 %v2287_v9  ;;  %5221 = vmatmul.mubr.msk.f32.gmra.mxu1 %vm342_vm0, %v6827_v16  ;;  %8013 = vst [vmem:[#allocation12_spill] sm:$0xff] %v7270_v38 }
 0x933   :  { %v2290_v45 = vmul.f32 %v7214_v53, %v2268_v62  ;;  %5223 = vmatprep.mubr.msk.f32.mxu1 %vm342_vm0, %v6822_v4  ;;  %v7277_v62 = vld [vmem:[%s7916_s7 + $0x10] sm:$0xff] }
 0x934   :  { %v2272_v19 = vpop.f32.mrf.mxu0  ;;  %8014 = vst [vmem:[#allocation13_spill] sm:$0xff] %v7277_v62 }
 0x935   :  { %2517 = vmatprep.mubr.f32.mxu0 %v2290_v45  ;;  %v2291_v30 = vmul.f32 %v7238_v26, %v2272_v19  ;;  %v7284_v45 = vld [vmem:[%s7916_s7 + $0x18] sm:$0xff]  ;;  %v7298_v19 = vld [vmem:[%s7916_s7 + $0x28] sm:$0xff] }
 0x936   :  { %v2274_v16 = vpop.f32.mrf.mxu0  ;;  %2518 = vmatmul.mubr.f32.gmra.mxu0 %v2289_v48  ;;  %5224 = vmatmul.mubr.msk.f32.gmra.mxu1 %vm342_vm0, %v6815_v7  ;;  %v7248_v7 = vld [vmem:[%s7916_s7] sm:$0xff]  ;;  %8015 = vst [vmem:[#allocation14_spill] sm:$0xff] %v7284_v45  ;;  %8017 = vst [vmem:[#allocation16_spill] sm:$0xff] %v7298_v19 }
 0x937   :  { %v2292_v4 = vmul.f32 %v7230_v25, %v2274_v16  ;;  %5226 = vmatprep.mubr.msk.f32.mxu1 %vm342_vm0, %v6808_v3  ;;  %8012 = vst [vmem:[#allocation11_spill] sm:$0xff] %v7248_v7  ;;  %v7291_v48 = vld [vmem:[%s7916_s7 + $0x20] sm:$0xff]  ;;  %v7305_v16 = vld [vmem:[%s7916_s7 + $0x30] sm:$0xff] }
 0x938   :  { %8016 = vst [vmem:[#allocation15_spill] sm:$0xff] %v7291_v48  ;;  %8018 = vst [vmem:[#allocation17_spill] sm:$0xff] %v7305_v16 }
 0x939   :  { %2522 = vmatprep.mubr.f32.mxu0 %v2292_v4  ;;  %v7312_v4 = vld [vmem:[%s7916_s7 + $0x38] sm:$0xff] }
 0x93a   :  { %2523 = vmatmul.mubr.f32.gmra.mxu0 %v2291_v30  ;;  %5227 = vmatmul.mubr.msk.f32.gmra.mxu1 %vm342_vm0, %v6801_v60  ;;  %8019 = vst [vmem:[#allocation18_spill] sm:$0xff] %v7312_v4  ;;  %v7319_v30 = vld [vmem:[%s7916_s7 + $0x40] sm:$0xff] }
 0x93b   :  { %5229 = vmatprep.mubr.msk.f32.mxu1 %vm342_vm0, %v6794_v36  ;;  %5249 = vmatprep.mubr.msk.f32.mxu0 %vm342_vm0, %v7248_v7  ;;  %8020 = vst [vmem:[#allocation19_spill] sm:$0xff] %v7319_v30 }
 0x93e   :  { %5230 = vmatmul.mubr.msk.f32.gmra.mxu1 %vm342_vm0, %v6788_v17 }
 0x93f   :  { %5232 = vmatprep.mubr.msk.f32.mxu1 %vm342_vm0, %v6782_v54 }
 0x942   :  { %5233 = vmatmul.mubr.msk.f32.gmra.mxu1 %vm342_vm0, %v6777_v43 }
 0x943   :  { %5235 = vmatprep.mubr.msk.f32.mxu1 %vm342_vm0, %v6772_v59 }
 0x946   :  { %5236 = vmatmul.mubr.msk.f32.gmra.mxu1 %vm342_vm0, %v6767_v33 }
 0x947   :  { %5238 = vmatprep.mubr.msk.f32.mxu1 %vm342_vm0, %v6762_v32 }
 0x94a   :  { %5239 = vmatmul.mubr.msk.f32.gmra.mxu1 %vm342_vm0, %v6758_v46 }
 0x94b   :  { %5305 = vmatprep.mubr.f32.mxu1 %v6698_v57 }
 0x9de   :  { %v4684_v17 = vpop.f32.mrf.mxu1 }
 0x9e0   :  { %v4685_v36 = vpop.f32.mrf.mxu1 }
 0x9e1   :  { %v4686_v20 = vadd.f32 %v4685_v36, %v4684_v17  ;;  %v7326_v17 = vld [vmem:[%s7916_s7 + $0x48] sm:$0xff]  ;;  %v7333_v36 = vld [vmem:[%s7916_s7 + $0x50] sm:$0xff] }
 0x9e2   :  { %v4687_v54 = vpop.f32.mrf.mxu1  ;;  %8021 = vst [vmem:[#allocation20_spill] sm:$0xff] %v7326_v17  ;;  %8022 = vst [vmem:[#allocation21_spill] sm:$0xff] %v7333_v36 }
 0x9e4   :  { %v4688_v60 = vpop.f32.mrf.mxu1 }
 0x9e5   :  { %v4689_v50 = vadd.f32 %v4688_v60, %v4687_v54  ;;  %v7340_v54 = vld [vmem:[%s7916_s7 + $0x58] sm:$0xff]  ;;  %v7347_v60 = vld [vmem:[%s7916_s7 + $0x60] sm:$0xff] }
 0x9e6   :  { %v4690_v3 = vpop.f32.mrf.mxu1  ;;  %8023 = vst [vmem:[#allocation22_spill] sm:$0xff] %v7340_v54  ;;  %8024 = vst [vmem:[#allocation23_spill] sm:$0xff] %v7347_v60 }
 0x9e8   :  { %v4691_v42 = vpop.f32.mrf.mxu1 }
 0x9e9   :  { %v4692_v57 = vadd.f32 %v4691_v42, %v4690_v3  ;;  %v7354_v3 = vld [vmem:[%s7916_s7 + $0x68] sm:$0xff] }
 0x9ea   :  { %v4693_v40 = vpop.f32.mrf.mxu1  ;;  %8025 = vst [vmem:[#allocation24_spill] sm:$0xff] %v7354_v3 }
 0x9ec   :  { %v4694_v23 = vpop.f32.mrf.mxu1 }
 0x9ed   :  { %v4695_v51 = vadd.f32 %v4694_v23, %v4693_v40 }
 0x9ee   :  { %v4728_v43 = vpop.f32.mrf.mxu0  ;;  %v7372_v42 = vpop.f32.mrf.mxu1 }
 0x9f0   :  { %v4729_v58 = vpop.f32.mrf.mxu0 }
 0x9f1   :  { %v4730_v6 = vadd.f32 %v4729_v58, %v4728_v43  ;;  %v7361_v43 = vld [vmem:[%s7916_s7 + $0x70] sm:$0xff]  ;;  %v7368_v58 = vld [vmem:[%s7916_s7 + $0x78] sm:$0xff] }
 0x9f2   :  { %v4731_v59 = vpop.f32.mrf.mxu0  ;;  %8026 = vst [vmem:[#allocation25_spill] sm:$0xff] %v7361_v43  ;;  %8027 = vst [vmem:[#allocation26_spill] sm:$0xff] %v7368_v58 }
 0x9f3   :  { %v2510_v9 = vadd.f32 %v4730_v6, %v4686_v20 }
 0x9f4   :  { %v4732_v61 = vpop.f32.mrf.mxu0 }
 0x9f5   :  { %v4733_v63 = vadd.f32 %v4732_v61, %v4731_v59  ;;  %v7374_v59 = vpop.f32.mrf.mxu1 }
 0x9f6   :  { %v4734_v33 = vpop.f32.mrf.mxu0 }
 0x9f7   :  { %v2515_v10 = vadd.f32 %v4733_v63, %v4689_v50  ;;  %v7376_v61 = vpop.f32.mrf.mxu1 }
 0x9f8   :  { %v4735_v14 = vpop.f32.mrf.mxu0 }
 0x9f9   :  { %v4736_v46 = vadd.f32 %v4735_v14, %v4734_v33  ;;  %v7378_v40 = vpop.f32.mrf.mxu1 }
 0x9fa   :  { %v4737_v32 = vpop.f32.mrf.mxu0 }
 0x9fb   :  { %v2520_v55 = vadd.f32 %v4736_v46, %v4692_v57  ;;  %v7380_v33 = vpop.f32.mrf.mxu1 }
 0x9fc   :  { %v4738_v15 = vpop.f32.mrf.mxu0 }
 0x9fd   :  { %v4739_v1 = vadd.f32 %v4738_v15, %v4737_v32  ;;  %v7382_v14 = vpop.f32.mrf.mxu1 }
 0x9ff   :  { %v2525_v49 = vadd.f32 %v4739_v1, %v4695_v51  ;;  %v5228_v23 = vpop.f32.mrf.mxu1 }
 0xa01   :  { %5241 = vmatprep.subr.mxu0 %v2525_v49  ;;  %v2677_v32 = vpop.f32.mrf.mxu1 }
 0xa02   :  { %5242 = vmatpush3.msra.mxu0 %v2525_v49 }
 0xa03   :  { %5243 = vmatprep.subr.mxu0 %v2520_v55  ;;  %v5231_v51 = vpop.f32.mrf.mxu1 }
 0xa04   :  { %5244 = vmatpush3.msra.mxu0 %v2520_v55 }
 0xa05   :  { %5245 = vmatprep.subr.mxu0 %v2515_v10  ;;  %v2687_v57 = vpop.f32.mrf.mxu1 }
 0xa06   :  { %5246 = vmatpush3.msra.mxu0 %v2515_v10 }
 0xa07   :  { %5247 = vmatprep.subr.mxu0 %v2510_v9  ;;  %v5234_v50 = vpop.f32.mrf.mxu1 }
 0xa08   :  { %5248 = vmatpush3.msra.mxu0 %v2510_v9 }
 0xa09   :  { %5250 = vmatmul.mubr.msk.f32.vlgmr.msra.gmra.mxu0 %vm342_vm0, %v7270_v38  ;;  %v2697_v20 = vpop.f32.mrf.mxu1 }
 0xa0a   :  { %5252 = vmatprep.mubr.msk.f32.mxu0 %vm342_vm0, %v7277_v62 }
 0xa0d   :  { %5253 = vmatmul.mubr.msk.f32.gmra.mxu0 %vm342_vm0, %v7284_v45  ;;  %v7395_v45 = vld [vmem:[%s7919_s10 + $0x2] ss:$0 sm:$0xff] }
 0xa0e   :  { %5255 = vmatprep.mubr.msk.f32.mxu0 %vm342_vm0, %v7291_v48 }
 0xa11   :  { %5256 = vmatmul.mubr.msk.f32.gmra.mxu0 %vm342_vm0, %v7298_v19 }
 0xa12   :  { %5258 = vmatprep.mubr.msk.f32.mxu0 %vm342_vm0, %v7305_v16 }
 0xa15   :  { %5259 = vmatmul.mubr.msk.f32.gmra.mxu0 %vm342_vm0, %v7312_v4 }
 0xa16   :  { %5261 = vmatprep.mubr.msk.f32.mxu0 %vm342_vm0, %v7319_v30 }
 0xa19   :  { %5262 = vmatmul.mubr.msk.f32.gmra.mxu0 %vm342_vm0, %v7326_v17 }
 0xa1a   :  { %5264 = vmatprep.mubr.msk.f32.mxu0 %vm342_vm0, %v7333_v36 }
 0xa1d   :  { %5265 = vmatmul.mubr.msk.f32.gmra.mxu0 %vm342_vm0, %v7340_v54 }
 0xa1e   :  { %5267 = vmatprep.mubr.msk.f32.mxu0 %vm342_vm0, %v7347_v60 }
 0xa21   :  { %5268 = vmatmul.mubr.msk.f32.gmra.mxu0 %vm342_vm0, %v7354_v3 }
 0xa22   :  { %5270 = vmatprep.mubr.msk.f32.mxu0 %vm342_vm0, %v7361_v43 }
 0xa25   :  { %5271 = vmatmul.mubr.msk.f32.gmra.mxu0 %vm342_vm0, %v7368_v58  ;;  %v5237_v58 = vpop.f32.mrf.mxu1 }
 0xa27   :  { %v2707_v60 = vpop.f32.mrf.mxu1 }
 0xa29   :  { %v5240_v17 = vpop.f32.mrf.mxu1 }
 0xa2b   :  { %v2717_v48 = vpop.f32.mrf.mxu1 }
 0xac9   :  { %v7384_v15 = vpop.f32.mrf.mxu0 }
 0xacb   :  { %v7386_v46 = vpop.f32.mrf.mxu0 }
 0xacd   :  { %v7388_v1 = vpop.f32.mrf.mxu0 }
 0xacf   :  { %v7390_v63 = vpop.f32.mrf.mxu0 }
 0xad1   :  { %v5257_v49 = vpop.f32.mrf.mxu0 }
 0xad3   :  { %v2812_v6 = vpop.f32.mrf.mxu0 }
 0xad5   :  { %v5260_v55 = vpop.f32.mrf.mxu0 }
 0xad7   :  { %v2822_v10 = vpop.f32.mrf.mxu0 }
 0xad9   :  { %v5263_v9 = vpop.f32.mrf.mxu0 }
 0xadb   :  { %v2832_v43 = vpop.f32.mrf.mxu0 }
 0xadd   :  { %v5266_v3 = vpop.f32.mrf.mxu0 }
 0xade   :  { %v2848_v25 = vadd.f32 %v5266_v3, %v5234_v50 }
 0xadf   :  { %v2842_v54 = vpop.f32.mrf.mxu0 }
 0xae1   :  { %v5269_v36 = vpop.f32.mrf.mxu0 }
 0xae2   :  { %v2858_v16 = vadd.f32 %v5269_v36, %v5237_v58  ;;  %v2843_v36 = vadd.f32 %v2842_v54, %v2697_v20  ;;  %v2813_v58 = vadd.f32 %v2812_v6, %v7382_v14  ;;  %v2803_v14 = vadd.f32 %v7390_v63, %v7378_v40 }
 0xae3   :  { %v2852_v30 = vpop.f32.mrf.mxu0  ;;  %v2793_v40 = vadd.f32 %v7386_v46, %v7374_v59 }
 0xae4   :  { %v2853_v38 = vadd.f32 %v2852_v30, %v2707_v60  ;;  %v2892_v35 = vadd.f32 %v7395_v45, %v2858_v16  ;;  %v2838_v30 = vadd.f32 %v5263_v9, %v5231_v51  ;;  %v2818_v60 = vadd.f32 %v5257_v49, %v7380_v33  ;;  %v5471_v9 = vld [vmem:[%s7913_s4 + $0x30] sm:$0xff] }
 0xae5   :  { %v5272_v4 = vpop.f32.mrf.mxu0  ;;  %v2808_v33 = vadd.f32 %v7388_v1, %v7376_v61  ;;  %v2883_v49 = vadd.f32 %v7395_v45, %v2813_v58  ;;  %v2798_v61 = vadd.f32 %v7384_v15, %v7372_v42  ;;  %v2881_v63 = vadd.f32 %v7395_v45, %v2803_v14  ;;  %v4227_v58 = vld [vmem:[%s7917_s8 + $0x6b0] sm:$0xff]  ;;  %v4225_v14 = vld [vmem:[%s7917_s8 + $0x6a0] sm:$0xff] }
 0xae6   :  { %v2868_v19 = vadd.f32 %v5272_v4, %v5240_v17  ;;  %v2891_v4 = vadd.f32 %v7395_v45, %v2853_v38  ;;  %v2888_v38 = vadd.f32 %v7395_v45, %v2838_v30  ;;  %v2884_v51 = vadd.f32 %v7395_v45, %v2818_v60  ;;  %v4232_v30 = vld [vmem:[%s7917_s8 + $0x6d8] sm:$0xff] }
 0xae7   :  { %v2862_v62 = vpop.f32.mrf.mxu0  ;;  %v2882_v1 = vadd.f32 %v7395_v45, %v2808_v33  ;;  %v2880_v42 = vadd.f32 %v7395_v45, %v2798_v61  ;;  %v2879_v20 = vadd.f32 %v7395_v45, %v2793_v40  ;;  %v4228_v60 = vld [vmem:[%s7917_s8 + $0x6b8] sm:$0xff]  ;;  %v4226_v33 = vld [vmem:[%s7917_s8 + $0x6a8] sm:$0xff] }
 0xae8   :  { %v2894_v7 = vadd.f32 %v7395_v45, %v2868_v19  ;;  %v2863_v26 = vadd.f32 %v2862_v62, %v2717_v48  ;;  %v2890_v19 = vadd.f32 %v7395_v45, %v2848_v25  ;;  %v7408_v62 = vmax.f32 %v2892_v35, 0.0  ;;  %v4224_v61 = vld [vmem:[%s7917_s8 + $0x698] sm:$0xff] }
 0xae9   :  { %v7413_v48 = vmax.f32 %v2891_v4, 0.0  ;;  %v2823_v35 = vadd.f32 %v2822_v10, %v2677_v32  ;;  %v7456_v6 = vmax.f32 %v2884_v51, 0.0  ;;  %v7468_v15 = vmax.f32 %v2882_v1, 0.0  ;;  %v4268_v4 = vld [vmem:[%s7917_s8 + $0x7f8] sm:$0xff]  ;;  %v4210_v51 = vld [vmem:[%s7917_s8 + $0x628] sm:$0xff] }
 0xaea   :  { %v7399_v53 = vmax.f32 %v2894_v7, 0.0  ;;  %v2893_v29 = vadd.f32 %v7395_v45, %v2863_v26  ;;  %v2833_v7 = vadd.f32 %v2832_v43, %v2687_v57  ;;  %v2889_v26 = vadd.f32 %v7395_v45, %v2843_v36  ;;  %v5472_v36 = vld [vmem:[%s7913_s4 + $0x28] sm:$0xff]  ;;  %v4208_v1 = vld [vmem:[%s7917_s8 + $0x618] sm:$0xff] }
 0xaeb   :  { %v7418_v16 = vmax.f32 %v2890_v19, 0.0  ;;  %v7429_v43 = vmax.f32 %v2888_v38, 0.0  ;;  %v7473_v10 = vmax.f32 %v2881_v63, 0.0  ;;  %v7477_v59 = vmax.f32 %v2880_v42, 0.0  ;;  %v4216_v19 = vld [vmem:[%s7917_s8 + $0x658] sm:$0xff]  ;;  %v4214_v38 = vld [vmem:[%s7917_s8 + $0x648] sm:$0xff] }
 0xaec   :  { %v7403_v17 = vmax.f32 %v2893_v29, 0.0  ;;  %5273 = vmatprep.subr.mxu1 %v7399_v53  ;;  %v2828_v29 = vadd.f32 %v5260_v55, %v5228_v23  ;;  %v2887_v25 = vadd.f32 %v7395_v45, %v2833_v7  ;;  %v7423_v54 = vmax.f32 %v2889_v26, 0.0  ;;  %v4231_v7 = vld [vmem:[%s7917_s8 + $0x6d0] sm:$0xff]  ;;  %v4252_v63 = vld [vmem:[%s7917_s8 + $0x778] sm:$0xff] }
 0xaed   :  { %5274 = vmatpush3.msra.mxu1 %v7399_v53  ;;  %v2885_v23 = vadd.f32 %v7395_v45, %v2823_v35  ;;  %v7463_v55 = vmax.f32 %v2883_v49, 0.0  ;;  %v7481_v46 = vmax.f32 %v2879_v20, 0.0  ;;  %v4215_v26 = vld [vmem:[%s7917_s8 + $0x650] sm:$0xff]  ;;  %v4229_v35 = vld [vmem:[%s7917_s8 + $0x6c0] sm:$0xff] }
 0xaee   :  { %5275 = vmatprep.subr.mxu1 %v7403_v17  ;;  %v2886_v3 = vadd.f32 %v7395_v45, %v2828_v29  ;;  %v7435_v32 = vmax.f32 %v2887_v25, 0.0  ;;  %v5470_v45 = vld [vmem:[%s7913_s4 + $0x38] sm:$0xff]  ;;  %v4230_v29 = vld [vmem:[%s7917_s8 + $0x6c8] sm:$0xff]  ;;  %v4213_v25 = vld [vmem:[%s7917_s8 + $0x640] sm:$0xff] }
 0xaef   :  { %5276 = vmatpush3.msra.mxu1 %v7403_v17  ;;  %v7449_v50 = vmax.f32 %v2885_v23, 0.0  ;;  %v4211_v23 = vld [vmem:[%s7917_s8 + $0x630] sm:$0xff]  ;;  %v4209_v49 = vld [vmem:[%s7917_s8 + $0x620] sm:$0xff] }
 0xaf0   :  { %5277 = vmatprep.subr.mxu1 %v7408_v62  ;;  %v7442_v57 = vmax.f32 %v2886_v3, 0.0  ;;  %v4212_v3 = vld [vmem:[%s7917_s8 + $0x638] sm:$0xff]  ;;  %v4267_v20 = vld [vmem:[%s7917_s8 + $0x7f0] sm:$0xff] }
 0xaf1   :  { %5278 = vmatpush3.msra.mxu1 %v7408_v62 }
 0xaf2   :  { %5279 = vmatprep.subr.mxu1 %v7413_v48 }
 0xaf3   :  { %5280 = vmatpush3.msra.mxu1 %v7413_v48 }
 0xaf4   :  { %5281 = vmatprep.subr.mxu1 %v7418_v16 }
 0xaf5   :  { %5282 = vmatpush3.msra.mxu1 %v7418_v16 }
 0xaf6   :  { %5283 = vmatprep.subr.mxu1 %v7423_v54 }
 0xaf7   :  { %5284 = vmatpush3.msra.mxu1 %v7423_v54 }
 0xaf8   :  { %5285 = vmatprep.subr.mxu1 %v7429_v43 }
 0xaf9   :  { %5286 = vmatpush3.msra.mxu1 %v7429_v43 }
 0xafa   :  { %5287 = vmatprep.subr.mxu1 %v7435_v32 }
 0xafb   :  { %5288 = vmatpush3.msra.mxu1 %v7435_v32 }
 0xafc   :  { %5289 = vmatprep.subr.mxu1 %v7442_v57 }
 0xafd   :  { %5290 = vmatpush3.msra.mxu1 %v7442_v57 }
 0xafe   :  { %5291 = vmatprep.subr.mxu1 %v7449_v50 }
 0xaff   :  { %5292 = vmatpush3.msra.mxu1 %v7449_v50 }
 0xb00   :  { %5293 = vmatprep.subr.mxu1 %v7456_v6 }
 0xb01   :  { %5294 = vmatpush3.msra.mxu1 %v7456_v6 }
 0xb02   :  { %5295 = vmatprep.subr.mxu1 %v7463_v55 }
 0xb03   :  { %5296 = vmatpush3.msra.mxu1 %v7463_v55 }
 0xb04   :  { %5297 = vmatprep.subr.mxu1 %v7468_v15 }
 0xb05   :  { %5298 = vmatpush3.msra.mxu1 %v7468_v15 }
 0xb06   :  { %5299 = vmatprep.subr.mxu1 %v7473_v10 }
 0xb07   :  { %5300 = vmatpush3.msra.mxu1 %v7473_v10 }
 0xb08   :  { %5301 = vmatprep.subr.mxu1 %v7477_v59 }
 0xb09   :  { %5302 = vmatpush3.msra.mxu1 %v7477_v59 }
 0xb0a   :  { %5303 = vmatprep.subr.mxu1 %v7481_v46 }
 0xb0b   :  { %5304 = vmatpush3.msra.mxu1 %v7481_v46 }
 0xb0c   :  { %5306 = vmatmul.mubr.f32.vlgmr.msra.gmra.mxu1 %v6849_v21  ;;  %3064 = vmatprep.subr.mxu1 %v5470_v45  ;;  %v5473_v21 = vld [vmem:[%s7913_s4 + $0x20] sm:$0xff]  ;;  %v4251_v45 = vld [vmem:[%s7917_s8 + $0x770] sm:$0xff] }
 0xb0d   :  { %5308 = vmatprep.mubr.f32.mxu1 %v6856_v41  ;;  %3065 = vmatpush1.msra.mxu1 %v5471_v9  ;;  %v5474_v41 = vld [vmem:[%s7913_s4 + $0x18] sm:$0xff]  ;;  %v4266_v9 = vld [vmem:[%s7917_s8 + $0x7e8] sm:$0xff] }
 0xb0e   :  { %3066 = vmatprep.subr.mxu1 %v5472_v36  ;;  %v4250_v36 = vld [vmem:[%s7917_s8 + $0x768] sm:$0xff] }
 0xb0f   :  { %3067 = vmatpush1.msra.mxu1 %v5473_v21 }
 0xb10   :  { %5309 = vmatmul.mubr.f32.gmra.mxu1 %v6865_v31  ;;  %3068 = vmatprep.subr.mxu1 %v5474_v41  ;;  %v4236_v31 = vld [vmem:[%s7917_s8 + $0x6f8] sm:$0xff]  ;;  %v4265_v41 = vld [vmem:[%s7917_s8 + $0x7e0] sm:$0xff] }
 0xb11   :  { %5311 = vmatprep.mubr.f32.mxu1 %v6872_v34  ;;  %3069 = vmatpush1.msra.mxu1 %v6878_v27  ;;  %v4220_v34 = vld [vmem:[%s7917_s8 + $0x678] sm:$0xff]  ;;  %v4235_v27 = vld [vmem:[%s7917_s8 + $0x6f0] sm:$0xff] }
 0xb12   :  { %3070 = vmatprep.subr.mxu1 %v6884_v11  ;;  %4804 = vmatprep.subr.mxu0 %v4236_v31  ;;  %v4219_v11 = vld [vmem:[%s7917_s8 + $0x670] sm:$0xff]  ;;  %v4249_v31 = vld [vmem:[%s7917_s8 + $0x760] sm:$0xff] }
 0xb13   :  { %3071 = vmatpush1.msra.mxu1 %v6890_v22  ;;  %4805 = vmatpush3.msra.mxu0 %v4220_v34  ;;  %v4234_v22 = vld [vmem:[%s7917_s8 + $0x6e8] sm:$0xff]  ;;  %v4264_v34 = vld [vmem:[%s7917_s8 + $0x7d8] sm:$0xff] }
 0xb14   :  { %5312 = vmatmul.mubr.f32.gmra.mxu1 %v6896_v12  ;;  %4806 = vmatprep.subr.mxu0 %v4235_v27  ;;  %v4218_v12 = vld [vmem:[%s7917_s8 + $0x668] sm:$0xff]  ;;  %v4248_v27 = vld [vmem:[%s7917_s8 + $0x758] sm:$0xff] }
 0xb15   :  { %5314 = vmatprep.mubr.f32.mxu1 %v6902_v5  ;;  %4807 = vmatpush3.msra.mxu0 %v4219_v11  ;;  %v4233_v5 = vld [vmem:[%s7917_s8 + $0x6e0] sm:$0xff] }
 0xb16   :  { %4808 = vmatprep.subr.mxu0 %v4234_v22  ;;  %4848 = vmatprep.subr.mxu1 %v4268_v4  ;;  %v4223_v4 = vld [vmem:[%s7917_s8 + $0x690] sm:$0xff] }
 0xb17   :  { %4809 = vmatpush3.msra.mxu0 %v4218_v12 }
 0xb18   :  { %5315 = vmatmul.mubr.f32.gmra.mxu1 %v6908_v28  ;;  %v4217_v28 = vld [vmem:[%s7917_s8 + $0x660] sm:$0xff]  ;;  %4810 = vmatprep.subr.mxu0 %v4233_v5 }
 0xb19   :  { %3104 = vmatprep.mubr.f32.mxu1 %v7986_v13  ;;  %4811 = vmatpush3.msra.mxu0 %v4217_v28 }
 0xb1a   :  { %4812 = vmatprep.subr.mxu0 %v4232_v30  ;;  %v4263_v30 = vld [vmem:[%s7917_s8 + $0x7d0] sm:$0xff] }
 0xb1b   :  { %4813 = vmatpush3.msra.mxu0 %v4216_v19  ;;  %v4207_v19 = vld [vmem:[%s7917_s8 + $0x610] sm:$0xff] }
 0xb1c   :  { %4814 = vmatprep.subr.mxu0 %v4231_v7  ;;  %v4247_v7 = vld [vmem:[%s7917_s8 + $0x750] sm:$0xff] }
 0xb1d   :  { %4815 = vmatpush3.msra.mxu0 %v4215_v26  ;;  %v4222_v26 = vld [vmem:[%s7917_s8 + $0x688] sm:$0xff] }
 0xb1e   :  { %4816 = vmatprep.subr.mxu0 %v4230_v29  ;;  %v4262_v29 = vld [vmem:[%s7917_s8 + $0x7c8] sm:$0xff] }
 0xb1f   :  { %4817 = vmatpush3.msra.mxu0 %v4214_v38  ;;  %v4206_v38 = vld [vmem:[%s7917_s8 + $0x608] sm:$0xff] }
 0xb20   :  { %4818 = vmatprep.subr.mxu0 %v4229_v35  ;;  %v4246_v35 = vld [vmem:[%s7917_s8 + $0x748] sm:$0xff] }
 0xb21   :  { %4819 = vmatpush3.msra.mxu0 %v4213_v25  ;;  %v4221_v25 = vld [vmem:[%s7917_s8 + $0x680] sm:$0xff] }
 0xb22   :  { %4820 = vmatprep.subr.mxu0 %v4228_v60  ;;  %v4261_v60 = vld [vmem:[%s7917_s8 + $0x7c0] sm:$0xff] }
 0xb23   :  { %4821 = vmatpush3.msra.mxu0 %v4212_v3  ;;  %v4205_v3 = vld [vmem:[%s7917_s8 + $0x600] sm:$0xff] }
 0xb24   :  { %4822 = vmatprep.subr.mxu0 %v4227_v58  ;;  %v4245_v58 = vld [vmem:[%s7917_s8 + $0x740] sm:$0xff] }
 0xb25   :  { %4823 = vmatpush3.msra.mxu0 %v4211_v23  ;;  %v4260_v23 = vld [vmem:[%s7917_s8 + $0x7b8] sm:$0xff] }
 0xb26   :  { %4824 = vmatprep.subr.mxu0 %v4226_v33  ;;  %v4244_v33 = vld [vmem:[%s7917_s8 + $0x738] sm:$0xff] }
 0xb27   :  { %4825 = vmatpush3.msra.mxu0 %v4210_v51  ;;  %v4259_v51 = vld [vmem:[%s7917_s8 + $0x7b0] sm:$0xff] }
 0xb28   :  { %4826 = vmatprep.subr.mxu0 %v4225_v14  ;;  %v4243_v14 = vld [vmem:[%s7917_s8 + $0x730] sm:$0xff] }
 0xb29   :  { %4827 = vmatpush3.msra.mxu0 %v4209_v49  ;;  %v4258_v49 = vld [vmem:[%s7917_s8 + $0x7a8] sm:$0xff] }
 0xb2a   :  { %4828 = vmatprep.subr.mxu0 %v4224_v61  ;;  %v4242_v61 = vld [vmem:[%s7917_s8 + $0x728] sm:$0xff] }
 0xb2b   :  { %4829 = vmatpush3.msra.mxu0 %v4208_v1  ;;  %v4257_v1 = vld [vmem:[%s7917_s8 + $0x7a0] sm:$0xff] }
 0xb2c   :  { %4830 = vmatprep.subr.mxu0 %v4223_v4 }
 0xb2d   :  { %4831 = vmatpush3.msra.mxu0 %v4207_v19 }
 0xb2e   :  { %4832 = vmatprep.subr.mxu0 %v4222_v26 }
 0xb2f   :  { %4833 = vmatpush3.msra.mxu0 %v4206_v38 }
 0xb30   :  { %4834 = vmatprep.subr.mxu0 %v4221_v25 }
 0xb31   :  { %4835 = vmatpush3.msra.mxu0 %v4205_v3 }
 0xbcc   :  { %v5307_v40 = vpop.f32.mrf.mxu1 }
 0xbce   :  { %v2977_v42 = vpop.f32.mrf.mxu1 }
 0xbcf   :  { %4197 = vmatmul.mubr.msk.f32.vlgmr.msra.gmra.mxu1 %vm342_vm0, %v2977_v42  ;;  %v4272_v42 = vld [vmem:[%s7918_s9 + $0x78] sm:$0xff] }
 0xbd0   :  { %3110 = vmatprep.mubr.f32.mxu1 %v7986_v13  ;;  %4849 = vmatpush3.msra.mxu1 %v4252_v63  ;;  %v5310_v21 = vpop.f32.mrf.mxu1  ;;  %v4256_v63 = vld [vmem:[%s7917_s8 + $0x798] sm:$0xff] }
 0xbd1   :  { %4850 = vmatprep.subr.mxu1 %v4267_v20  ;;  %5317 = vmatprep.subr.mxu0 %v4272_v42  ;;  %v4240_v20 = vld [vmem:[%s7917_s8 + $0x718] sm:$0xff] }
 0xbd2   :  { %4851 = vmatpush3.msra.mxu1 %v4251_v45  ;;  %v2987_v11 = vpop.f32.mrf.mxu1  ;;  %v4255_v45 = vld [vmem:[%s7917_s8 + $0x790] sm:$0xff] }
 0xbd3   :  { %4198 = vmatmul.mubr.msk.f32.gmra.mxu1 %vm342_vm0, %v5307_v40  ;;  %4852 = vmatprep.subr.mxu1 %v4266_v9  ;;  %v4241_v40 = vld [vmem:[%s7917_s8 + $0x720] sm:$0xff]  ;;  %v4239_v9 = vld [vmem:[%s7917_s8 + $0x710] sm:$0xff] }
 0xbd4   :  { %3116 = vmatprep.mubr.f32.mxu1 %v7986_v13  ;;  %4853 = vmatpush3.msra.mxu1 %v4250_v36  ;;  %v5313_v22 = vpop.f32.mrf.mxu1  ;;  %v4254_v36 = vld [vmem:[%s7917_s8 + $0x788] sm:$0xff] }
 0xbd5   :  { %4854 = vmatprep.subr.mxu1 %v4265_v41  ;;  %v4253_v41 = vld [vmem:[%s7917_s8 + $0x780] sm:$0xff] }
 0xbd6   :  { %4855 = vmatpush3.msra.mxu1 %v4249_v31  ;;  %v2997_v12 = vpop.f32.mrf.mxu1  ;;  %v4237_v31 = vld [vmem:[%s7917_s8 + $0x700] sm:$0xff] }
 0xbd7   :  { %4199 = vmatmul.mubr.msk.f32.gmra.mxu1 %vm342_vm0, %v2987_v11  ;;  %4856 = vmatprep.subr.mxu1 %v4264_v34 }
 0xbd8   :  { %3122 = vmatprep.mubr.f32.mxu1 %v7986_v13  ;;  %4857 = vmatpush3.msra.mxu1 %v4248_v27  ;;  %v5316_v5 = vpop.f32.mrf.mxu1 }
 0xbd9   :  { %4858 = vmatprep.subr.mxu1 %v4263_v30  ;;  %v4270_v30 = vld [vmem:[%s7918_s9 + $0x68] sm:$0xff] }
 0xbda   :  { %v3007_v28 = vpop.f32.mrf.mxu1  ;;  %4859 = vmatpush3.msra.mxu1 %v4247_v7 }
 0xbdb   :  { %4200 = vmatmul.mubr.msk.f32.gmra.mxu1 %vm342_vm0, %v5310_v21  ;;  %4860 = vmatprep.subr.mxu1 %v4262_v29  ;;  %v4238_v21 = vld [vmem:[%s7917_s8 + $0x708] sm:$0xff] }
 0xbdc   :  { %3128 = vmatprep.mubr.f32.mxu1 %v7986_v13  ;;  %4861 = vmatpush3.msra.mxu1 %v4246_v35 }
 0xbdd   :  { %4862 = vmatprep.subr.mxu1 %v4261_v60 }
 0xbde   :  { %4863 = vmatpush3.msra.mxu1 %v4245_v58 }
 0xbdf   :  { %4201 = vmatmul.mubr.msk.f32.gmra.mxu1 %vm342_vm0, %v2997_v12  ;;  %4864 = vmatprep.subr.mxu1 %v4260_v23 }
 0xbe0   :  { %3134 = vmatprep.mubr.f32.mxu1 %v7986_v13  ;;  %4865 = vmatpush3.msra.mxu1 %v4244_v33 }
 0xbe1   :  { %4866 = vmatprep.subr.mxu1 %v4259_v51 }
 0xbe2   :  { %4867 = vmatpush3.msra.mxu1 %v4243_v14 }
 0xbe3   :  { %4202 = vmatmul.mubr.msk.f32.gmra.mxu1 %vm342_vm0, %v5313_v22  ;;  %4868 = vmatprep.subr.mxu1 %v4258_v49 }
 0xbe4   :  { %3140 = vmatprep.mubr.f32.mxu1 %v7986_v13  ;;  %4869 = vmatpush3.msra.mxu1 %v4242_v61 }
 0xbe5   :  { %4870 = vmatprep.subr.mxu1 %v4257_v1 }
 0xbe6   :  { %4871 = vmatpush3.msra.mxu1 %v4241_v40 }
 0xbe7   :  { %4203 = vmatmul.mubr.msk.f32.gmra.mxu1 %vm342_vm0, %v3007_v28  ;;  %4872 = vmatprep.subr.mxu1 %v4256_v63 }
 0xbe8   :  { %3146 = vmatprep.mubr.f32.mxu1 %v7986_v13  ;;  %4873 = vmatpush3.msra.mxu1 %v4240_v20 }
 0xbe9   :  { %4874 = vmatprep.subr.mxu1 %v4255_v45 }
 0xbea   :  { %4875 = vmatpush3.msra.mxu1 %v4239_v9 }
 0xbeb   :  { %4204 = vmatmul.mubr.msk.f32.gmra.mxu1 %vm342_vm0, %v5316_v5  ;;  %4876 = vmatprep.subr.mxu1 %v4254_v36  ;;  %v4271_v5 = vld [vmem:[%s7918_s9 + $0x70] sm:$0xff] }
 0xbec   :  { %4877 = vmatpush3.msra.mxu1 %v4238_v21 }
 0xbed   :  { %4878 = vmatprep.subr.mxu1 %v4253_v41 }
 0xbee   :  { %4879 = vmatpush3.msra.mxu1 %v4237_v31 }
 0xc8f   :  { %v3106_v34 = vpop.f32.mrf.mxu1 }
 0xc90   :  { %v3153_v22 = vmul.f32 %v7131_v39, %v3106_v34  ;;  %v4269_v39 = vld [vmem:[%s7918_s9 + $0x60] sm:$0xff] }
 0xc91   :  { %v3108_v27 = vpop.f32.mrf.mxu1 }
 0xc92   :  { %v3154_v11 = vmul.f32 %v7125_v37, %v3108_v27 }
 0xc93   :  { %v3112_v12 = vpop.f32.mrf.mxu1 }
 0xc94   :  { %3298 = vmatprep.mubr.f32.mxu0 %v3154_v11  ;;  %v3155_v19 = vmul.f32 %v7149_v2, %v3112_v12 }
 0xc95   :  { %v3114_v28 = vpop.f32.mrf.mxu1  ;;  %3299 = vmatmul.mubr.f32.vlgmr.msra.gmra.mxu0 %v3153_v22 }
 0xc96   :  { %v3156_v4 = vmul.f32 %v7140_v52, %v3114_v28  ;;  %5318 = vmatpush3.msra.mxu0 %v4272_v42  ;;  %v8034_v28 = vld [vmem:[#allocation12_spill] sm:$0xff] }
 0xc97   :  { %v3118_v37 = vpop.f32.mrf.mxu1  ;;  %5319 = vmatprep.subr.mxu0 %v4271_v5 }
 0xc98   :  { %3303 = vmatprep.mubr.f32.mxu0 %v3156_v4  ;;  %5320 = vmatpush3.msra.mxu0 %v4271_v5  ;;  %v3157_v26 = vmul.f32 %v7164_v44, %v3118_v37  ;;  %v8035_v4 = vld [vmem:[#allocation13_spill] sm:$0xff]  ;;  %v8038_v37 = vld [vmem:[#allocation16_spill] sm:$0xff] }
 0xc99   :  { %v3120_v7 = vpop.f32.mrf.mxu1  ;;  %3304 = vmatmul.mubr.f32.gmra.mxu0 %v3155_v19  ;;  %5321 = vmatprep.subr.mxu0 %v4270_v30  ;;  %v8037_v19 = vld [vmem:[#allocation15_spill] sm:$0xff] }
 0xc9a   :  { %v3158_v52 = vmul.f32 %v7158_v24, %v3120_v7  ;;  %5322 = vmatpush3.msra.mxu0 %v4270_v30  ;;  %v8036_v30 = vld [vmem:[#allocation14_spill] sm:$0xff] }
 0xc9b   :  { %v3124_v29 = vpop.f32.mrf.mxu1  ;;  %5323 = vmatprep.subr.mxu0 %v4269_v39  ;;  %v8040_v7 = vld [vmem:[#allocation18_spill] sm:$0xff] }
 0xc9c   :  { %3308 = vmatprep.mubr.f32.mxu0 %v3158_v52  ;;  %5324 = vmatpush3.msra.mxu0 %v4269_v39  ;;  %v3159_v35 = vmul.f32 %v7176_v56, %v3124_v29  ;;  %v8028_v56 = vld [vmem:[#allocation6_spill] sm:$0xff]  ;;  %v8039_v39 = vld [vmem:[#allocation17_spill] sm:$0xff]  ;;  %v8041_v52 = vld [vmem:[#allocation19_spill] sm:$0xff] }
 0xc9d   :  { %v3126_v2 = vpop.f32.mrf.mxu1  ;;  %3309 = vmatmul.mubr.f32.gmra.mxu0 %v3157_v26  ;;  %5381 = vmatprep.subr.mxu0 %v7986_v13  ;;  %v8042_v26 = vld [vmem:[#allocation20_spill] sm:$0xff]  ;;  %v8043_v29 = vld [vmem:[#allocation21_spill] sm:$0xff] }
 0xc9e   :  { %v3160_v38 = vmul.f32 %v7170_v8, %v3126_v2  ;;  %v8044_v2 = vld [vmem:[#allocation22_spill] sm:$0xff] }
 0xc9f   :  { %v3130_v25 = vpop.f32.mrf.mxu1 }
 0xca0   :  { %3313 = vmatprep.mubr.f32.mxu0 %v3160_v38  ;;  %v3161_v44 = vmul.f32 %v7190_v0, %v3130_v25  ;;  %v8029_v0 = vld [vmem:[#allocation7_spill] sm:$0xff]  ;;  %v8047_v25 = vld [vmem:[#allocation25_spill] sm:$0xff] }
 0xca1   :  { %v3132_v60 = vpop.f32.mrf.mxu1  ;;  %3314 = vmatmul.mubr.f32.gmra.mxu0 %v3159_v35  ;;  %v8045_v38 = vld [vmem:[#allocation23_spill] sm:$0xff]  ;;  %v8046_v35 = vld [vmem:[#allocation24_spill] sm:$0xff] }
 0xca2   :  { %v3162_v24 = vmul.f32 %v7182_v18, %v3132_v60  ;;  %5325 = vmatprep.mubr.msk.f32.mxu0 %vm342_vm0, %v7481_v46  ;;  %v8048_v60 = vld [vmem:[#allocation26_spill] sm:$0xff] }
 0xca3   :  { %v3136_v3 = vpop.f32.mrf.mxu1 }
 0xca4   :  { %3383 = vmatprep.mubr.f32.mxu1 %v3162_v24  ;;  %v3163_v23 = vmul.f32 %v8028_v56, %v3136_v3 }
 0xca5   :  { %v3138_v58 = vpop.f32.mrf.mxu1  ;;  %3384 = vmatmul.mubr.f32.vlgmr.msra.gmra.mxu1 %v3161_v44  ;;  %5326 = vmatmul.mubr.msk.f32.vlgmr.msra.gmra.mxu0 %vm342_vm0, %v7477_v59  ;;  %v8030_v59 = vld [vmem:[#allocation8_spill] sm:$0xff] }
 0xca6   :  { %v3164_v8 = vmul.f32 %v7198_v47, %v3138_v58  ;;  %5328 = vmatprep.mubr.msk.f32.mxu0 %vm342_vm0, %v7473_v10  ;;  %v8031_v10 = vld [vmem:[#allocation9_spill] sm:$0xff] }
 0xca7   :  { %v3142_v18 = vpop.f32.mrf.mxu1 }
 0xca8   :  { %3388 = vmatprep.mubr.f32.mxu1 %v3164_v8  ;;  %v3165_v51 = vmul.f32 %v8030_v59, %v3142_v18 }
 0xca9   :  { %v3144_v33 = vpop.f32.mrf.mxu1  ;;  %3389 = vmatmul.mubr.f32.gmra.mxu1 %v3163_v23  ;;  %5329 = vmatmul.mubr.msk.f32.gmra.mxu0 %vm342_vm0, %v7468_v15  ;;  %v8032_v15 = vld [vmem:[#allocation10_spill] sm:$0xff] }
 0xcaa   :  { %v3166_v46 = vmul.f32 %v8029_v0, %v3144_v33  ;;  %5331 = vmatprep.mubr.msk.f32.mxu0 %vm342_vm0, %v7463_v55  ;;  %v8033_v55 = vld [vmem:[#allocation11_spill] sm:$0xff] }
 0xcab   :  { %v3148_v47 = vpop.f32.mrf.mxu1 }
 0xcac   :  { %3393 = vmatprep.mubr.f32.mxu1 %v3166_v46  ;;  %v3167_v61 = vmul.f32 %v8032_v15, %v3148_v47 }
 0xcad   :  { %v3150_v14 = vpop.f32.mrf.mxu1  ;;  %3394 = vmatmul.mubr.f32.gmra.mxu1 %v3165_v51  ;;  %5332 = vmatmul.mubr.msk.f32.gmra.mxu0 %vm342_vm0, %v7456_v6 }
 0xcae   :  { %v3168_v49 = vmul.f32 %v8031_v10, %v3150_v14  ;;  %5334 = vmatprep.mubr.msk.f32.mxu0 %vm342_vm0, %v7449_v50 }
 0xcb0   :  { %3398 = vmatprep.mubr.f32.mxu1 %v3168_v49 }
 0xcb1   :  { %3399 = vmatmul.mubr.f32.gmra.mxu1 %v3167_v61  ;;  %5335 = vmatmul.mubr.msk.f32.gmra.mxu0 %vm342_vm0, %v7442_v57 }
 0xcb2   :  { %5337 = vmatprep.mubr.msk.f32.mxu0 %vm342_vm0, %v7435_v32  ;;  %5357 = vmatprep.mubr.msk.f32.mxu1 %vm342_vm0, %v8033_v55 }
 0xcb5   :  { %5338 = vmatmul.mubr.msk.f32.gmra.mxu0 %vm342_vm0, %v7429_v43 }
 0xcb6   :  { %5340 = vmatprep.mubr.msk.f32.mxu0 %vm342_vm0, %v7423_v54 }
 0xcb9   :  { %5341 = vmatmul.mubr.msk.f32.gmra.mxu0 %vm342_vm0, %v7418_v16 }
 0xcba   :  { %5343 = vmatprep.mubr.msk.f32.mxu0 %vm342_vm0, %v7413_v48 }
 0xcbd   :  { %5344 = vmatmul.mubr.msk.f32.gmra.mxu0 %vm342_vm0, %v7408_v62 }
 0xcbe   :  { %5346 = vmatprep.mubr.msk.f32.mxu0 %vm342_vm0, %v7403_v17 }
 0xcc1   :  { %5347 = vmatmul.mubr.msk.f32.gmra.mxu0 %vm342_vm0, %v7399_v53 }
 0xcc2   :  { %5413 = vmatprep.mubr.msk.f32.mxu0 %vm5499_vm1, %v7986_v13 }
 0xd55   :  { %v4836_v32 = vpop.f32.mrf.mxu0 }
 0xd57   :  { %v4837_v43 = vpop.f32.mrf.mxu0 }
 0xd58   :  { %v4838_v22 = vadd.f32 %v4837_v43, %v4836_v32 }
 0xd59   :  { %v4839_v57 = vpop.f32.mrf.mxu0 }
 0xd5b   :  { %v4840_v50 = vpop.f32.mrf.mxu0 }
 0xd5c   :  { %v4841_v34 = vadd.f32 %v4840_v50, %v4839_v57 }
 0xd5d   :  { %v4842_v54 = vpop.f32.mrf.mxu0 }
 0xd5f   :  { %v4843_v16 = vpop.f32.mrf.mxu0 }
 0xd60   :  { %v4844_v53 = vadd.f32 %v4843_v16, %v4842_v54 }
 0xd61   :  { %v4845_v48 = vpop.f32.mrf.mxu0 }
 0xd63   :  { %v4846_v62 = vpop.f32.mrf.mxu0 }
 0xd64   :  { %v4847_v17 = vadd.f32 %v4846_v62, %v4845_v48 }
 0xd65   :  { %v4880_v6 = vpop.f32.mrf.mxu1  ;;  %v7814_v24 = vpop.f32.mrf.mxu0 }
 0xd67   :  { %v4881_v1 = vpop.f32.mrf.mxu1  ;;  %v7816_v44 = vpop.f32.mrf.mxu0 }
 0xd68   :  { %v4882_v27 = vadd.f32 %v4881_v1, %v4880_v6 }
 0xd69   :  { %v4883_v40 = vpop.f32.mrf.mxu1  ;;  %v7818_v3 = vpop.f32.mrf.mxu0 }
 0xd6a   :  { %v3386_v5 = vadd.f32 %v4882_v27, %v4838_v22 }
 0xd6b   :  { %v4884_v63 = vpop.f32.mrf.mxu1  ;;  %v7820_v58 = vpop.f32.mrf.mxu0 }
 0xd6c   :  { %v4885_v41 = vadd.f32 %v4884_v63, %v4883_v40 }
 0xd6d   :  { %v4886_v42 = vpop.f32.mrf.mxu1  ;;  %v7822_v8 = vpop.f32.mrf.mxu0 }
 0xd6e   :  { %v3391_v12 = vadd.f32 %v4885_v41, %v4841_v34 }
 0xd6f   :  { %v4887_v20 = vpop.f32.mrf.mxu1  ;;  %v7824_v56 = vpop.f32.mrf.mxu0 }
 0xd70   :  { %v4888_v36 = vadd.f32 %v4887_v20, %v4886_v42  ;;  %v7841_v20 = vld [vmem:[%s7919_s10 + $0x3] ss:$0 sm:$0xff] }
 0xd71   :  { %v4889_v45 = vpop.f32.mrf.mxu1  ;;  %v5336_v23 = vpop.f32.mrf.mxu0 }
 0xd72   :  { %v3396_v11 = vadd.f32 %v4888_v36, %v4844_v53 }
 0xd73   :  { %v4890_v9 = vpop.f32.mrf.mxu1  ;;  %v7826_v18 = vpop.f32.mrf.mxu0 }
 0xd74   :  { %v4891_v21 = vadd.f32 %v4890_v9, %v4889_v45 }
 0xd75   :  { %v5339_v0 = vpop.f32.mrf.mxu0 }
 0xd76   :  { %v3401_v31 = vadd.f32 %v4891_v21, %v4847_v17 }
 0xd77   :  { %v3563_v51 = vpop.f32.mrf.mxu0 }
 0xd78   :  { %5349 = vmatprep.subr.mxu1 %v3401_v31 }
 0xd79   :  { %5350 = vmatpush3.msra.mxu1 %v3401_v31  ;;  %v5342_v10 = vpop.f32.mrf.mxu0 }
 0xd7a   :  { %5351 = vmatprep.subr.mxu1 %v3396_v11 }
 0xd7b   :  { %5352 = vmatpush3.msra.mxu1 %v3396_v11  ;;  %v3573_v61 = vpop.f32.mrf.mxu0 }
 0xd7c   :  { %5353 = vmatprep.subr.mxu1 %v3391_v12 }
 0xd7d   :  { %5354 = vmatpush3.msra.mxu1 %v3391_v12  ;;  %v5345_v43 = vpop.f32.mrf.mxu0 }
 0xd7e   :  { %5355 = vmatprep.subr.mxu1 %v3386_v5 }
 0xd7f   :  { %5356 = vmatpush3.msra.mxu1 %v3386_v5  ;;  %v3583_v54 = vpop.f32.mrf.mxu0 }
 0xd80   :  { %5358 = vmatmul.mubr.msk.f32.vlgmr.msra.gmra.mxu1 %vm342_vm0, %v8034_v28 }
 0xd81   :  { %5360 = vmatprep.mubr.msk.f32.mxu1 %vm342_vm0, %v8035_v4  ;;  %v5348_v16 = vpop.f32.mrf.mxu0 }
 0xd83   :  { %v3593_v42 = vpop.f32.mrf.mxu0 }
 0xd84   :  { %5361 = vmatmul.mubr.msk.f32.gmra.mxu1 %vm342_vm0, %v8036_v30 }
 0xd85   :  { %5363 = vmatprep.mubr.msk.f32.mxu1 %vm342_vm0, %v8037_v19 }
 0xd88   :  { %5364 = vmatmul.mubr.msk.f32.gmra.mxu1 %vm342_vm0, %v8038_v37 }
 0xd89   :  { %5366 = vmatprep.mubr.msk.f32.mxu1 %vm342_vm0, %v8039_v39 }
 0xd8c   :  { %5367 = vmatmul.mubr.msk.f32.gmra.mxu1 %vm342_vm0, %v8040_v7 }
 0xd8d   :  { %5369 = vmatprep.mubr.msk.f32.mxu1 %vm342_vm0, %v8041_v52 }
 0xd90   :  { %5370 = vmatmul.mubr.msk.f32.gmra.mxu1 %vm342_vm0, %v8042_v26 }
 0xd91   :  { %5372 = vmatprep.mubr.msk.f32.mxu1 %vm342_vm0, %v8043_v29 }
 0xd94   :  { %5373 = vmatmul.mubr.msk.f32.gmra.mxu1 %vm342_vm0, %v8044_v2 }
 0xd95   :  { %5375 = vmatprep.mubr.msk.f32.mxu1 %vm342_vm0, %v8045_v38 }
 0xd98   :  { %5376 = vmatmul.mubr.msk.f32.gmra.mxu1 %vm342_vm0, %v8046_v35 }
 0xd99   :  { %5378 = vmatprep.mubr.msk.f32.mxu1 %vm342_vm0, %v8047_v25 }
 0xd9c   :  { %5379 = vmatmul.mubr.msk.f32.gmra.mxu1 %vm342_vm0, %v8048_v60 }
 0xe40   :  { %v7828_v33 = vpop.f32.mrf.mxu1 }
 0xe42   :  { %v7830_v46 = vpop.f32.mrf.mxu1 }
 0xe44   :  { %v7832_v59 = vpop.f32.mrf.mxu1 }
 0xe46   :  { %v7834_v47 = vpop.f32.mrf.mxu1 }
 0xe48   :  { %v5365_v14 = vpop.f32.mrf.mxu1 }
 0xe49   :  { %v3694_v35 = vadd.f32 %v5365_v14, %v7822_v8  ;;  %v3684_v8 = vadd.f32 %v7832_v59, %v7818_v3  ;;  %v3674_v3 = vadd.f32 %v7828_v33, %v7814_v24 }
 0xe4a   :  { %v7836_v49 = vpop.f32.mrf.mxu1 }
 0xe4c   :  { %v5368_v15 = vpop.f32.mrf.mxu1 }
 0xe4d   :  { %v3704_v7 = vadd.f32 %v5368_v15, %v5336_v23  ;;  %v3760_v23 = vadd.f32 %v7841_v20, %v3694_v35 }
 0xe4e   :  { %v3698_v55 = vpop.f32.mrf.mxu1 }
 0xe4f   :  { %v3762_v29 = vadd.f32 %v7841_v20, %v3704_v7  ;;  %v3699_v2 = vadd.f32 %v3698_v55, %v7826_v18 }
 0xe50   :  { %v5371_v32 = vpop.f32.mrf.mxu1 }
 0xe51   :  { %v3714_v28 = vadd.f32 %v5371_v32, %v5339_v0  ;;  %v3778_v25 = vmax.f32 %v3762_v29, 0.0  ;;  %v3761_v60 = vadd.f32 %v7841_v20, %v3699_v2  ;;  %v3689_v0 = vadd.f32 %v7836_v49, %v7824_v56  ;;  %v3787_v32 = vld [vmem:[%s7920_s11] sm:$0x1] }
 0xe52   :  { %v3708_v57 = vpop.f32.mrf.mxu1  ;;  %v3679_v56 = vadd.f32 %v7834_v47, %v7820_v58  ;;  %v3669_v58 = vadd.f32 %v7830_v46, %v7816_v44  ;;  %v3794_v44 = vlaneseq }
 0xe53   :  { %v3764_v19 = vadd.f32 %v7841_v20, %v3714_v28  ;;  %v3709_v37 = vadd.f32 %v3708_v57, %v3563_v51  ;;  %v3777_v18 = vmax.f32 %v3761_v60, 0.0  ;;  %v3776_v51 = vmax.f32 %v3760_v23, 0.0  ;;  %v3792_v57 = vpop.permute.xlu0 %3791 }
 0xe54   :  { %v5374_v50 = vpop.f32.mrf.mxu1  ;;  %v3759_v14 = vadd.f32 %v7841_v20, %v3689_v0  ;;  %v3757_v15 = vadd.f32 %v7841_v20, %v3679_v56  ;;  %v3755_v24 = vadd.f32 %v7841_v20, %v3669_v58  ;;  %v3795_v46 = vshrl.u32 %v3794_v44, 7 }
 0xe55   :  { %v3724_v34 = vadd.f32 %v5374_v50, %v5342_v10  ;;  %v3780_v52 = vmax.f32 %v3764_v19, 0.0  ;;  %v3763_v26 = vadd.f32 %v7841_v20, %v3709_v37  ;;  %v3758_v10 = vadd.f32 %v7841_v20, %v3684_v8 }
 0xe56   :  { %v3718_v6 = vpop.f32.mrf.mxu1  ;;  %v3775_v49 = vmax.f32 %v3759_v14, 0.0  ;;  %v3773_v47 = vmax.f32 %v3757_v15, 0.0  ;;  %v3771_v33 = vmax.f32 %v3755_v24, 0.0 }
 0xe57   :  { %v3766_v22 = vadd.f32 %v7841_v20, %v3724_v34  ;;  %v3719_v12 = vadd.f32 %v3718_v6, %v3573_v61  ;;  %v3779_v38 = vmax.f32 %v3763_v26, 0.0  ;;  %v3774_v59 = vmax.f32 %v3758_v10, 0.0 }
 0xe58   :  { %v5377_v1 = vpop.f32.mrf.mxu1  ;;  %v3756_v61 = vadd.f32 %v7841_v20, %v3674_v3 }
 0xe59   :  { %v3734_v17 = vadd.f32 %v5377_v1, %v5345_v43  ;;  %v3782_v4 = vmax.f32 %v3766_v22, 0.0  ;;  %v3765_v30 = vadd.f32 %v7841_v20, %v3719_v12  ;;  %v3796_v43 = vsub.s32 0, %v3795_v46 }
 0xe5a   :  { %v3728_v40 = vpop.f32.mrf.mxu1  ;;  %v3772_v55 = vmax.f32 %v3756_v61, 0.0 }
 0xe5b   :  { %v3768_v53 = vadd.f32 %v7841_v20, %v3734_v17  ;;  %v3729_v41 = vadd.f32 %v3728_v40, %v3583_v54  ;;  %v3781_v39 = vmax.f32 %v3765_v30, 0.0  ;;  %v3797_v50 = vrot.slane %v3792_v57, %v3796_v43 }
 0xe5c   :  { %v5380_v63 = vpop.f32.mrf.mxu1 }
 0xe5d   :  { %v3744_v48 = vadd.f32 %v5380_v63, %v5348_v16  ;;  %v3784_v27 = vmax.f32 %v3768_v53, 0.0  ;;  %v3767_v11 = vadd.f32 %v7841_v20, %v3729_v41 }
 0xe5e   :  { %v3738_v62 = vpop.f32.mrf.mxu1 }
 0xe5f   :  { %v3770_v45 = vadd.f32 %v7841_v20, %v3744_v48  ;;  %v3739_v9 = vadd.f32 %v3738_v62, %v3593_v42  ;;  %v3783_v5 = vmax.f32 %v3767_v11, 0.0 }
 0xe61   :  { %v3786_v36 = vmax.f32 %v3770_v45, 0.0  ;;  %v3769_v21 = vadd.f32 %v7841_v20, %v3739_v9 }
 0xe63   :  { %5382 = vmatpush3.xpose.msk.msra.mxu0 %vm342_vm0, %v3786_v36  ;;  %v3785_v31 = vmax.f32 %v3769_v21, 0.0 }
 0xe64   :  { %5383 = vmatprep.subr.mxu0 %v7986_v13 }
 0xe67   :  { %5384 = vmatpush3.xpose.msk.msra.mxu0 %vm342_vm0, %v3785_v31 }
 0xe68   :  { %5385 = vmatprep.subr.mxu0 %v7986_v13 }
 0xe6b   :  { %5386 = vmatpush3.xpose.msk.msra.mxu0 %vm342_vm0, %v3784_v27 }
 0xe6c   :  { %5387 = vmatprep.subr.mxu0 %v7986_v13 }
 0xe6f   :  { %5388 = vmatpush3.xpose.msk.msra.mxu0 %vm342_vm0, %v3783_v5 }
 0xe70   :  { %5389 = vmatprep.subr.mxu0 %v7986_v13 }
 0xe73   :  { %5390 = vmatpush3.xpose.msk.msra.mxu0 %vm342_vm0, %v3782_v4 }
 0xe74   :  { %5391 = vmatprep.subr.mxu0 %v7986_v13 }
 0xe77   :  { %5392 = vmatpush3.xpose.msk.msra.mxu0 %vm342_vm0, %v3781_v39 }
 0xe78   :  { %5393 = vmatprep.subr.mxu0 %v7986_v13 }
 0xe7b   :  { %5394 = vmatpush3.xpose.msk.msra.mxu0 %vm342_vm0, %v3780_v52 }
 0xe7c   :  { %5395 = vmatprep.subr.mxu0 %v7986_v13 }
 0xe7f   :  { %5396 = vmatpush3.xpose.msk.msra.mxu0 %vm342_vm0, %v3779_v38 }
 0xe80   :  { %5397 = vmatprep.subr.mxu0 %v7986_v13 }
 0xe83   :  { %5398 = vmatpush3.xpose.msk.msra.mxu0 %vm342_vm0, %v3778_v25 }
 0xe84   :  { %5399 = vmatprep.subr.mxu0 %v7986_v13 }
 0xe87   :  { %5400 = vmatpush3.xpose.msk.msra.mxu0 %vm342_vm0, %v3777_v18 }
 0xe88   :  { %5401 = vmatprep.subr.mxu0 %v7986_v13 }
 0xe8b   :  { %5402 = vmatpush3.xpose.msk.msra.mxu0 %vm342_vm0, %v3776_v51 }
 0xe8c   :  { %5403 = vmatprep.subr.mxu0 %v7986_v13 }
 0xe8f   :  { %5404 = vmatpush3.xpose.msk.msra.mxu0 %vm342_vm0, %v3775_v49 }
 0xe90   :  { %5405 = vmatprep.subr.mxu0 %v7986_v13 }
 0xe93   :  { %5406 = vmatpush3.xpose.msk.msra.mxu0 %vm342_vm0, %v3774_v59 }
 0xe94   :  { %5407 = vmatprep.subr.mxu0 %v7986_v13 }
 0xe97   :  { %5408 = vmatpush3.xpose.msk.msra.mxu0 %vm342_vm0, %v3773_v47 }
 0xe98   :  { %5409 = vmatprep.subr.mxu0 %v7986_v13 }
 0xe9b   :  { %5410 = vmatpush3.xpose.msk.msra.mxu0 %vm342_vm0, %v3772_v55 }
 0xe9c   :  { %5411 = vmatprep.subr.mxu0 %v7986_v13 }
 0xe9f   :  { %5412 = vmatpush3.xpose.msk.msra.mxu0 %vm342_vm0, %v3771_v33 }
 0xea2   :  { %5414 = vmatmul.mubr.msk.f32.vlgmr.msra.gmra.mxu0 %vm342_vm0, %v3787_v32 }
 0xf62   :  { %v3915_v54 = vpop.f32.mrf.mxu0 }
 0xf63   :  { %v3916_v6 = vadd.f32 %v3915_v54, %v3797_v50 }
 0xf64   :  { %v5415_v13 = vpop.f32.mrf.mxu0 }
 0xf65   :  { %3919 = vst [vmem:[#allocation3] sm:$0x1] %v3916_v6 }
 0xf66   :  { %5486 = shalt.err (!%p5483_p4)
}
 0xf67   :  { %3929 = dma.vmem_to_hbm [thread:$0]  %s3927_s6, 16, %s7922_s13, [#allocation4]  }
 0xf68   :  { %5495 = dma.done.wait [#allocation4], 16  }
 0xf69   :  { %5496 = vsyncadd [#allocation4], 4294967280 }
 0xf6a   :  { %3933 = vsyncpa [#allocation4], 1 }

</bundles_post_ra>
